<compile_context>
chip_gen: v5e
topology: v5e:2x2
jax: 0.10.0
libtpu: 0.0.40
codegen_flags: <defaults>
</compile_context>

<pallas_src>
import functools

import jax
import jax.numpy as jnp
from jax.experimental import pallas as pl
from jax.experimental.pallas import tpu as pltpu

# ----------------------------- model dims (small synthetic T5) ----------------
B = 2            # batch
S_ENC = 8        # encoder (source) sequence length
S_DEC = 8        # decoder (target) sequence length
D_MODEL = 32
N_HEADS = 4
D_KV = D_MODEL // N_HEADS
D_FF = 64
VOCAB = 64
VPAD = 128       # lane-dense padded vocab (one-hot K, LM-head N, logits store)
NUM_BUCKETS = 32
MAX_DIST = 128
LN_EPS = 1e-6


# ----------------------------- in-kernel helpers -------------------------------
def _bdot(a, b):
    """MXU matmul: bf16 operands, f32 accumulation."""
    return jnp.dot(a.astype(jnp.bfloat16), b.astype(jnp.bfloat16),
                   preferred_element_type=jnp.float32)


def _rmsnorm(x, w):
    # T5 LayerNorm: no mean subtraction, f32 variance.
    var = jnp.mean(x * x, axis=-1, keepdims=True)
    return x * jax.lax.rsqrt(var + LN_EPS) * w


def _attn(q, k, v, w_o, bias, sq, sk):
    """All-heads attention: 2 batched einsums + 1 O-projection matmul.

    q: [sq, D_MODEL]  k, v: [sk, D_MODEL]  w_o: [D_MODEL, D_MODEL] (bf16)
    bias: [N_HEADS, sq, sk] f32 or None.  Returns [sq, D_MODEL] f32.
    """
    qh = q.reshape(sq, N_HEADS, D_KV).transpose(1, 0, 2).astype(jnp.bfloat16)
    kh = k.reshape(sk, N_HEADS, D_KV).transpose(1, 0, 2).astype(jnp.bfloat16)
    vh = v.reshape(sk, N_HEADS, D_KV).transpose(1, 0, 2).astype(jnp.bfloat16)
    # T5 attention: scores are NOT scaled by 1/sqrt(dk)
    s = jnp.einsum('hqd,hkd->hqk', qh, kh, preferred_element_type=jnp.float32)
    if bias is not None:
        s = s + bias
    m = jnp.max(s, axis=-1, keepdims=True)
    p = jnp.exp(s - m)
    p = p * pl.reciprocal(jnp.sum(p, axis=-1, keepdims=True), approx=True)
    ctx = jnp.einsum('hqk,hkd->hqd', p.astype(jnp.bfloat16), vh,
                     preferred_element_type=jnp.float32)          # [H, sq, dkv]
    ctx = ctx.transpose(1, 0, 2).reshape(sq, D_MODEL)
    return _bdot(ctx, w_o)


# ----------------------------- the fused kernel ---------------------------------
def _t5_fused_kernel(
    # per-example token ids / labels
    enc_ids_ref, labels_ref,
    # shared embedding (padded), its transpose, precomputed rel-pos biases
    shared_ref, shared_t_ref, enc_bias_ref, dec_bias_ref,
    # encoder layer weights
    e_ln1_ref, e_qkv_ref, e_o_ref, e_ln2_ref, e_wi_ref, e_wo_ref, e_lnf_ref,
    # decoder layer weights
    d_ln1_ref, d_sa_qkv_ref, d_sa_o_ref,
    d_ln2_ref, d_ca_q_ref, d_ca_kv_ref, d_ca_o_ref,
    d_ln3_ref, d_wi_ref, d_wo_ref, d_lnf_ref,
    # outputs
    logits_ref, loss_ref,
):
    shared = shared_ref[...]                                   # [VPAD, D] bf16

    # ------------------------------ encoder layer ------------------------------
    enc_ids = enc_ids_ref[0]                                   # [S_ENC, 1] int32
    col_e = jax.lax.broadcasted_iota(jnp.int32, (S_ENC, VPAD), 1)
    enc_oh = (col_e == enc_ids).astype(jnp.bfloat16)           # exact one-hot
    x = jnp.dot(enc_oh, shared, preferred_element_type=jnp.float32)  # [S_ENC, D]

    h = _rmsnorm(x, e_ln1_ref[...])
    qkv = _bdot(h, e_qkv_ref[...])                             # [S_ENC, 3D]
    q = qkv[:, :D_MODEL]
    k = qkv[:, D_MODEL:2 * D_MODEL]
    v = qkv[:, 2 * D_MODEL:]
    x = x + _attn(q, k, v, e_o_ref[...], enc_bias_ref[...], S_ENC, S_ENC)
    h = _rmsnorm(x, e_ln2_ref[...])
    x = x + _bdot(jnp.maximum(_bdot(h, e_wi_ref[...]), 0.0), e_wo_ref[...])
    enc_out = _rmsnorm(x, e_lnf_ref[...])                      # [S_ENC, D]

    # ------------- decoder: shift-right folded in (lane-dense one-hot) ---------
    lab = labels_ref[0]                                        # [S_DEC, 1], -100 = ignore
    clean = jnp.where(lab == -100, 0, lab)
    col_d = jax.lax.broadcasted_iota(jnp.int32, (S_DEC, VPAD), 1)
    row_d = jax.lax.broadcasted_iota(jnp.int32, (S_DEC, VPAD), 0)
    clean_oh = (col_d == clean).astype(jnp.bfloat16)           # [S_DEC, VPAD]
    r = jax.lax.broadcasted_iota(jnp.int32, (S_DEC, S_DEC), 0)
    c = jax.lax.broadcasted_iota(jnp.int32, (S_DEC, S_DEC), 1)
    shift = (r == c + 1).astype(jnp.bfloat16)                  # shift-right matrix
    dec_oh = jnp.dot(shift, clean_oh, preferred_element_type=jnp.float32)
    dec_oh = dec_oh + ((row_d == 0) & (col_d == 0)).astype(jnp.float32)  # start tok 0
    y = jnp.dot(dec_oh.astype(jnp.bfloat16), shared,
                preferred_element_type=jnp.float32)            # [S_DEC, D]

    # masked self-attention (causal mask folded into dec_bias)
    h = _rmsnorm(y, d_ln1_ref[...])
    qkv = _bdot(h, d_sa_qkv_ref[...])
    q = qkv[:, :D_MODEL]
    k = qkv[:, D_MODEL:2 * D_MODEL]
    v = qkv[:, 2 * D_MODEL:]
    y = y + _attn(q, k, v, d_sa_o_ref[...], dec_bias_ref[...], S_DEC, S_DEC)

    # cross-attention (no position bias)
    h = _rmsnorm(y, d_ln2_ref[...])
    q = _bdot(h, d_ca_q_ref[...])                              # [S_DEC, D]
    kv = _bdot(enc_out, d_ca_kv_ref[...])                      # [S_ENC, 2D]
    k = kv[:, :D_MODEL]
    v = kv[:, D_MODEL:]
    y = y + _attn(q, k, v, d_ca_o_ref[...], None, S_DEC, S_ENC)

    # FFN
    h = _rmsnorm(y, d_ln3_ref[...])
    y = y + _bdot(jnp.maximum(_bdot(h, d_wi_ref[...]), 0.0), d_wo_ref[...])
    dec_out = _rmsnorm(y, d_lnf_ref[...])                      # [S_DEC, D]

    # ------------------ tied LM head (pre-transposed) + cross-entropy ----------
    scaled = (dec_out * (D_MODEL ** -0.5)).astype(jnp.bfloat16)
    logits = jnp.dot(scaled, shared_t_ref[...],
                     preferred_element_type=jnp.float32)       # [S_DEC, VPAD]
    logits_ref[0] = logits                                     # lane-dense store

    ml = jnp.where(col_d < VOCAB, logits, jnp.float32(-1e9))   # mask pad vocab cols
    m = jnp.max(ml, axis=-1, keepdims=True)
    lse = m + jnp.log(jnp.sum(jnp.exp(ml - m), axis=-1, keepdims=True))
    tgt = jnp.sum(jnp.where(col_d == lab, ml, 0.0), axis=-1, keepdims=True)
    valid = (lab >= 0).astype(jnp.float32)                     # [S_DEC, 1]
    loss_sum = jnp.sum((lse - tgt) * valid, axis=0, keepdims=True)   # [1, 1]
    valid_sum = jnp.sum(valid, axis=0, keepdims=True)                # [1, 1]
    rowsel = jax.lax.broadcasted_iota(jnp.int32, (1, 2, 128), 1)
    loss_ref[...] = jnp.where(rowsel == 0, loss_sum[None], valid_sum[None])


# ----------------------------- forward wrapper ----------------------------------
def _const_spec(shape):
    zeros = (0,) * len(shape)
    return pl.BlockSpec(shape, lambda b, z=zeros: z)


_WEIGHT_ORDER = [
    "shared", "shared_t", "enc_bias", "dec_bias",
    "e_ln1", "e_qkv", "e_o", "e_ln2", "e_wi", "e_wo", "e_lnf",
    "d_ln1", "d_sa_qkv", "d_sa_o",
    "d_ln2", "d_ca_q", "d_ca_kv", "d_ca_o",
    "d_ln3", "d_wi", "d_wo", "d_lnf",
]


def t5_forward(prep, input_ids, labels):
    enc_ids = input_ids.reshape(B, S_ENC, 1).astype(jnp.int32)
    lab3 = labels.reshape(B, S_DEC, 1).astype(jnp.int32)
    weights = [prep[k] for k in _WEIGHT_ORDER]

    in_specs = [
        pl.BlockSpec((1, S_ENC, 1), lambda b: (b, 0, 0)),   # enc ids (per example)
        pl.BlockSpec((1, S_DEC, 1), lambda b: (b, 0, 0)),   # labels  (per example)
    ] + [_const_spec(w.shape) for w in weights]             # weights stay resident

    out_specs = (
        pl.BlockSpec((1, S_DEC, VPAD), lambda b: (b, 0, 0)),  # padded logits
        pl.BlockSpec((1, 2, 128), lambda b: (b, 0, 0)),       # [loss_sum, valid]
    )
    out_shape = (
        jax.ShapeDtypeStruct((B, S_DEC, VPAD), jnp.float32),
        jax.ShapeDtypeStruct((B, 2, 128), jnp.float32),
    )

    logits_pad, loss_parts = pl.pallas_call(
        _t5_fused_kernel,
        grid=(B,),
        in_specs=in_specs,
        out_specs=out_specs,
        out_shape=out_shape,
        compiler_params=pltpu.CompilerParams(
            dimension_semantics=("parallel",)),
    )(enc_ids, lab3, *weights)

    loss = jnp.sum(loss_parts[:, 0, 0]) / jnp.maximum(jnp.sum(loss_parts[:, 1, 0]), 1.0)
    return loss, logits_pad[:, :, :VOCAB]


# ----------------------------- position bias (host-side, input-independent) -----
def _rel_pos_bucket(relative_position, bidirectional, num_buckets=NUM_BUCKETS,
                    max_distance=MAX_DIST):
    rp = relative_position
    ret = jnp.zeros_like(rp)
    if bidirectional:
        num_buckets //= 2
        ret = ret + (rp > 0).astype(jnp.int32) * num_buckets
        n = jnp.abs(rp)
    else:
        n = -jnp.minimum(rp, 0)
    max_exact = num_buckets // 2
    is_small = n < max_exact
    n_safe = jnp.maximum(n, 1).astype(jnp.float32)
    val_if_large = max_exact + (
        jnp.log(n_safe / max_exact) / jnp.log(max_distance / max_exact)
        * (num_buckets - max_exact)
    ).astype(jnp.int32)
    val_if_large = jnp.minimum(val_if_large, num_buckets - 1)
    return ret + jnp.where(is_small, n, val_if_large)


def _compute_position_bias(qlen, klen, rel_embed, bidirectional):
    ctx = jnp.arange(qlen)[:, None]
    mem = jnp.arange(klen)[None, :]
    rp_bucket = _rel_pos_bucket(mem - ctx, bidirectional)        # [qlen, klen]
    values = rel_embed[rp_bucket]                                # [qlen, klen, H]
    return jnp.transpose(values, (2, 0, 1))                      # [H, qlen, klen]


# ----------------------------- parameter init / prep -----------------------------
def init_params(key):
    keys = iter(jax.random.split(key, 64))

    def dense(shape):
        return jax.random.normal(next(keys), shape, jnp.float32) * 0.05

    def attn_block():
        return {"q": dense((D_MODEL, N_HEADS * D_KV)),
                "k": dense((D_MODEL, N_HEADS * D_KV)),
                "v": dense((D_MODEL, N_HEADS * D_KV)),
                "o": dense((N_HEADS * D_KV, D_MODEL))}

    def ff_block():
        return {"wi": dense((D_MODEL, D_FF)), "wo": dense((D_FF, D_MODEL))}

    ones = jnp.ones((D_MODEL,), jnp.float32)
    return {
        "shared": dense((VOCAB, D_MODEL)),
        "enc": {
            "sa": attn_block(), "ff": ff_block(),
            "rel": dense((NUM_BUCKETS, N_HEADS)),
            "ln1": ones, "ln2": ones, "ln_f": ones,
        },
        "dec": {
            "sa": attn_block(), "ca": attn_block(), "ff": ff_block(),
            "rel": dense((NUM_BUCKETS, N_HEADS)),
            "ln1": ones, "ln2": ones, "ln3": ones, "ln_f": ones,
        },
    }


def prepare_params(params):
    """Host-side, input-independent prep: fused bf16 QKV weights, vocab-padded
    embedding table and its transpose, relative-position biases with the causal
    mask folded in for the decoder."""
    enc, dec = params["enc"], params["dec"]
    enc_bias = _compute_position_bias(S_ENC, S_ENC, enc["rel"], bidirectional=True)
    dec_bias = _compute_position_bias(S_DEC, S_DEC, dec["rel"], bidirectional=False)
    causal = jnp.where(
        jnp.arange(S_DEC)[:, None] >= jnp.arange(S_DEC)[None, :], 0.0, -1e9)
    dec_bias = dec_bias + causal[None]

    shared_pad = jnp.zeros((VPAD, D_MODEL), jnp.float32).at[:VOCAB].set(params["shared"])

    def bf(x):
        return x.astype(jnp.bfloat16)

    def fuse(*ws):
        return bf(jnp.concatenate(ws, axis=1))

    def ln(w):
        return w.reshape(1, D_MODEL)

    return {
        "shared": bf(shared_pad),            # [VPAD, D]  (rows >= VOCAB are zero)
        "shared_t": bf(shared_pad.T),        # [D, VPAD]  pre-transposed tied head
        "enc_bias": enc_bias.astype(jnp.float32),
        "dec_bias": dec_bias.astype(jnp.float32),
        # encoder
        "e_ln1": ln(enc["ln1"]), "e_ln2": ln(enc["ln2"]), "e_lnf": ln(enc["ln_f"]),
        "e_qkv": fuse(enc["sa"]["q"], enc["sa"]["k"], enc["sa"]["v"]),
        "e_o": bf(enc["sa"]["o"]),
        "e_wi": bf(enc["ff"]["wi"]), "e_wo": bf(enc["ff"]["wo"]),
        # decoder
        "d_ln1": ln(dec["ln1"]), "d_ln2": ln(dec["ln2"]),
        "d_ln3": ln(dec["ln3"]), "d_lnf": ln(dec["ln_f"]),
        "d_sa_qkv": fuse(dec["sa"]["q"], dec["sa"]["k"], dec["sa"]["v"]),
        "d_sa_o": bf(dec["sa"]["o"]),
        "d_ca_q": bf(dec["ca"]["q"]),
        "d_ca_kv": fuse(dec["ca"]["k"], dec["ca"]["v"]),
        "d_ca_o": bf(dec["ca"]["o"]),
        "d_wi": bf(dec["ff"]["wi"]), "d_wo": bf(dec["ff"]["wo"]),
    }


# ----------------------------- main ----------------------------------------------
if __name__ == "__main__":
    key = jax.random.PRNGKey(0)
    k_param, k_src, k_tgt = jax.random.split(key, 3)

    params = init_params(k_param)
    prep = prepare_params(params)

    # synthetic "tokenized" source / target ids (stand-in for the T5 tokenizer)
    input_ids = jax.random.randint(k_src, (B, S_ENC), 1, VOCAB, dtype=jnp.int32)
    labels = jax.random.randint(k_tgt, (B, S_DEC), 0, VOCAB, dtype=jnp.int32)
    # reproduce `labels[labels == 0] = -100`
    labels = jnp.where(labels == 0, -100, labels)

    fwd = jax.jit(functools.partial(t5_forward, prep))
    loss, logits = fwd(input_ids, labels)
    jax.block_until_ready((loss, logits))

    assert logits.shape == (B, S_DEC, VOCAB)
    assert bool(jnp.isfinite(loss))
    print("KERNEL_OK")
</pallas_src>

<mosaic_0001>
module attributes {stable_mosaic.version = 11 : i64} {
  func.func @_t5_fused_kernel(%arg0: i32, %arg1: memref<1x8x1xi32, #tpu.memory_space<vmem>>, %arg2: memref<1x8x1xi32, #tpu.memory_space<vmem>>, %arg3: memref<128x32xbf16, #tpu.memory_space<vmem>>, %arg4: memref<32x128xbf16, #tpu.memory_space<vmem>>, %arg5: memref<4x8x8xf32, #tpu.memory_space<vmem>>, %arg6: memref<4x8x8xf32, #tpu.memory_space<vmem>>, %arg7: memref<1x32xf32, #tpu.memory_space<vmem>>, %arg8: memref<32x96xbf16, #tpu.memory_space<vmem>>, %arg9: memref<32x32xbf16, #tpu.memory_space<vmem>>, %arg10: memref<1x32xf32, #tpu.memory_space<vmem>>, %arg11: memref<32x64xbf16, #tpu.memory_space<vmem>>, %arg12: memref<64x32xbf16, #tpu.memory_space<vmem>>, %arg13: memref<1x32xf32, #tpu.memory_space<vmem>>, %arg14: memref<1x32xf32, #tpu.memory_space<vmem>>, %arg15: memref<32x96xbf16, #tpu.memory_space<vmem>>, %arg16: memref<32x32xbf16, #tpu.memory_space<vmem>>, %arg17: memref<1x32xf32, #tpu.memory_space<vmem>>, %arg18: memref<32x32xbf16, #tpu.memory_space<vmem>>, %arg19: memref<32x64xbf16, #tpu.memory_space<vmem>>, %arg20: memref<32x32xbf16, #tpu.memory_space<vmem>>, %arg21: memref<1x32xf32, #tpu.memory_space<vmem>>, %arg22: memref<32x64xbf16, #tpu.memory_space<vmem>>, %arg23: memref<64x32xbf16, #tpu.memory_space<vmem>>, %arg24: memref<1x32xf32, #tpu.memory_space<vmem>>, %arg25: memref<1x8x128xf32, #tpu.memory_space<vmem>>, %arg26: memref<1x2x128xf32, #tpu.memory_space<vmem>>) attributes {dimension_semantics = [#tpu.dimension_semantics<parallel>], iteration_bounds = array<i64: 2>, scalar_prefetch = 0 : i64, scratch_operands = 0 : i64, tpu.core_type = #tpu.core_type<tc>, window_params = [{transform_indices = @transform_0, window_bounds = array<i64: 1, 8, 1>}, {transform_indices = @transform_1, window_bounds = array<i64: 1, 8, 1>}, {pipeline_mode = #tpu.pipeline_mode<synchronous>, transform_indices = @transform_2, window_bounds = array<i64: 128, 32>}, {pipeline_mode = #tpu.pipeline_mode<synchronous>, transform_indices = @transform_3, window_bounds = array<i64: 32, 128>}, {pipeline_mode = #tpu.pipeline_mode<synchronous>, transform_indices = @transform_4, window_bounds = array<i64: 4, 8, 8>}, {pipeline_mode = #tpu.pipeline_mode<synchronous>, transform_indices = @transform_5, window_bounds = array<i64: 4, 8, 8>}, {pipeline_mode = #tpu.pipeline_mode<synchronous>, transform_indices = @transform_6, window_bounds = array<i64: 1, 32>}, {pipeline_mode = #tpu.pipeline_mode<synchronous>, transform_indices = @transform_7, window_bounds = array<i64: 32, 96>}, {pipeline_mode = #tpu.pipeline_mode<synchronous>, transform_indices = @transform_8, window_bounds = array<i64: 32, 32>}, {pipeline_mode = #tpu.pipeline_mode<synchronous>, transform_indices = @transform_9, window_bounds = array<i64: 1, 32>}, {pipeline_mode = #tpu.pipeline_mode<synchronous>, transform_indices = @transform_10, window_bounds = array<i64: 32, 64>}, {pipeline_mode = #tpu.pipeline_mode<synchronous>, transform_indices = @transform_11, window_bounds = array<i64: 64, 32>}, {pipeline_mode = #tpu.pipeline_mode<synchronous>, transform_indices = @transform_12, window_bounds = array<i64: 1, 32>}, {pipeline_mode = #tpu.pipeline_mode<synchronous>, transform_indices = @transform_13, window_bounds = array<i64: 1, 32>}, {pipeline_mode = #tpu.pipeline_mode<synchronous>, transform_indices = @transform_14, window_bounds = array<i64: 32, 96>}, {pipeline_mode = #tpu.pipeline_mode<synchronous>, transform_indices = @transform_15, window_bounds = array<i64: 32, 32>}, {pipeline_mode = #tpu.pipeline_mode<synchronous>, transform_indices = @transform_16, window_bounds = array<i64: 1, 32>}, {pipeline_mode = #tpu.pipeline_mode<synchronous>, transform_indices = @transform_17, window_bounds = array<i64: 32, 32>}, {pipeline_mode = #tpu.pipeline_mode<synchronous>, transform_indices = @transform_18, window_bounds = array<i64: 32, 64>}, {pipeline_mode = #tpu.pipeline_mode<synchronous>, transform_indices = @transform_19, window_bounds = array<i64: 32, 32>}, {pipeline_mode = #tpu.pipeline_mode<synchronous>, transform_indices = @transform_20, window_bounds = array<i64: 1, 32>}, {pipeline_mode = #tpu.pipeline_mode<synchronous>, transform_indices = @transform_21, window_bounds = array<i64: 32, 64>}, {pipeline_mode = #tpu.pipeline_mode<synchronous>, transform_indices = @transform_22, window_bounds = array<i64: 64, 32>}, {pipeline_mode = #tpu.pipeline_mode<synchronous>, transform_indices = @transform_23, window_bounds = array<i64: 1, 32>}, {transform_indices = @transform_24, window_bounds = array<i64: 1, 8, 128>}, {transform_indices = @transform_25, window_bounds = array<i64: 1, 2, 128>}]} {
    %c0 = arith.constant 0 : index
    %c0_0 = arith.constant 0 : index
    %0 = vector.load %arg3[%c0, %c0_0] : memref<128x32xbf16, #tpu.memory_space<vmem>>, vector<128x32xbf16>
    %c0_1 = arith.constant 0 : index
    %c0_2 = arith.constant 0 : index
    %c0_3 = arith.constant 0 : index
    %1 = vector.load %arg1[%c0_1, %c0_2, %c0_3] : memref<1x8x1xi32, #tpu.memory_space<vmem>>, vector<1x8x1xi32>
    %2 = vector.shape_cast %1 : vector<1x8x1xi32> to vector<8x1xi32>
    %3 = tpu.iota {dimensions = array<i32: 1>} : vector<8x128xi32>
    %4 = vector.broadcast %2 : vector<8x1xi32> to vector<8x128xi32>
    %5 = arith.cmpi eq, %3, %4 : vector<8x128xi32>
    %6 = arith.extui %5 : vector<8x128xi1> to vector<8x128xi32>
    %7 = arith.sitofp %6 : vector<8x128xi32> to vector<8x128xf32>
    %8 = arith.truncf %7 : vector<8x128xf32> to vector<8x128xbf16>
    %cst = arith.constant dense<0.000000e+00> : vector<8x32xf32>
    %9 = tpu.matmul %8, %0, %cst {dimension_numbers = #tpu.dot_dimension_numbers<[1], [0], [0], [1], [0, 0, 1, 1], [], []>} : vector<8x128xbf16>, vector<128x32xbf16>, vector<8x32xf32> -> vector<8x32xf32>
    %c0_4 = arith.constant 0 : index
    %c0_5 = arith.constant 0 : index
    %10 = vector.load %arg7[%c0_4, %c0_5] : memref<1x32xf32, #tpu.memory_space<vmem>>, vector<1x32xf32>
    %11 = arith.mulf %9, %9 : vector<8x32xf32>
    %cst_6 = arith.constant dense<0.000000e+00> : vector<8xf32>
    %12 = vector.multi_reduction <add>, %11, %cst_6 [1] : vector<8x32xf32> to vector<8xf32>
    %13 = vector.shape_cast %12 : vector<8xf32> to vector<8x1xf32>
    %cst_7 = arith.constant 3.200000e+01 : f32
    %14 = vector.broadcast %cst_7 : f32 to vector<8x1xf32>
    %15 = arith.divf %13, %14 : vector<8x1xf32>
    %cst_8 = arith.constant 9.99999997E-7 : f32
    %16 = vector.broadcast %cst_8 : f32 to vector<8x1xf32>
    %17 = arith.addf %15, %16 : vector<8x1xf32>
    %18 = math.rsqrt %17 : vector<8x1xf32>
    %19 = vector.broadcast %18 : vector<8x1xf32> to vector<8x32xf32>
    %20 = arith.mulf %9, %19 : vector<8x32xf32>
    %21 = vector.broadcast %10 : vector<1x32xf32> to vector<8x32xf32>
    %22 = arith.mulf %20, %21 : vector<8x32xf32>
    %c0_9 = arith.constant 0 : index
    %c0_10 = arith.constant 0 : index
    %23 = vector.load %arg8[%c0_9, %c0_10] : memref<32x96xbf16, #tpu.memory_space<vmem>>, vector<32x96xbf16>
    %24 = arith.truncf %22 : vector<8x32xf32> to vector<8x32xbf16>
    %cst_11 = arith.constant dense<0.000000e+00> : vector<8x96xf32>
    %25 = tpu.matmul %24, %23, %cst_11 {dimension_numbers = #tpu.dot_dimension_numbers<[1], [0], [0], [1], [0, 0, 1, 1], [], []>} : vector<8x32xbf16>, vector<32x96xbf16>, vector<8x96xf32> -> vector<8x96xf32>
    %26 = vector.extract_strided_slice %25 {offsets = [0, 0], sizes = [8, 32], strides = [1, 1]} : vector<8x96xf32> to vector<8x32xf32>
    %27 = vector.extract_strided_slice %25 {offsets = [0, 32], sizes = [8, 32], strides = [1, 1]} : vector<8x96xf32> to vector<8x32xf32>
    %28 = vector.extract_strided_slice %25 {offsets = [0, 64], sizes = [8, 32], strides = [1, 1]} : vector<8x96xf32> to vector<8x32xf32>
    %c0_12 = arith.constant 0 : index
    %c0_13 = arith.constant 0 : index
    %29 = vector.load %arg9[%c0_12, %c0_13] : memref<32x32xbf16, #tpu.memory_space<vmem>>, vector<32x32xbf16>
    %c0_14 = arith.constant 0 : index
    %c0_15 = arith.constant 0 : index
    %c0_16 = arith.constant 0 : index
    %30 = vector.load %arg5[%c0_14, %c0_15, %c0_16] : memref<4x8x8xf32, #tpu.memory_space<vmem>>, vector<4x8x8xf32>
    %31 = vector.shape_cast %26 : vector<8x32xf32> to vector<8x4x8xf32>
    %32 = tpu.transpose %31, [1, 0, 2] : vector<8x4x8xf32> -> vector<4x8x8xf32>
    %33 = arith.truncf %32 : vector<4x8x8xf32> to vector<4x8x8xbf16>
    %34 = vector.shape_cast %27 : vector<8x32xf32> to vector<8x4x8xf32>
    %35 = tpu.transpose %34, [1, 0, 2] : vector<8x4x8xf32> -> vector<4x8x8xf32>
    %36 = arith.truncf %35 : vector<4x8x8xf32> to vector<4x8x8xbf16>
    %37 = vector.shape_cast %28 : vector<8x32xf32> to vector<8x4x8xf32>
    %38 = tpu.transpose %37, [1, 0, 2] : vector<8x4x8xf32> -> vector<4x8x8xf32>
    %39 = arith.truncf %38 : vector<4x8x8xf32> to vector<4x8x8xbf16>
    "tpu.trace_start"() <{level = 10 : i32, message = "hqd,hkd->hqk"}> : () -> ()
    %cst_17 = arith.constant dense<0.000000e+00> : vector<4x8x8xf32>
    %40 = tpu.matmul %33, %36, %cst_17 {dimension_numbers = #tpu.dot_dimension_numbers<[2], [2], [1], [1], [0, 0, 0, 1, 1, 1], [0], [0]>} : vector<4x8x8xbf16>, vector<4x8x8xbf16>, vector<4x8x8xf32> -> vector<4x8x8xf32>
    "tpu.trace_stop"() : () -> ()
    %41 = arith.addf %40, %30 : vector<4x8x8xf32>
    %cst_18 = arith.constant dense<0xFF800000> : vector<4x8xf32>
    %42 = vector.multi_reduction <maximumf>, %41, %cst_18 [2] : vector<4x8x8xf32> to vector<4x8xf32>
    %43 = vector.shape_cast %42 : vector<4x8xf32> to vector<4x8x1xf32>
    %44 = vector.broadcast %43 : vector<4x8x1xf32> to vector<4x8x8xf32>
    %45 = arith.subf %41, %44 : vector<4x8x8xf32>
    %46 = math.exp %45 : vector<4x8x8xf32>
    %cst_19 = arith.constant dense<0.000000e+00> : vector<4x8xf32>
    %47 = vector.multi_reduction <add>, %46, %cst_19 [2] : vector<4x8x8xf32> to vector<4x8xf32>
    %48 = vector.shape_cast %47 : vector<4x8xf32> to vector<4x8x1xf32>
    %49 = tpu.reciprocal %48 {approx = true} : vector<4x8x1xf32> -> vector<4x8x1xf32>
    %50 = vector.broadcast %49 : vector<4x8x1xf32> to vector<4x8x8xf32>
    %51 = arith.mulf %46, %50 : vector<4x8x8xf32>
    %52 = arith.truncf %51 : vector<4x8x8xf32> to vector<4x8x8xbf16>
    "tpu.trace_start"() <{level = 10 : i32, message = "hqk,hkd->hqd"}> : () -> ()
    %cst_20 = arith.constant dense<0.000000e+00> : vector<4x8x8xf32>
    %53 = tpu.matmul %52, %39, %cst_20 {dimension_numbers = #tpu.dot_dimension_numbers<[2], [1], [1], [2], [0, 0, 0, 1, 1, 2], [0], [0]>} : vector<4x8x8xbf16>, vector<4x8x8xbf16>, vector<4x8x8xf32> -> vector<4x8x8xf32>
    "tpu.trace_stop"() : () -> ()
    %54 = tpu.transpose %53, [1, 0, 2] : vector<4x8x8xf32> -> vector<8x4x8xf32>
    %55 = vector.shape_cast %54 : vector<8x4x8xf32> to vector<8x32xf32>
    %56 = arith.truncf %55 : vector<8x32xf32> to vector<8x32xbf16>
    %cst_21 = arith.constant dense<0.000000e+00> : vector<8x32xf32>
    %57 = tpu.matmul %56, %29, %cst_21 {dimension_numbers = #tpu.dot_dimension_numbers<[1], [0], [0], [1], [0, 0, 1, 1], [], []>} : vector<8x32xbf16>, vector<32x32xbf16>, vector<8x32xf32> -> vector<8x32xf32>
    %58 = arith.addf %9, %57 : vector<8x32xf32>
    %c0_22 = arith.constant 0 : index
    %c0_23 = arith.constant 0 : index
    %59 = vector.load %arg10[%c0_22, %c0_23] : memref<1x32xf32, #tpu.memory_space<vmem>>, vector<1x32xf32>
    %60 = arith.mulf %58, %58 : vector<8x32xf32>
    %cst_24 = arith.constant dense<0.000000e+00> : vector<8xf32>
    %61 = vector.multi_reduction <add>, %60, %cst_24 [1] : vector<8x32xf32> to vector<8xf32>
    %62 = vector.shape_cast %61 : vector<8xf32> to vector<8x1xf32>
    %cst_25 = arith.constant 3.200000e+01 : f32
    %63 = vector.broadcast %cst_25 : f32 to vector<8x1xf32>
    %64 = arith.divf %62, %63 : vector<8x1xf32>
    %cst_26 = arith.constant 9.99999997E-7 : f32
    %65 = vector.broadcast %cst_26 : f32 to vector<8x1xf32>
    %66 = arith.addf %64, %65 : vector<8x1xf32>
    %67 = math.rsqrt %66 : vector<8x1xf32>
    %68 = vector.broadcast %67 : vector<8x1xf32> to vector<8x32xf32>
    %69 = arith.mulf %58, %68 : vector<8x32xf32>
    %70 = vector.broadcast %59 : vector<1x32xf32> to vector<8x32xf32>
    %71 = arith.mulf %69, %70 : vector<8x32xf32>
    %c0_27 = arith.constant 0 : index
    %c0_28 = arith.constant 0 : index
    %72 = vector.load %arg11[%c0_27, %c0_28] : memref<32x64xbf16, #tpu.memory_space<vmem>>, vector<32x64xbf16>
    %73 = arith.truncf %71 : vector<8x32xf32> to vector<8x32xbf16>
    %cst_29 = arith.constant dense<0.000000e+00> : vector<8x64xf32>
    %74 = tpu.matmul %73, %72, %cst_29 {dimension_numbers = #tpu.dot_dimension_numbers<[1], [0], [0], [1], [0, 0, 1, 1], [], []>} : vector<8x32xbf16>, vector<32x64xbf16>, vector<8x64xf32> -> vector<8x64xf32>
    %cst_30 = arith.constant 0.000000e+00 : f32
    %75 = vector.broadcast %cst_30 : f32 to vector<8x64xf32>
    %76 = arith.maximumf %74, %75 : vector<8x64xf32>
    %c0_31 = arith.constant 0 : index
    %c0_32 = arith.constant 0 : index
    %77 = vector.load %arg12[%c0_31, %c0_32] : memref<64x32xbf16, #tpu.memory_space<vmem>>, vector<64x32xbf16>
    %78 = arith.truncf %76 : vector<8x64xf32> to vector<8x64xbf16>
    %cst_33 = arith.constant dense<0.000000e+00> : vector<8x32xf32>
    %79 = tpu.matmul %78, %77, %cst_33 {dimension_numbers = #tpu.dot_dimension_numbers<[1], [0], [0], [1], [0, 0, 1, 1], [], []>} : vector<8x64xbf16>, vector<64x32xbf16>, vector<8x32xf32> -> vector<8x32xf32>
    %80 = arith.addf %58, %79 : vector<8x32xf32>
    %c0_34 = arith.constant 0 : index
    %c0_35 = arith.constant 0 : index
    %81 = vector.load %arg13[%c0_34, %c0_35] : memref<1x32xf32, #tpu.memory_space<vmem>>, vector<1x32xf32>
    %82 = arith.mulf %80, %80 : vector<8x32xf32>
    %cst_36 = arith.constant dense<0.000000e+00> : vector<8xf32>
    %83 = vector.multi_reduction <add>, %82, %cst_36 [1] : vector<8x32xf32> to vector<8xf32>
    %84 = vector.shape_cast %83 : vector<8xf32> to vector<8x1xf32>
    %cst_37 = arith.constant 3.200000e+01 : f32
    %85 = vector.broadcast %cst_37 : f32 to vector<8x1xf32>
    %86 = arith.divf %84, %85 : vector<8x1xf32>
    %cst_38 = arith.constant 9.99999997E-7 : f32
    %87 = vector.broadcast %cst_38 : f32 to vector<8x1xf32>
    %88 = arith.addf %86, %87 : vector<8x1xf32>
    %89 = math.rsqrt %88 : vector<8x1xf32>
    %90 = vector.broadcast %89 : vector<8x1xf32> to vector<8x32xf32>
    %91 = arith.mulf %80, %90 : vector<8x32xf32>
    %92 = vector.broadcast %81 : vector<1x32xf32> to vector<8x32xf32>
    %93 = arith.mulf %91, %92 : vector<8x32xf32>
    %c0_39 = arith.constant 0 : index
    %c0_40 = arith.constant 0 : index
    %c0_41 = arith.constant 0 : index
    %94 = vector.load %arg2[%c0_39, %c0_40, %c0_41] : memref<1x8x1xi32, #tpu.memory_space<vmem>>, vector<1x8x1xi32>
    %95 = vector.shape_cast %94 : vector<1x8x1xi32> to vector<8x1xi32>
    %c-100_i32 = arith.constant -100 : i32
    %96 = vector.broadcast %c-100_i32 : i32 to vector<8x1xi32>
    %97 = arith.cmpi eq, %95, %96 : vector<8x1xi32>
    %c0_i32 = arith.constant 0 : i32
    %98 = vector.broadcast %c0_i32 : i32 to vector<8x1xi32>
    %99 = arith.select %97, %98, %95 : vector<8x1xi1>, vector<8x1xi32>
    %100 = tpu.iota {dimensions = array<i32: 1>} : vector<8x128xi32>
    %101 = tpu.iota {dimensions = array<i32: 0>} : vector<8x128xi32>
    %102 = vector.broadcast %99 : vector<8x1xi32> to vector<8x128xi32>
    %103 = arith.cmpi eq, %100, %102 : vector<8x128xi32>
    %104 = arith.extui %103 : vector<8x128xi1> to vector<8x128xi32>
    %105 = arith.sitofp %104 : vector<8x128xi32> to vector<8x128xf32>
    %106 = arith.truncf %105 : vector<8x128xf32> to vector<8x128xbf16>
    %107 = tpu.iota {dimensions = array<i32: 0>} : vector<8x8xi32>
    %108 = tpu.iota {dimensions = array<i32: 1>} : vector<8x8xi32>
    %c1_i32 = arith.constant 1 : i32
    %109 = vector.broadcast %c1_i32 : i32 to vector<8x8xi32>
    %110 = arith.addi %108, %109 : vector<8x8xi32>
    %111 = arith.cmpi eq, %107, %110 : vector<8x8xi32>
    %112 = arith.extui %111 : vector<8x8xi1> to vector<8x8xi32>
    %113 = arith.sitofp %112 : vector<8x8xi32> to vector<8x8xf32>
    %114 = arith.truncf %113 : vector<8x8xf32> to vector<8x8xbf16>
    %cst_42 = arith.constant dense<0.000000e+00> : vector<8x128xf32>
    %115 = tpu.matmul %114, %106, %cst_42 {dimension_numbers = #tpu.dot_dimension_numbers<[1], [0], [0], [1], [0, 0, 1, 1], [], []>} : vector<8x8xbf16>, vector<8x128xbf16>, vector<8x128xf32> -> vector<8x128xf32>
    %c0_i32_43 = arith.constant 0 : i32
    %116 = vector.broadcast %c0_i32_43 : i32 to vector<8x128xi32>
    %117 = arith.cmpi eq, %101, %116 : vector<8x128xi32>
    %c0_i32_44 = arith.constant 0 : i32
    %118 = vector.broadcast %c0_i32_44 : i32 to vector<8x128xi32>
    %119 = arith.cmpi eq, %100, %118 : vector<8x128xi32>
    %120 = arith.andi %117, %119 : vector<8x128xi1>
    %121 = arith.extui %120 : vector<8x128xi1> to vector<8x128xi32>
    %122 = arith.sitofp %121 : vector<8x128xi32> to vector<8x128xf32>
    %123 = arith.addf %115, %122 : vector<8x128xf32>
    %124 = arith.truncf %123 : vector<8x128xf32> to vector<8x128xbf16>
    %cst_45 = arith.constant dense<0.000000e+00> : vector<8x32xf32>
    %125 = tpu.matmul %124, %0, %cst_45 {dimension_numbers = #tpu.dot_dimension_numbers<[1], [0], [0], [1], [0, 0, 1, 1], [], []>} : vector<8x128xbf16>, vector<128x32xbf16>, vector<8x32xf32> -> vector<8x32xf32>
    %c0_46 = arith.constant 0 : index
    %c0_47 = arith.constant 0 : index
    %126 = vector.load %arg14[%c0_46, %c0_47] : memref<1x32xf32, #tpu.memory_space<vmem>>, vector<1x32xf32>
    %127 = arith.mulf %125, %125 : vector<8x32xf32>
    %cst_48 = arith.constant dense<0.000000e+00> : vector<8xf32>
    %128 = vector.multi_reduction <add>, %127, %cst_48 [1] : vector<8x32xf32> to vector<8xf32>
    %129 = vector.shape_cast %128 : vector<8xf32> to vector<8x1xf32>
    %cst_49 = arith.constant 3.200000e+01 : f32
    %130 = vector.broadcast %cst_49 : f32 to vector<8x1xf32>
    %131 = arith.divf %129, %130 : vector<8x1xf32>
    %cst_50 = arith.constant 9.99999997E-7 : f32
    %132 = vector.broadcast %cst_50 : f32 to vector<8x1xf32>
    %133 = arith.addf %131, %132 : vector<8x1xf32>
    %134 = math.rsqrt %133 : vector<8x1xf32>
    %135 = vector.broadcast %134 : vector<8x1xf32> to vector<8x32xf32>
    %136 = arith.mulf %125, %135 : vector<8x32xf32>
    %137 = vector.broadcast %126 : vector<1x32xf32> to vector<8x32xf32>
    %138 = arith.mulf %136, %137 : vector<8x32xf32>
    %c0_51 = arith.constant 0 : index
    %c0_52 = arith.constant 0 : index
    %139 = vector.load %arg15[%c0_51, %c0_52] : memref<32x96xbf16, #tpu.memory_space<vmem>>, vector<32x96xbf16>
    %140 = arith.truncf %138 : vector<8x32xf32> to vector<8x32xbf16>
    %cst_53 = arith.constant dense<0.000000e+00> : vector<8x96xf32>
    %141 = tpu.matmul %140, %139, %cst_53 {dimension_numbers = #tpu.dot_dimension_numbers<[1], [0], [0], [1], [0, 0, 1, 1], [], []>} : vector<8x32xbf16>, vector<32x96xbf16>, vector<8x96xf32> -> vector<8x96xf32>
    %142 = vector.extract_strided_slice %141 {offsets = [0, 0], sizes = [8, 32], strides = [1, 1]} : vector<8x96xf32> to vector<8x32xf32>
    %143 = vector.extract_strided_slice %141 {offsets = [0, 32], sizes = [8, 32], strides = [1, 1]} : vector<8x96xf32> to vector<8x32xf32>
    %144 = vector.extract_strided_slice %141 {offsets = [0, 64], sizes = [8, 32], strides = [1, 1]} : vector<8x96xf32> to vector<8x32xf32>
    %c0_54 = arith.constant 0 : index
    %c0_55 = arith.constant 0 : index
    %145 = vector.load %arg16[%c0_54, %c0_55] : memref<32x32xbf16, #tpu.memory_space<vmem>>, vector<32x32xbf16>
    %c0_56 = arith.constant 0 : index
    %c0_57 = arith.constant 0 : index
    %c0_58 = arith.constant 0 : index
    %146 = vector.load %arg6[%c0_56, %c0_57, %c0_58] : memref<4x8x8xf32, #tpu.memory_space<vmem>>, vector<4x8x8xf32>
    %147 = vector.shape_cast %142 : vector<8x32xf32> to vector<8x4x8xf32>
    %148 = tpu.transpose %147, [1, 0, 2] : vector<8x4x8xf32> -> vector<4x8x8xf32>
    %149 = arith.truncf %148 : vector<4x8x8xf32> to vector<4x8x8xbf16>
    %150 = vector.shape_cast %143 : vector<8x32xf32> to vector<8x4x8xf32>
    %151 = tpu.transpose %150, [1, 0, 2] : vector<8x4x8xf32> -> vector<4x8x8xf32>
    %152 = arith.truncf %151 : vector<4x8x8xf32> to vector<4x8x8xbf16>
    %153 = vector.shape_cast %144 : vector<8x32xf32> to vector<8x4x8xf32>
    %154 = tpu.transpose %153, [1, 0, 2] : vector<8x4x8xf32> -> vector<4x8x8xf32>
    %155 = arith.truncf %154 : vector<4x8x8xf32> to vector<4x8x8xbf16>
    "tpu.trace_start"() <{level = 10 : i32, message = "hqd,hkd->hqk"}> : () -> ()
    %cst_59 = arith.constant dense<0.000000e+00> : vector<4x8x8xf32>
    %156 = tpu.matmul %149, %152, %cst_59 {dimension_numbers = #tpu.dot_dimension_numbers<[2], [2], [1], [1], [0, 0, 0, 1, 1, 1], [0], [0]>} : vector<4x8x8xbf16>, vector<4x8x8xbf16>, vector<4x8x8xf32> -> vector<4x8x8xf32>
    "tpu.trace_stop"() : () -> ()
    %157 = arith.addf %156, %146 : vector<4x8x8xf32>
    %cst_60 = arith.constant dense<0xFF800000> : vector<4x8xf32>
    %158 = vector.multi_reduction <maximumf>, %157, %cst_60 [2] : vector<4x8x8xf32> to vector<4x8xf32>
    %159 = vector.shape_cast %158 : vector<4x8xf32> to vector<4x8x1xf32>
    %160 = vector.broadcast %159 : vector<4x8x1xf32> to vector<4x8x8xf32>
    %161 = arith.subf %157, %160 : vector<4x8x8xf32>
    %162 = math.exp %161 : vector<4x8x8xf32>
    %cst_61 = arith.constant dense<0.000000e+00> : vector<4x8xf32>
    %163 = vector.multi_reduction <add>, %162, %cst_61 [2] : vector<4x8x8xf32> to vector<4x8xf32>
    %164 = vector.shape_cast %163 : vector<4x8xf32> to vector<4x8x1xf32>
    %165 = tpu.reciprocal %164 {approx = true} : vector<4x8x1xf32> -> vector<4x8x1xf32>
    %166 = vector.broadcast %165 : vector<4x8x1xf32> to vector<4x8x8xf32>
    %167 = arith.mulf %162, %166 : vector<4x8x8xf32>
    %168 = arith.truncf %167 : vector<4x8x8xf32> to vector<4x8x8xbf16>
    "tpu.trace_start"() <{level = 10 : i32, message = "hqk,hkd->hqd"}> : () -> ()
    %cst_62 = arith.constant dense<0.000000e+00> : vector<4x8x8xf32>
    %169 = tpu.matmul %168, %155, %cst_62 {dimension_numbers = #tpu.dot_dimension_numbers<[2], [1], [1], [2], [0, 0, 0, 1, 1, 2], [0], [0]>} : vector<4x8x8xbf16>, vector<4x8x8xbf16>, vector<4x8x8xf32> -> vector<4x8x8xf32>
    "tpu.trace_stop"() : () -> ()
    %170 = tpu.transpose %169, [1, 0, 2] : vector<4x8x8xf32> -> vector<8x4x8xf32>
    %171 = vector.shape_cast %170 : vector<8x4x8xf32> to vector<8x32xf32>
    %172 = arith.truncf %171 : vector<8x32xf32> to vector<8x32xbf16>
    %cst_63 = arith.constant dense<0.000000e+00> : vector<8x32xf32>
    %173 = tpu.matmul %172, %145, %cst_63 {dimension_numbers = #tpu.dot_dimension_numbers<[1], [0], [0], [1], [0, 0, 1, 1], [], []>} : vector<8x32xbf16>, vector<32x32xbf16>, vector<8x32xf32> -> vector<8x32xf32>
    %174 = arith.addf %125, %173 : vector<8x32xf32>
    %c0_64 = arith.constant 0 : index
    %c0_65 = arith.constant 0 : index
    %175 = vector.load %arg17[%c0_64, %c0_65] : memref<1x32xf32, #tpu.memory_space<vmem>>, vector<1x32xf32>
    %176 = arith.mulf %174, %174 : vector<8x32xf32>
    %cst_66 = arith.constant dense<0.000000e+00> : vector<8xf32>
    %177 = vector.multi_reduction <add>, %176, %cst_66 [1] : vector<8x32xf32> to vector<8xf32>
    %178 = vector.shape_cast %177 : vector<8xf32> to vector<8x1xf32>
    %cst_67 = arith.constant 3.200000e+01 : f32
    %179 = vector.broadcast %cst_67 : f32 to vector<8x1xf32>
    %180 = arith.divf %178, %179 : vector<8x1xf32>
    %cst_68 = arith.constant 9.99999997E-7 : f32
    %181 = vector.broadcast %cst_68 : f32 to vector<8x1xf32>
    %182 = arith.addf %180, %181 : vector<8x1xf32>
    %183 = math.rsqrt %182 : vector<8x1xf32>
    %184 = vector.broadcast %183 : vector<8x1xf32> to vector<8x32xf32>
    %185 = arith.mulf %174, %184 : vector<8x32xf32>
    %186 = vector.broadcast %175 : vector<1x32xf32> to vector<8x32xf32>
    %187 = arith.mulf %185, %186 : vector<8x32xf32>
    %c0_69 = arith.constant 0 : index
    %c0_70 = arith.constant 0 : index
    %188 = vector.load %arg18[%c0_69, %c0_70] : memref<32x32xbf16, #tpu.memory_space<vmem>>, vector<32x32xbf16>
    %189 = arith.truncf %187 : vector<8x32xf32> to vector<8x32xbf16>
    %cst_71 = arith.constant dense<0.000000e+00> : vector<8x32xf32>
    %190 = tpu.matmul %189, %188, %cst_71 {dimension_numbers = #tpu.dot_dimension_numbers<[1], [0], [0], [1], [0, 0, 1, 1], [], []>} : vector<8x32xbf16>, vector<32x32xbf16>, vector<8x32xf32> -> vector<8x32xf32>
    %c0_72 = arith.constant 0 : index
    %c0_73 = arith.constant 0 : index
    %191 = vector.load %arg19[%c0_72, %c0_73] : memref<32x64xbf16, #tpu.memory_space<vmem>>, vector<32x64xbf16>
    %192 = arith.truncf %93 : vector<8x32xf32> to vector<8x32xbf16>
    %cst_74 = arith.constant dense<0.000000e+00> : vector<8x64xf32>
    %193 = tpu.matmul %192, %191, %cst_74 {dimension_numbers = #tpu.dot_dimension_numbers<[1], [0], [0], [1], [0, 0, 1, 1], [], []>} : vector<8x32xbf16>, vector<32x64xbf16>, vector<8x64xf32> -> vector<8x64xf32>
    %194 = vector.extract_strided_slice %193 {offsets = [0, 0], sizes = [8, 32], strides = [1, 1]} : vector<8x64xf32> to vector<8x32xf32>
    %195 = vector.extract_strided_slice %193 {offsets = [0, 32], sizes = [8, 32], strides = [1, 1]} : vector<8x64xf32> to vector<8x32xf32>
    %c0_75 = arith.constant 0 : index
    %c0_76 = arith.constant 0 : index
    %196 = vector.load %arg20[%c0_75, %c0_76] : memref<32x32xbf16, #tpu.memory_space<vmem>>, vector<32x32xbf16>
    %197 = vector.shape_cast %190 : vector<8x32xf32> to vector<8x4x8xf32>
    %198 = tpu.transpose %197, [1, 0, 2] : vector<8x4x8xf32> -> vector<4x8x8xf32>
    %199 = arith.truncf %198 : vector<4x8x8xf32> to vector<4x8x8xbf16>
    %200 = vector.shape_cast %194 : vector<8x32xf32> to vector<8x4x8xf32>
    %201 = tpu.transpose %200, [1, 0, 2] : vector<8x4x8xf32> -> vector<4x8x8xf32>
    %202 = arith.truncf %201 : vector<4x8x8xf32> to vector<4x8x8xbf16>
    %203 = vector.shape_cast %195 : vector<8x32xf32> to vector<8x4x8xf32>
    %204 = tpu.transpose %203, [1, 0, 2] : vector<8x4x8xf32> -> vector<4x8x8xf32>
    %205 = arith.truncf %204 : vector<4x8x8xf32> to vector<4x8x8xbf16>
    "tpu.trace_start"() <{level = 10 : i32, message = "hqd,hkd->hqk"}> : () -> ()
    %cst_77 = arith.constant dense<0.000000e+00> : vector<4x8x8xf32>
    %206 = tpu.matmul %199, %202, %cst_77 {dimension_numbers = #tpu.dot_dimension_numbers<[2], [2], [1], [1], [0, 0, 0, 1, 1, 1], [0], [0]>} : vector<4x8x8xbf16>, vector<4x8x8xbf16>, vector<4x8x8xf32> -> vector<4x8x8xf32>
    "tpu.trace_stop"() : () -> ()
    %cst_78 = arith.constant dense<0xFF800000> : vector<4x8xf32>
    %207 = vector.multi_reduction <maximumf>, %206, %cst_78 [2] : vector<4x8x8xf32> to vector<4x8xf32>
    %208 = vector.shape_cast %207 : vector<4x8xf32> to vector<4x8x1xf32>
    %209 = vector.broadcast %208 : vector<4x8x1xf32> to vector<4x8x8xf32>
    %210 = arith.subf %206, %209 : vector<4x8x8xf32>
    %211 = math.exp %210 : vector<4x8x8xf32>
    %cst_79 = arith.constant dense<0.000000e+00> : vector<4x8xf32>
    %212 = vector.multi_reduction <add>, %211, %cst_79 [2] : vector<4x8x8xf32> to vector<4x8xf32>
    %213 = vector.shape_cast %212 : vector<4x8xf32> to vector<4x8x1xf32>
    %214 = tpu.reciprocal %213 {approx = true} : vector<4x8x1xf32> -> vector<4x8x1xf32>
    %215 = vector.broadcast %214 : vector<4x8x1xf32> to vector<4x8x8xf32>
    %216 = arith.mulf %211, %215 : vector<4x8x8xf32>
    %217 = arith.truncf %216 : vector<4x8x8xf32> to vector<4x8x8xbf16>
    "tpu.trace_start"() <{level = 10 : i32, message = "hqk,hkd->hqd"}> : () -> ()
    %cst_80 = arith.constant dense<0.000000e+00> : vector<4x8x8xf32>
    %218 = tpu.matmul %217, %205, %cst_80 {dimension_numbers = #tpu.dot_dimension_numbers<[2], [1], [1], [2], [0, 0, 0, 1, 1, 2], [0], [0]>} : vector<4x8x8xbf16>, vector<4x8x8xbf16>, vector<4x8x8xf32> -> vector<4x8x8xf32>
    "tpu.trace_stop"() : () -> ()
    %219 = tpu.transpose %218, [1, 0, 2] : vector<4x8x8xf32> -> vector<8x4x8xf32>
    %220 = vector.shape_cast %219 : vector<8x4x8xf32> to vector<8x32xf32>
    %221 = arith.truncf %220 : vector<8x32xf32> to vector<8x32xbf16>
    %cst_81 = arith.constant dense<0.000000e+00> : vector<8x32xf32>
    %222 = tpu.matmul %221, %196, %cst_81 {dimension_numbers = #tpu.dot_dimension_numbers<[1], [0], [0], [1], [0, 0, 1, 1], [], []>} : vector<8x32xbf16>, vector<32x32xbf16>, vector<8x32xf32> -> vector<8x32xf32>
    %223 = arith.addf %174, %222 : vector<8x32xf32>
    %c0_82 = arith.constant 0 : index
    %c0_83 = arith.constant 0 : index
    %224 = vector.load %arg21[%c0_82, %c0_83] : memref<1x32xf32, #tpu.memory_space<vmem>>, vector<1x32xf32>
    %225 = arith.mulf %223, %223 : vector<8x32xf32>
    %cst_84 = arith.constant dense<0.000000e+00> : vector<8xf32>
    %226 = vector.multi_reduction <add>, %225, %cst_84 [1] : vector<8x32xf32> to vector<8xf32>
    %227 = vector.shape_cast %226 : vector<8xf32> to vector<8x1xf32>
    %cst_85 = arith.constant 3.200000e+01 : f32
    %228 = vector.broadcast %cst_85 : f32 to vector<8x1xf32>
    %229 = arith.divf %227, %228 : vector<8x1xf32>
    %cst_86 = arith.constant 9.99999997E-7 : f32
    %230 = vector.broadcast %cst_86 : f32 to vector<8x1xf32>
    %231 = arith.addf %229, %230 : vector<8x1xf32>
    %232 = math.rsqrt %231 : vector<8x1xf32>
    %233 = vector.broadcast %232 : vector<8x1xf32> to vector<8x32xf32>
    %234 = arith.mulf %223, %233 : vector<8x32xf32>
    %235 = vector.broadcast %224 : vector<1x32xf32> to vector<8x32xf32>
    %236 = arith.mulf %234, %235 : vector<8x32xf32>
    %c0_87 = arith.constant 0 : index
    %c0_88 = arith.constant 0 : index
    %237 = vector.load %arg22[%c0_87, %c0_88] : memref<32x64xbf16, #tpu.memory_space<vmem>>, vector<32x64xbf16>
    %238 = arith.truncf %236 : vector<8x32xf32> to vector<8x32xbf16>
    %cst_89 = arith.constant dense<0.000000e+00> : vector<8x64xf32>
    %239 = tpu.matmul %238, %237, %cst_89 {dimension_numbers = #tpu.dot_dimension_numbers<[1], [0], [0], [1], [0, 0, 1, 1], [], []>} : vector<8x32xbf16>, vector<32x64xbf16>, vector<8x64xf32> -> vector<8x64xf32>
    %cst_90 = arith.constant 0.000000e+00 : f32
    %240 = vector.broadcast %cst_90 : f32 to vector<8x64xf32>
    %241 = arith.maximumf %239, %240 : vector<8x64xf32>
    %c0_91 = arith.constant 0 : index
    %c0_92 = arith.constant 0 : index
    %242 = vector.load %arg23[%c0_91, %c0_92] : memref<64x32xbf16, #tpu.memory_space<vmem>>, vector<64x32xbf16>
    %243 = arith.truncf %241 : vector<8x64xf32> to vector<8x64xbf16>
    %cst_93 = arith.constant dense<0.000000e+00> : vector<8x32xf32>
    %244 = tpu.matmul %243, %242, %cst_93 {dimension_numbers = #tpu.dot_dimension_numbers<[1], [0], [0], [1], [0, 0, 1, 1], [], []>} : vector<8x64xbf16>, vector<64x32xbf16>, vector<8x32xf32> -> vector<8x32xf32>
    %245 = arith.addf %223, %244 : vector<8x32xf32>
    %c0_94 = arith.constant 0 : index
    %c0_95 = arith.constant 0 : index
    %246 = vector.load %arg24[%c0_94, %c0_95] : memref<1x32xf32, #tpu.memory_space<vmem>>, vector<1x32xf32>
    %247 = arith.mulf %245, %245 : vector<8x32xf32>
    %cst_96 = arith.constant dense<0.000000e+00> : vector<8xf32>
    %248 = vector.multi_reduction <add>, %247, %cst_96 [1] : vector<8x32xf32> to vector<8xf32>
    %249 = vector.shape_cast %248 : vector<8xf32> to vector<8x1xf32>
    %cst_97 = arith.constant 3.200000e+01 : f32
    %250 = vector.broadcast %cst_97 : f32 to vector<8x1xf32>
    %251 = arith.divf %249, %250 : vector<8x1xf32>
    %cst_98 = arith.constant 9.99999997E-7 : f32
    %252 = vector.broadcast %cst_98 : f32 to vector<8x1xf32>
    %253 = arith.addf %251, %252 : vector<8x1xf32>
    %254 = math.rsqrt %253 : vector<8x1xf32>
    %255 = vector.broadcast %254 : vector<8x1xf32> to vector<8x32xf32>
    %256 = arith.mulf %245, %255 : vector<8x32xf32>
    %257 = vector.broadcast %246 : vector<1x32xf32> to vector<8x32xf32>
    %258 = arith.mulf %256, %257 : vector<8x32xf32>
    %cst_99 = arith.constant 0.176776692 : f32
    %259 = vector.broadcast %cst_99 : f32 to vector<8x32xf32>
    %260 = arith.mulf %258, %259 : vector<8x32xf32>
    %261 = arith.truncf %260 : vector<8x32xf32> to vector<8x32xbf16>
    %c0_100 = arith.constant 0 : index
    %c0_101 = arith.constant 0 : index
    %262 = vector.load %arg4[%c0_100, %c0_101] : memref<32x128xbf16, #tpu.memory_space<vmem>>, vector<32x128xbf16>
    %cst_102 = arith.constant dense<0.000000e+00> : vector<8x128xf32>
    %263 = tpu.matmul %261, %262, %cst_102 {dimension_numbers = #tpu.dot_dimension_numbers<[1], [0], [0], [1], [0, 0, 1, 1], [], []>} : vector<8x32xbf16>, vector<32x128xbf16>, vector<8x128xf32> -> vector<8x128xf32>
    %c0_103 = arith.constant 0 : index
    %c0_104 = arith.constant 0 : index
    %c0_105 = arith.constant 0 : index
    %264 = vector.load %arg25[%c0_103, %c0_104, %c0_105] : memref<1x8x128xf32, #tpu.memory_space<vmem>>, vector<1x8x128xf32>
    %265 = vector.shape_cast %264 : vector<1x8x128xf32> to vector<8x128xf32>
    %266 = vector.shape_cast %263 : vector<8x128xf32> to vector<1x8x128xf32>
    tpu.vector_store %arg25[%c0_103, %c0_104, %c0_105], %266 {strides = array<i32>} : memref<1x8x128xf32, #tpu.memory_space<vmem>>, vector<1x8x128xf32>,
    %c64_i32 = arith.constant 64 : i32
    %267 = vector.broadcast %c64_i32 : i32 to vector<8x128xi32>
    %268 = arith.cmpi slt, %100, %267 : vector<8x128xi32>
    %cst_106 = arith.constant -1.000000e+09 : f32
    %269 = vector.broadcast %cst_106 : f32 to vector<8x128xf32>
    %270 = arith.select %268, %263, %269 : vector<8x128xi1>, vector<8x128xf32>
    %cst_107 = arith.constant dense<0xFF800000> : vector<8xf32>
    %271 = vector.multi_reduction <maximumf>, %270, %cst_107 [1] : vector<8x128xf32> to vector<8xf32>
    %272 = vector.shape_cast %271 : vector<8xf32> to vector<8x1xf32>
    %273 = vector.broadcast %272 : vector<8x1xf32> to vector<8x128xf32>
    %274 = arith.subf %270, %273 : vector<8x128xf32>
    %275 = math.exp %274 : vector<8x128xf32>
    %cst_108 = arith.constant dense<0.000000e+00> : vector<8xf32>
    %276 = vector.multi_reduction <add>, %275, %cst_108 [1] : vector<8x128xf32> to vector<8xf32>
    %277 = vector.shape_cast %276 : vector<8xf32> to vector<8x1xf32>
    %278 = math.log %277 : vector<8x1xf32>
    %279 = arith.addf %272, %278 : vector<8x1xf32>
    %280 = vector.broadcast %95 : vector<8x1xi32> to vector<8x128xi32>
    %281 = arith.cmpi eq, %100, %280 : vector<8x128xi32>
    %cst_109 = arith.constant 0.000000e+00 : f32
    %282 = vector.broadcast %cst_109 : f32 to vector<8x128xf32>
    %283 = arith.select %281, %270, %282 : vector<8x128xi1>, vector<8x128xf32>
    %cst_110 = arith.constant dense<0.000000e+00> : vector<8xf32>
    %284 = vector.multi_reduction <add>, %283, %cst_110 [1] : vector<8x128xf32> to vector<8xf32>
    %285 = vector.shape_cast %284 : vector<8xf32> to vector<8x1xf32>
    %c0_i32_111 = arith.constant 0 : i32
    %286 = vector.broadcast %c0_i32_111 : i32 to vector<8x1xi32>
    %287 = arith.cmpi sge, %95, %286 : vector<8x1xi32>
    %288 = arith.extui %287 : vector<8x1xi1> to vector<8x1xi32>
    %289 = arith.sitofp %288 : vector<8x1xi32> to vector<8x1xf32>
    %290 = arith.subf %279, %285 : vector<8x1xf32>
    %291 = arith.mulf %290, %289 : vector<8x1xf32>
    %cst_112 = arith.constant dense<0.000000e+00> : vector<1xf32>
    %292 = vector.multi_reduction <add>, %291, %cst_112 [0] : vector<8x1xf32> to vector<1xf32>
    %293 = vector.shape_cast %292 : vector<1xf32> to vector<1x1xf32>
    %cst_113 = arith.constant dense<0.000000e+00> : vector<1xf32>
    %294 = vector.multi_reduction <add>, %289, %cst_113 [0] : vector<8x1xf32> to vector<1xf32>
    %295 = vector.shape_cast %294 : vector<1xf32> to vector<1x1xf32>
    %296 = tpu.iota {dimensions = array<i32: 1>} : vector<1x2x128xi32>
    %c0_i32_114 = arith.constant 0 : i32
    %297 = vector.broadcast %c0_i32_114 : i32 to vector<1x2x128xi32>
    %298 = arith.cmpi eq, %296, %297 : vector<1x2x128xi32>
    %299 = vector.shape_cast %293 : vector<1x1xf32> to vector<1x1x1xf32>
    %300 = vector.shape_cast %295 : vector<1x1xf32> to vector<1x1x1xf32>
    %301 = vector.shape_cast %299 : vector<1x1x1xf32> to vector<1x1x1xf32>
    %302 = vector.broadcast %301 : vector<1x1x1xf32> to vector<1x2x128xf32>
    %303 = vector.shape_cast %300 : vector<1x1x1xf32> to vector<1x1x1xf32>
    %304 = vector.broadcast %303 : vector<1x1x1xf32> to vector<1x2x128xf32>
    %305 = arith.select %298, %302, %304 : vector<1x2x128xi1>, vector<1x2x128xf32>
    %c0_115 = arith.constant 0 : index
    %c0_116 = arith.constant 0 : index
    %c0_117 = arith.constant 0 : index
    %306 = vector.load %arg26[%c0_115, %c0_116, %c0_117] : memref<1x2x128xf32, #tpu.memory_space<vmem>>, vector<1x2x128xf32>
    tpu.vector_store %arg26[%c0_115, %c0_116, %c0_117], %305 {strides = array<i32>} : memref<1x2x128xf32, #tpu.memory_space<vmem>>, vector<1x2x128xf32>,
    return
  }
  func.func @transform_0(%arg0: i32) -> (i32, i32, i32) {
    %c0_i32 = arith.constant 0 : i32
    %c0_i32_0 = arith.constant 0 : i32
    %c0_i32_1 = arith.constant 0 : i32
    return %arg0, %c0_i32, %c0_i32_0 : i32, i32, i32
  }
  func.func @transform_1(%arg0: i32) -> (i32, i32, i32) {
    %c0_i32 = arith.constant 0 : i32
    %c0_i32_0 = arith.constant 0 : i32
    %c0_i32_1 = arith.constant 0 : i32
    return %arg0, %c0_i32, %c0_i32_0 : i32, i32, i32
  }
  func.func @transform_2(%arg0: i32) -> (i32, i32) {
    %c0_i32 = arith.constant 0 : i32
    %c0_i32_0 = arith.constant 0 : i32
    %c0_i32_1 = arith.constant 0 : i32
    return %c0_i32, %c0_i32_0 : i32, i32
  }
  func.func @transform_3(%arg0: i32) -> (i32, i32) {
    %c0_i32 = arith.constant 0 : i32
    %c0_i32_0 = arith.constant 0 : i32
    %c0_i32_1 = arith.constant 0 : i32
    return %c0_i32, %c0_i32_0 : i32, i32
  }
  func.func @transform_4(%arg0: i32) -> (i32, i32, i32) {
    %c0_i32 = arith.constant 0 : i32
    %c0_i32_0 = arith.constant 0 : i32
    %c0_i32_1 = arith.constant 0 : i32
    %c0_i32_2 = arith.constant 0 : i32
    return %c0_i32, %c0_i32_0, %c0_i32_1 : i32, i32, i32
  }
  func.func @transform_5(%arg0: i32) -> (i32, i32, i32) {
    %c0_i32 = arith.constant 0 : i32
    %c0_i32_0 = arith.constant 0 : i32
    %c0_i32_1 = arith.constant 0 : i32
    %c0_i32_2 = arith.constant 0 : i32
    return %c0_i32, %c0_i32_0, %c0_i32_1 : i32, i32, i32
  }
  func.func @transform_6(%arg0: i32) -> (i32, i32) {
    %c0_i32 = arith.constant 0 : i32
    %c0_i32_0 = arith.constant 0 : i32
    %c0_i32_1 = arith.constant 0 : i32
    return %c0_i32, %c0_i32_0 : i32, i32
  }
  func.func @transform_7(%arg0: i32) -> (i32, i32) {
    %c0_i32 = arith.constant 0 : i32
    %c0_i32_0 = arith.constant 0 : i32
    %c0_i32_1 = arith.constant 0 : i32
    return %c0_i32, %c0_i32_0 : i32, i32
  }
  func.func @transform_8(%arg0: i32) -> (i32, i32) {
    %c0_i32 = arith.constant 0 : i32
    %c0_i32_0 = arith.constant 0 : i32
    %c0_i32_1 = arith.constant 0 : i32
    return %c0_i32, %c0_i32_0 : i32, i32
  }
  func.func @transform_9(%arg0: i32) -> (i32, i32) {
    %c0_i32 = arith.constant 0 : i32
    %c0_i32_0 = arith.constant 0 : i32
    %c0_i32_1 = arith.constant 0 : i32
    return %c0_i32, %c0_i32_0 : i32, i32
  }
  func.func @transform_10(%arg0: i32) -> (i32, i32) {
    %c0_i32 = arith.constant 0 : i32
    %c0_i32_0 = arith.constant 0 : i32
    %c0_i32_1 = arith.constant 0 : i32
    return %c0_i32, %c0_i32_0 : i32, i32
  }
  func.func @transform_11(%arg0: i32) -> (i32, i32) {
    %c0_i32 = arith.constant 0 : i32
    %c0_i32_0 = arith.constant 0 : i32
    %c0_i32_1 = arith.constant 0 : i32
    return %c0_i32, %c0_i32_0 : i32, i32
  }
  func.func @transform_12(%arg0: i32) -> (i32, i32) {
    %c0_i32 = arith.constant 0 : i32
    %c0_i32_0 = arith.constant 0 : i32
    %c0_i32_1 = arith.constant 0 : i32
    return %c0_i32, %c0_i32_0 : i32, i32
  }
  func.func @transform_13(%arg0: i32) -> (i32, i32) {
    %c0_i32 = arith.constant 0 : i32
    %c0_i32_0 = arith.constant 0 : i32
    %c0_i32_1 = arith.constant 0 : i32
    return %c0_i32, %c0_i32_0 : i32, i32
  }
  func.func @transform_14(%arg0: i32) -> (i32, i32) {
    %c0_i32 = arith.constant 0 : i32
    %c0_i32_0 = arith.constant 0 : i32
    %c0_i32_1 = arith.constant 0 : i32
    return %c0_i32, %c0_i32_0 : i32, i32
  }
  func.func @transform_15(%arg0: i32) -> (i32, i32) {
    %c0_i32 = arith.constant 0 : i32
    %c0_i32_0 = arith.constant 0 : i32
    %c0_i32_1 = arith.constant 0 : i32
    return %c0_i32, %c0_i32_0 : i32, i32
  }
  func.func @transform_16(%arg0: i32) -> (i32, i32) {
    %c0_i32 = arith.constant 0 : i32
    %c0_i32_0 = arith.constant 0 : i32
    %c0_i32_1 = arith.constant 0 : i32
    return %c0_i32, %c0_i32_0 : i32, i32
  }
  func.func @transform_17(%arg0: i32) -> (i32, i32) {
    %c0_i32 = arith.constant 0 : i32
    %c0_i32_0 = arith.constant 0 : i32
    %c0_i32_1 = arith.constant 0 : i32
    return %c0_i32, %c0_i32_0 : i32, i32
  }
  func.func @transform_18(%arg0: i32) -> (i32, i32) {
    %c0_i32 = arith.constant 0 : i32
    %c0_i32_0 = arith.constant 0 : i32
    %c0_i32_1 = arith.constant 0 : i32
    return %c0_i32, %c0_i32_0 : i32, i32
  }
  func.func @transform_19(%arg0: i32) -> (i32, i32) {
    %c0_i32 = arith.constant 0 : i32
    %c0_i32_0 = arith.constant 0 : i32
    %c0_i32_1 = arith.constant 0 : i32
    return %c0_i32, %c0_i32_0 : i32, i32
  }
  func.func @transform_20(%arg0: i32) -> (i32, i32) {
    %c0_i32 = arith.constant 0 : i32
    %c0_i32_0 = arith.constant 0 : i32
    %c0_i32_1 = arith.constant 0 : i32
    return %c0_i32, %c0_i32_0 : i32, i32
  }
  func.func @transform_21(%arg0: i32) -> (i32, i32) {
    %c0_i32 = arith.constant 0 : i32
    %c0_i32_0 = arith.constant 0 : i32
    %c0_i32_1 = arith.constant 0 : i32
    return %c0_i32, %c0_i32_0 : i32, i32
  }
  func.func @transform_22(%arg0: i32) -> (i32, i32) {
    %c0_i32 = arith.constant 0 : i32
    %c0_i32_0 = arith.constant 0 : i32
    %c0_i32_1 = arith.constant 0 : i32
    return %c0_i32, %c0_i32_0 : i32, i32
  }
  func.func @transform_23(%arg0: i32) -> (i32, i32) {
    %c0_i32 = arith.constant 0 : i32
    %c0_i32_0 = arith.constant 0 : i32
    %c0_i32_1 = arith.constant 0 : i32
    return %c0_i32, %c0_i32_0 : i32, i32
  }
  func.func @transform_24(%arg0: i32) -> (i32, i32, i32) {
    %c0_i32 = arith.constant 0 : i32
    %c0_i32_0 = arith.constant 0 : i32
    %c0_i32_1 = arith.constant 0 : i32
    return %arg0, %c0_i32, %c0_i32_0 : i32, i32, i32
  }
  func.func @transform_25(%arg0: i32) -> (i32, i32, i32) {
    %c0_i32 = arith.constant 0 : i32
    %c0_i32_0 = arith.constant 0 : i32
    %c0_i32_1 = arith.constant 0 : i32
    return %arg0, %c0_i32, %c0_i32_0 : i32, i32, i32
  }
}

</mosaic_0001>

<bundles_post_ra>
// kernel: t5_forward.1
= control target key start
LH: loop header
LB: loop body
LE: loop exit
PB: predicated region body
PF: predicated region fallthrough
CT: control target
= control target key end

     0   :  { %s6487_s0 = inlined_call_operand.vmem [shape: s32[2,8,1], index: 0, kind: input, shape index: {}]   ;;  %s6488_s1 = inlined_call_operand.vmem [shape: s32[2,8,1], index: 1, kind: input, shape index: {}]   ;;  %s6489_s2 = inlined_call_operand.hbm [shape: bf16[128,32], index: 2, kind: input, shape index: {}]   ;;  %s6490_s3 = inlined_call_operand.hbm [shape: bf16[32,128], index: 3, kind: input, shape index: {}]   ;;  %s6491_s4 = inlined_call_operand.hbm [shape: f32[4,8,8], index: 4, kind: input, shape index: {}]   ;;  %s6492_s5 = inlined_call_operand.hbm [shape: f32[4,8,8], index: 5, kind: input, shape index: {}]   ;;  %s6493_s6 = inlined_call_operand.vmem [shape: f32[1,32], index: 6, kind: input, shape index: {}, may-alias: {6,9,12,13,16,20,23}]   ;;  %s6494_s7 = inlined_call_operand.hbm [shape: bf16[32,96], index: 7, kind: input, shape index: {}]   ;;  %s6495_s8 = inlined_call_operand.hbm [shape: bf16[32,32], index: 8, kind: input, shape index: {}]   ;;  %s6496_s9 = inlined_call_operand.vmem [shape: f32[1,32], index: 9, kind: input, shape index: {}, may-alias: {6,9,12,13,16,20,23}]   ;;  %s6497_s10 = inlined_call_operand.hbm [shape: bf16[32,64], index: 10, kind: input, shape index: {}]   ;;  %s6498_s11 = inlined_call_operand.hbm [shape: bf16[64,32], index: 11, kind: input, shape index: {}]   ;;  %s6499_s12 = inlined_call_operand.vmem [shape: f32[1,32], index: 12, kind: input, shape index: {}, may-alias: {6,9,12,13,16,20,23}]   ;;  %s6500_s13 = inlined_call_operand.vmem [shape: f32[1,32], index: 13, kind: input, shape index: {}, may-alias: {6,9,12,13,16,20,23}]   ;;  %s6501_s14 = inlined_call_operand.hbm [shape: bf16[32,96], index: 14, kind: input, shape index: {}]   ;;  %s6502_s15 = inlined_call_operand.hbm [shape: bf16[32,32], index: 15, kind: input, shape index: {}]   ;;  %s6503_s16 = inlined_call_operand.vmem [shape: f32[1,32], index: 16, kind: input, shape index: {}, may-alias: {6,9,12,13,16,20,23}]   ;;  %s6504_s17 = inlined_call_operand.hbm [shape: bf16[32,32], index: 17, kind: input, shape index: {}]   ;;  %s6505_s18 = inlined_call_operand.hbm [shape: bf16[32,64], index: 18, kind: input, shape index: {}]   ;;  %s6506_s19 = inlined_call_operand.hbm [shape: bf16[32,32], index: 19, kind: input, shape index: {}]   ;;  %s6507_s20 = inlined_call_operand.vmem [shape: f32[1,32], index: 20, kind: input, shape index: {}, may-alias: {6,9,12,13,16,20,23}]   ;;  %s6508_s21 = inlined_call_operand.vmem [shape: bf16[32,64], index: 21, kind: input, shape index: {}]   ;;  %s6509_s22 = inlined_call_operand.vmem [shape: bf16[64,32], index: 22, kind: input, shape index: {}]   ;;  %s6510_s23 = inlined_call_operand.vmem [shape: f32[1,32], index: 23, kind: input, shape index: {}, may-alias: {6,9,12,13,16,20,23}]   ;;  %s6511_s24 = inlined_call_operand.hbm [shape: f32[2,8,128], index: 24, kind: output, shape index: {0}]   ;;  %s6512_s25 = inlined_call_operand.vmem [shape: f32[2,2,128], index: 25, kind: output, shape index: {1}]  }
   0x1   :  { %6526 = sst [smem:[#allocation40_spill]] %s6487_s0 }
   0x2   :  { %6527 = sst [smem:[#allocation41_spill]] %s6488_s1 }
   0x3   :  { %6528 = sst [smem:[#allocation42_spill]] %s6489_s2 }
   0x4   :  { %6529 = sst [smem:[#allocation43_spill]] %s6490_s3 }
   0x5   :  { %6530 = sst [smem:[#allocation44_spill]] %s6491_s4 }
   0x6   :  { %6531 = sst [smem:[#allocation45_spill]] %s6492_s5 }
   0x7   :  { %6532 = sst [smem:[#allocation46_spill]] %s6493_s6 }
   0x8   :  { %6533 = sst [smem:[#allocation47_spill]] %s6494_s7 }
   0x9   :  { %6534 = sst [smem:[#allocation48_spill]] %s6495_s8 }
   0xa   :  { %6535 = sst [smem:[#allocation49_spill]] %s6496_s9 }
   0xb   :  { %6536 = sst [smem:[#allocation50_spill]] %s6498_s11 }
   0xc   :  { %6537 = sst [smem:[#allocation51_spill]] %s6507_s20 }
   0xd   :  { %6538 = sst [smem:[#allocation52_spill]] %s6510_s23 }
   0xe   :  { %6539 = sst [smem:[#allocation53_spill]] %s6511_s24 }
   0xf   :  { %6540 = sst [smem:[#allocation54_spill]] %s6512_s25 }
  0x10   :  { %31 = vsyncpa [#allocation3], 0 }
  0x11   :  { %32 = vsyncpa [#allocation6], 0 }
  0x12   :  { %33 = vsyncpa [#allocation9], 0 }
  0x13   :  { %34 = vsyncpa [#allocation12], 0 }
  0x14   :  { %35 = vsyncpa [#allocation15], 0 }
  0x15   :  { %36 = vsyncpa [#allocation18], 0 }
  0x16   :  { %37 = vsyncpa [#allocation21], 0 }
  0x17   :  { %38 = vsyncpa [#allocation4], 0 }
  0x18   :  { %40 = vsyncpa [#allocation4 + $0x1], 0  ;;  %s5377_s29 = smov 0   ;;  %s5379_s2 = smov 0  }
  0x19   :  { %s5381_s6 = smov 0   ;;  %s5383_s30 = smov 0  }
  0x1a LB: > { %6541 = sst [smem:[#allocation32_spill]] %s5202_s29  ;;  %s5398_s7 = sadd.s32 4294967295, %s5214_s30   ;;  %s5214_s30 = sphi %s5383_s30, %s6575_s30   ;;  %s5210_s6 = sphi %s5381_s6, %s6578_s6   ;;  %s5206_s2 = sphi %s5379_s2, %s6577_s2   ;;  %s5202_s29 = sphi %s5377_s29, %s6576_s29  }
  0x1b   : > { %6542 = sst [smem:[#allocation33_spill]] %s5206_s2  ;;  %s4155_s3 = sadd.s32 4294967294, %s5214_s30  }
  0x1c   : > { %6543 = sst [smem:[#allocation34_spill]] %s5210_s6  ;;  %s5402_s26 = sadd.s32 1, %s5214_s30  }
  0x1d   : > { %6544 = sst [smem:[#allocation35_spill]] %s5214_s30  ;;  %s567_s1 = sadd.s32 1, %s5210_s6 }
  0x1e   : > { %6545 = sst [smem:[#allocation36_spill]] %s5402_s26  ;;  %s564_s8 = ssub.s32 %s5214_s30, %s5402_s26 }
  0x1f   : > { %p577_p0 = scmp.ne.s32.totalorder %s5210_s6, %s5206_s2  ;;  %p565_p1 = scmp.eq.s32.totalorder %s564_s8, 0 }
  0x20   : > { %p578_p2 = scmp.eq.s32.totalorder %s5398_s7, 1  ;;  %p583_p3 = scmp.ne.s32.totalorder %s5206_s2, %s5202_s29 }
  0x21   : > { %p584_p4 = scmp.eq.s32.totalorder %s4155_s3, 1  ;;  %p4156_p7 = scmp.ge.s32.totalorder %s5214_s30, 1 }
  0x22   : > { %s5413_s27 = scalar_select %p565_p1, %s5210_s6, %s567_s1  }
  0x23   : > { %p5415_p5 = por %p578_p2, %p577_p0  ;;  %p5419_p6 = por %p584_p4, %p583_p3 }
  0x24   : > { %6546 = sst [smem:[#allocation37_spill]] %s5413_s27  ;;  %p617_p8 = scmp.lt.s32.totalorder %s5214_s30, 3 }
  0x25   : > { %s6547_s4 = scalar_select %p5415_p5, 1, 0 }
  0x26   : > { %s6549_s28 = scalar_select %p5419_p6, 1, 0 }
  0x27   : > { %6548 = sst [smem:[#allocation38_spill]] %s6547_s4  ;;  %p4515_p9 = scmp.eq.s32.totalorder %s5398_s7, 0 }
  0x28   : > { %6550 = sst [smem:[#allocation39_spill]] %s6549_s28  ;;  %p5426_p10 = pnand %p4156_p7, %p617_p8 }
  0x29   : > { %s6552_s3 = sld [smem:[#allocation43_spill]]  ;;  %s5216_s27 = smov [#allocation5]  }
  0x2a   : > { %p4471_p11 = pneg %p5426_p10  ;;  %s644_s6 = sshll.u32 %s5216_s27, 4  ;;  %s645_s6 = int_to_ptr.vmem [resolvable:$true] %s644_s6 }
  0x2b   : > { %s6554_s29 = sld [smem:[#allocation45_spill]]  ;;  %s5217_s5 = smov 64  }
  0x2c   : > { %p5437_p12 = pnand %p4515_p9, %p4471_p11  ;;  %s5218_s0 = smov 4  }
  0x2d   : > { %s6555_s23 = sld [smem:[#allocation48_spill]]  ;;  %s6524_s26 = smov 128  }
  0x2e   : > { %s6556_s11 = sld [smem:[#allocation50_spill]]  ;;  %s797_s28 = sshll.u32 %s6505_s18, 4  ;;  %s798_s28 = int_to_ptr.hbm [resolvable:$true] %s797_s28 }
  0x2f   : > { %s642_s1 = sshll.u32 %s6552_s3, 4  ;;  %s5219_s3 = smov [#allocation8]   ;;  %s643_s1 = int_to_ptr.hbm [resolvable:$true] %s642_s1 }
  0x30   : > { %4477 = dma.hbm_to_vmem [thread:$0]  (!%p5437_p12), %s643_s1, 256, %s645_s6, [#allocation6], %s5217_s5, %s5217_s5, %s5218_s0  }
  0x31   : > { %s670_s30 = sshll.u32 %s6554_s29, 4  ;;  %s672_s25 = sshll.u32 %s5219_s3, 4  ;;  %s671_s30 = int_to_ptr.hbm [resolvable:$true] %s670_s30  ;;  %s673_s25 = int_to_ptr.vmem [resolvable:$true] %s672_s25 }
  0x32   : > { %s6525_s29 = smov 8   ;;  %s5222_s1 = smov [#allocation11]  }
  0x33   : > { %s701_s27 = sshll.u32 %s6555_s23, 4  ;;  %s703_s3 = sshll.u32 %s5222_s1, 4  ;;  %s702_s27 = int_to_ptr.hbm [resolvable:$true] %s701_s27  ;;  %s704_s3 = int_to_ptr.vmem [resolvable:$true] %s703_s3 }
  0x34   : > { %4483 = dma.hbm_to_vmem [thread:$0]  (!%p5437_p12), %s671_s30, 512, %s673_s25, [#allocation9], %s6524_s26, %s6524_s26, %s6525_s29  }
  0x35   : > { %s732_s6 = sshll.u32 %s6556_s11, 4  ;;  %s5223_s23 = smov [#allocation14]   ;;  %s733_s6 = int_to_ptr.hbm [resolvable:$true] %s732_s6 }
  0x36   : > { %4489 = dma.hbm_to_vmem [thread:$0]  (!%p5437_p12), %s702_s27, 256, %s704_s3, [#allocation12], %s5217_s5, %s5217_s5, %s5218_s0  }
  0x37   : > { %s734_s24 = sshll.u32 %s5223_s23, 4  ;;  %s766_s25 = sshll.u32 %s6502_s15, 4  ;;  %s735_s24 = int_to_ptr.vmem [resolvable:$true] %s734_s24  ;;  %s767_s25 = int_to_ptr.hbm [resolvable:$true] %s766_s25 }
  0x38   : > { %4495 = dma.hbm_to_vmem [thread:$0]  (!%p5437_p12), %s733_s6, 512, %s735_s24, [#allocation15], %s5217_s5, %s5217_s5, %s5218_s0  }
  0x39   : > { %s5224_s1 = smov [#allocation17]   ;;  %s5225_s20 = smov [#allocation20]  }
  0x3a   : > { %s768_s27 = sshll.u32 %s5224_s1, 4  ;;  %s799_s3 = sshll.u32 %s5225_s20, 4  ;;  %s769_s27 = int_to_ptr.vmem [resolvable:$true] %s768_s27  ;;  %s800_s3 = int_to_ptr.vmem [resolvable:$true] %s799_s3 }
  0x3b   : > { %4501 = dma.hbm_to_vmem [thread:$0]  (!%p5437_p12), %s767_s25, 256, %s769_s27, [#allocation18], %s5217_s5, %s5217_s5, %s5218_s0  }
  0x3c   : > { %s6557_s26 = sld [smem:[#allocation42_spill]]  ;;  %s5226_s29 = smov [#allocation2]  }
  0x3d   : > { %4507 = dma.hbm_to_vmem [thread:$0]  (!%p5437_p12), %s798_s28, 256, %s800_s3, [#allocation21], %s5217_s5, %s5217_s5, %s5218_s0  }
  0x3e   : > { %s6558_s30 = sld [smem:[#allocation44_spill]]  ;;  %s630_s25 = sshll.u32 %s5226_s29, 4  ;;  %s631_s25 = int_to_ptr.vmem [resolvable:$true] %s630_s25 }
  0x3f   : > { %s6559_s4 = sld [smem:[#allocation47_spill]]  ;;  %s6560_s3 = smov 8  }
  0x40   : > { %s6561_s24 = smov 128   ;;  %s5228_s11 = smov [#allocation10]  }
  0x42   : > { %s628_s6 = sshll.u32 %s6557_s26, 4  ;;  %s5227_s26 = smov [#allocation7]   ;;  %s629_s6 = int_to_ptr.hbm [resolvable:$true] %s628_s6 }
  0x43   : > { %4474 = dma.hbm_to_vmem [thread:$0]  (!%p5437_p12), %s629_s6, 1024, %s631_s25, [#allocation3], %s5217_s5, %s5217_s5, %s5218_s0  }
  0x44   : > { %s656_s1 = sshll.u32 %s6558_s30, 4  ;;  %s658_s27 = sshll.u32 %s5227_s26, 4  ;;  %s657_s1 = int_to_ptr.hbm [resolvable:$true] %s656_s1  ;;  %s659_s27 = int_to_ptr.vmem [resolvable:$true] %s658_s27 }
  0x45   : > { %s687_s28 = sshll.u32 %s6559_s4, 4  ;;  %s718_s30 = sshll.u32 %s6497_s10, 4  ;;  %s688_s28 = int_to_ptr.hbm [resolvable:$true] %s687_s28  ;;  %s719_s30 = int_to_ptr.hbm [resolvable:$true] %s718_s30 }
  0x46   : > { %4480 = dma.hbm_to_vmem [thread:$0]  (!%p5437_p12), %s657_s1, 512, %s659_s27, [#allocation6], %s6561_s24, %s6561_s24, %s6560_s3  }
  0x47   : > { %s689_s6 = sshll.u32 %s5228_s11, 4  ;;  %s5229_s25 = smov [#allocation13]   ;;  %s690_s6 = int_to_ptr.vmem [resolvable:$true] %s689_s6 }
  0x48   : > { %4486 = dma.hbm_to_vmem [thread:$0]  (!%p5437_p12), %s688_s28, 256, %s690_s6, [#allocation9], %s5217_s5, %s5217_s5, %s5218_s0  }
  0x49   : > { %s720_s26 = sshll.u32 %s5229_s25, 4  ;;  %s752_s1 = sshll.u32 %s6501_s14, 4  ;;  %s721_s26 = int_to_ptr.vmem [resolvable:$true] %s720_s26  ;;  %s753_s1 = int_to_ptr.hbm [resolvable:$true] %s752_s1 }
  0x4a   : > { %4492 = dma.hbm_to_vmem [thread:$0]  (!%p5437_p12), %s719_s30, 256, %s721_s26, [#allocation12], %s5217_s5, %s5217_s5, %s5218_s0  }
  0x4b   : > { %s783_s4 = sshll.u32 %s6504_s17, 4  ;;  %s5230_s28 = smov [#allocation16]   ;;  %s784_s4 = int_to_ptr.hbm [resolvable:$true] %s783_s4 }
  0x4c   : > { %s754_s3 = sshll.u32 %s5230_s28, 4  ;;  %s5231_s24 = smov [#allocation19]   ;;  %s755_s3 = int_to_ptr.vmem [resolvable:$true] %s754_s3 }
  0x4d   : > { %4498 = dma.hbm_to_vmem [thread:$0]  (!%p5437_p12), %s753_s1, 256, %s755_s3, [#allocation15], %s5217_s5, %s5217_s5, %s5218_s0  }
  0x4e   : > { %s785_s29 = sshll.u32 %s5231_s24, 4  ;;  %s811_s30 = sshll.u32 %s6506_s19, 4  ;;  %s786_s29 = int_to_ptr.vmem [resolvable:$true] %s785_s29  ;;  %s812_s30 = int_to_ptr.hbm [resolvable:$true] %s811_s30 }
  0x4f   : > { %4504 = dma.hbm_to_vmem [thread:$0]  (!%p5437_p12), %s784_s4, 256, %s786_s29, [#allocation18], %s5217_s5, %s5217_s5, %s5218_s0  }
  0x50   : > { %s5232_s25 = smov [#allocation22]   ;;  %855 = sbr.rel (%p5426_p10) target bundleno = 5387 (0x150b), region = 116 }
  0x51   : > { %s813_s26 = sshll.u32 %s5232_s25, 4  ;;  %s814_s26 = int_to_ptr.vmem [resolvable:$true] %s813_s26 }
  0x52   : > { %4510 = dma.hbm_to_vmem [thread:$0]  (!%p5437_p12), %s812_s30, 256, %s814_s26, [#allocation21], %s5217_s5, %s5217_s5, %s5218_s0  }
  0x55   : > { %5169 = dma.done.wait (%p4515_p9), [#allocation3], 1024  }
  0x56   : > { %5171 = vsyncadd (%p4515_p9), [#allocation3], 4294966272 }
  0x57   : > { %5173 = dma.done.wait (%p4515_p9), [#allocation6], 768  }
  0x58   : > { %5175 = vsyncadd (%p4515_p9), [#allocation6], 4294966528 }
  0x59   : > { %5177 = dma.done.wait (%p4515_p9), [#allocation9], 768  }
  0x5a   : > { %5179 = vsyncadd (%p4515_p9), [#allocation9], 4294966528 }
  0x5b   : > { %5181 = dma.done.wait (%p4515_p9), [#allocation12], 512  }
  0x5c   : > { %5183 = vsyncadd (%p4515_p9), [#allocation12], 4294966784 }
  0x5d   : > { %5185 = dma.done.wait (%p4515_p9), [#allocation15], 768  }
  0x5e   : > { %5187 = vsyncadd (%p4515_p9), [#allocation15], 4294966528 }
  0x5f   : > { %5189 = dma.done.wait (%p4515_p9), [#allocation18], 512  }
  0x60   : > { %5191 = vsyncadd (%p4515_p9), [#allocation18], 4294966784 }
  0x61   : > { %5193 = dma.done.wait (%p4515_p9), [#allocation21], 512  }
  0x62   : > { %5195 = vsyncadd (%p4515_p9), [#allocation21], 4294966784  ;;  %p991_p13 = scmp.lt.s32.totalorder %s5398_s7, 1  ;;  %v5233_v0 = vmov 0   ;;  %s6562_s20 = sld [smem:[#allocation40_spill]]  ;;  %v5582_v2 = vld [vmem:[#allocation2 + $0x38] sm:$0xff]  ;;  %v1021_v10 = vlaneseq }
  0x63   : > { %4605 = vset.pattern.permute.xlu0 %v5233_v0  ;;  %4626 = vset.pattern.permute.xlu2 %v5233_v0  ;;  %v5585_v3 = vld [vmem:[#allocation2 + $0x30] sm:$0xff]  ;;  %v5588_v4 = vld [vmem:[#allocation2 + $0x28] sm:$0xff]  ;;  %v5591_v5 = vld [vmem:[#allocation2 + $0x20] sm:$0xff]  ;;  %v5234_v13 = vmov 1.0|1.0   ;;  %vm1093_vm2 = vcmask 261120  }
  0x64   : > { %s5574_s9 = scalar_select %p991_p13, %s5398_s7, 1  ;;  %4657 = vset.pattern.permute.xlu1 %v5233_v0  ;;  %1078 = vmatpush.bf16.msra.mxu0 %v5582_v2  ;;  %v5594_v6 = vld [vmem:[#allocation2 + $0x18] sm:$0xff]  ;;  %v5597_v7 = vld [vmem:[#allocation2 + $0x10] sm:$0xff]  ;;  %v5600_v8 = vld [vmem:[#allocation2 + $0x8] sm:$0xff]  ;;  %v5607_v11 = vand.u32 127, %v1021_v10  ;;  %v5235_v18 = vmov 32.0  }
  0x65   : > { %v5603_v9 = vld [vmem:[#allocation2] sm:$0xff]  ;;  %4665 = vrcp.f32 %v5235_v18  ;;  %v4390_v22 = vld [vmem:[#allocation10 + $0x8] sm:$0xff]  ;;  %v4389_v24 = vld [vmem:[#allocation10] sm:$0xff]  ;;  %s6563_s27 = sld [smem:[#allocation46_spill]]  ;;  %s5236_s4 = smov 104   ;;  %vm1173_vm7 = vcmask 1047556  }
  0x66   : > { %s4186_s8 = sshll.u32 %s5574_s9, 3  ;;  %1147 = vmatpush.bf16.msra.mxu1 %v4390_v22  ;;  %s5237_s28 = smov 120   ;;  %v5240_v49 = vmov 1983009808   ;;  %v5241_v63 = vmov 1934713408  }
  0x67   : > { %s5238_s3 = smov 112   ;;  %s5239_s24 = smov 96   ;;  %v1178_v50 = vunpack.c.l.s4 %v5240_v49  ;;  %v1202_v0 = vunpack.c.l.s4 %v5241_v63  ;;  %vm1539_vm8 = vcmask 64512   ;;  %vm1667_vm9 = vcmask 1043456  }
  0x68   : > { %s994_s23 = scalar_lea.vmem %s6562_s20, %s4186_s8  ;;  %1079 = vmatpush.bf16.msra.mxu0 %v5585_v3  ;;  %s5242_s29 = smov 64   ;;  %vm1864_vm13 = vcmask 130048   ;;  %vm1866_vm14 = vcmask 195584  }
  0x69   : > { %v1020_v1 = vld [vmem:[%s994_s23] sm:$0xff]  ;;  %v5636_v54 = vunpack.c.0.s8 %v1178_v50  ;;  %s6564_s30 = sld [smem:[#allocation41_spill]]  ;;  %s5244_s26 = smov 16  }
  0x6a   : > { %1024 = vperm.xlu0 %4605, %v1020_v1   ;;  %1148 = vmatpush.bf16.msra.mxu1 %v4389_v24  ;;  %s5246_s5 = smov 24   ;;  %s6565_s23 = sld [smem:[#allocation49_spill]] }
  0x6b   : > { %v4666_v19 = vpop.eup %4665  ;;  %v4658_v36 = vld [vmem:[%s6563_s27] ss:$0 sm:$0xff]  ;;  %s6566_s1 = sld [smem:[#allocation51_spill]] }
  0x6c   : > { %1080 = vmatpush.bf16.msra.mxu0 %v5588_v4  ;;  %v1098_v20 = vmul.f32 32.0, %v4666_v19  ;;  %vm1102_vm3 = vweird.f32 %v4666_v19  ;;  %s6570_s0 = sld [smem:[#allocation53_spill]] }
  0x6e   : > { %v1099_v21 = vsub.f32 1.0, %v1098_v20 }
  0x6f   : > { %s5799_s25 = scalar_lea.vmem %s6564_s30, %s4186_s8  ;;  %s5245_s8 = smov 8  }
  0x70   : > { %1081 = vmatpush.bf16.msra.mxu0 %v5591_v5  ;;  %v1100_v23 = vmul.f32 %v4666_v19, %v1099_v21 }
  0x72   : > { %v1101_v25 = vadd.f32 %v4666_v19, %v1100_v23  ;;  %s5144_s6 = scalar_lea.hbm %s6570_s0, 16 }
  0x74   : > { %1082 = vmatpush.bf16.msra.mxu0 %v5594_v6  ;;  %v5615_v26 = vsel %vm1102_vm3, %v4666_v19, %v1101_v25 }
  0x78   : > { %1083 = vmatpush.bf16.msra.mxu0 %v5597_v7 }
  0x7c   : > { %1084 = vmatpush.bf16.msra.mxu0 %v5600_v8 }
  0x80   : > { %1085 = vmatpush.bf16.msra.mxu0 %v5603_v9 }
  0xdc   : > { %v1025_v12 = vpop.permute.xlu0 %1024 }
  0xdd   : > { %vm1026_vm0 = vcmp.eq.s32.totalorder %v5607_v11, %v1025_v12 }
  0xde   : > { %vm4222_vm1 = vmpackc.low %vm1026_vm0, %vm1026_vm0  ;;  %vm2045_vm0 = vcmp.eq.s32.totalorder %v5607_v11, 0 }
  0xdf   : > { %4223 = vmatmul.msk.bf16.vlgmr.msra.gmra.mxu0 %vm4222_vm1, %v5234_v13 }
 0x15c   : > { %v5610_v14 = vpop.f32.mrf.mxu0 }
 0x15d   : > { %v1092_v15 = vmul.f32 %v5610_v14, %v5610_v14 }
 0x15f   : > { %v1094_v16 = vsel %vm1093_vm2, %v1092_v15, 0.0 }
 0x160   : > { %1095 = vadd.xlane.f32.xlu0 %v1094_v16  ;;  %v5646_v16 = vunpack.c.0.s8 %v1202_v0 }
 0x164   : > { %v1089_v17 = vpop.f32.mrf.mxu0 }
 0x1d3   : > { %v1096_v27 = vpop.xlane.xlu0 %1095 }
 0x1d4   : > { %v1104_v28 = vmul.f32 %v5615_v26, %v1096_v27 }
 0x1d6   : > { %v1105_v29 = vadd.f32 1e-06, %v1104_v28 }
 0x1d8   : > { %4667 = vrsqrt.f32 %v1105_v29  ;;  %vm1112_vm5 = vweird.f32 %v1105_v29 }
 0x1de   : > { %v4668_v30 = vpop.eup %4667 }
 0x1df   : > { %v1107_v31 = vmul.f32 %v4668_v30, %v1105_v29  ;;  %vm1113_vm4 = vweird.f32 %v4668_v30 }
 0x1e0   : > { %vm1114_vm6 = vmor %vm1112_vm5, %vm1113_vm4 }
 0x1e1   : > { %v1108_v32 = vmul.f32 %v4668_v30, %v1107_v31 }
 0x1e3   : > { %v1109_v33 = vmul.f32 0.5, %v1108_v32 }
 0x1e5   : > { %v1110_v34 = vsub.f32 1.5, %v1109_v33 }
 0x1e7   : > { %v1111_v35 = vmul.f32 %v4668_v30, %v1110_v34 }
 0x1e9   : > { %v1115_v37 = vsel %vm1114_vm6, %v4668_v30, %v1111_v35 }
 0x1ea   : > { %v1116_v38 = vmul.f32 %v1115_v37, %v5610_v14 }
 0x1ec   : > { %v1120_v39 = vmul.f32 %v4658_v36, %v1116_v38 }
 0x1ee   : > { %v1125_v40 = vpack.c.bf16 %v1120_v39, %v1120_v39 }
 0x1f0   : > { %4232 = vmatmul.msk.bf16.vlgmr.msra.gmra.mxu1 %vm1093_vm2, %v1125_v40 }
 0x26d   : > { %v1150_v41 = vpop.f32.mrf.mxu1 }
 0x26e   : > { %1169 = vrot.lane.b32.xlu2 %v1150_v41, %s5236_s4  ;;  %1163 = vrot.lane.b32.xlu1 %v1150_v41, %s5237_s28  ;;  %v1175_v51 = vrot.slane %v1150_v41, 4 }
 0x275   : > { %v1152_v42 = vpop.f32.mrf.mxu1 }
 0x276   : > { %1166 = vrot.lane.b32.xlu1 %v1150_v41, %s5238_s3 }
 0x2c8   : > { %v1170_v45 = vpop.permute.xlu2 %1169 }
 0x2c9   : > { %v1185_v58 = vrot.slane %v1170_v45, 4 }
 0x2e0   : > { %v1164_v43 = vpop.permute.xlu1 %1163 }
 0x2e1   : > { %v5626_v44 = vpack.i.bf16 %v1164_v43, %v1150_v41  ;;  %v1187_v55 = vrot.slane %v1164_v43, 4  ;;  %v1186_v59 = vsel %vm1173_vm7, %v1185_v58, %v1164_v43 }
 0x2e2   : > { %v1192_v1 = vperm.slane %v1186_v59, %v5636_v54 }
 0x2e3   : > { %4607 = vrot.lane.b32.xlu2 %v5626_v44, %s5239_s24  ;;  %v1188_v60 = vsel %vm1173_vm7, %v1170_v45, %v1187_v55 }
 0x2e4   : > { %v1196_v12 = vperm.slane %v1188_v60, %v5636_v54  ;;  %v1197_v17 = vrot.slane %v1192_v1, 4 }
 0x2e6   : > { %v1209_v18 = vrot.slane %v1196_v12, 4 }
 0x2e8   : > { %v1167_v46 = vpop.permute.xlu1 %1166 }
 0x2e9   : > { %v5630_v47 = vpack.i.bf16 %v1170_v45, %v1167_v46  ;;  %v1172_v48 = vrot.slane %v1167_v46, 4  ;;  %v1176_v53 = vsel %vm1173_vm7, %v1167_v46, %v1175_v51 }
 0x2ea   : > { %v1184_v57 = vperm.slane %v1176_v53, %v5636_v54 }
 0x2eb   : > { %4612 = vrot.lane.b32.xlu1 %v5630_v47, %s5239_s24  ;;  %v1174_v52 = vsel %vm1173_vm7, %v1172_v48, %v1150_v41 }
 0x2ec   : > { %v1180_v56 = vperm.slane %v1174_v52, %v5636_v54  ;;  %v1211_v62 = vrot.slane %v1184_v57, 4  ;;  %v1210_v23 = vsel %vm1173_vm7, %v1209_v18, %v1184_v57 }
 0x2ed   : > { %v1216_v28 = vperm.slane %v1210_v23, %v5646_v16 }
 0x2ee   : > { %v1199_v61 = vrot.slane %v1180_v56, 4  ;;  %v1212_v15 = vsel %vm1173_vm7, %v1196_v12, %v1211_v62  ;;  %v1198_v22 = vsel %vm1173_vm7, %v1197_v17, %v1180_v56 }
 0x2ef   : > { %v1220_v20 = vperm.slane %v1212_v15, %v5646_v16  ;;  %v1204_v27 = vperm.slane %v1198_v22, %v5646_v16  ;;  %v1225_v38 = vrot.slane %v1216_v28, 4 }
 0x2f0   : > { %v1200_v13 = vsel %vm1173_vm7, %v1192_v1, %v1199_v61 }
 0x2f1   : > { %v1208_v19 = vperm.slane %v1200_v13, %v5646_v16  ;;  %v1227_v30 = vrot.slane %v1220_v20, 4  ;;  %v1221_v36 = vrot.slane %v1204_v27, 4  ;;  %v1226_v59 = vsel %vm1173_vm7, 0.0, %v1225_v38 }
 0x2f3   : > { %v1223_v29 = vrot.slane %v1208_v19, 4  ;;  %v1228_v39 = vsel %vm1173_vm7, 0.0, %v1227_v30  ;;  %v1240_v45 = vsel %vm1173_vm7, %v1227_v30, %v1216_v28  ;;  %v1222_v58 = vsel %vm1173_vm7, 0.0, %v1221_v36 }
 0x2f4   : > { %v1245_v50 = vrot.slane %v1228_v39, 4  ;;  %v1244_v0 = vperm.slane %v1240_v45, %v5636_v54 }
 0x2f5   : > { %v1224_v37 = vsel %vm1173_vm7, 0.0, %v1223_v29  ;;  %v1229_v18 = vsel %vm1173_vm7, %v1223_v29, %v1204_v27 }
 0x2f6   : > { %v1234_v49 = vrot.slane %v1224_v37, 4  ;;  %v1246_v1 = vsel %vm1173_vm7, %v1245_v50, %v1226_v59  ;;  %v1265_v29 = vrot.slane %v1244_v0, 4 }
 0x2f8   : > { %v1235_v19 = vsel %vm1173_vm7, %v1234_v49, %v1222_v58 }
 0x2f9   : > { %v1239_v27 = vperm.slane %v1235_v19, %v5636_v54 }
 0x33d   : > { %v4608_v21 = vpop.permute.xlu2 %4607 }
 0x33e   : > { %v4610_v24 = vunpack.i.h.bf16 %v4608_v21  ;;  %v4609_v25 = vunpack.i.l.bf16 %v4608_v21 }
 0x340   : > { %v1313_v32 = vrot.slane %v4610_v24, 4  ;;  %v1301_v33 = vrot.slane %v4609_v25, 4 }
 0x35d   : > { %v4613_v31 = vpop.permute.xlu1 %4612 }
 0x35e   : > { %v4615_v34 = vunpack.i.h.bf16 %v4613_v31  ;;  %v4614_v35 = vunpack.i.l.bf16 %v4613_v31  ;;  %v1233_v31 = vperm.slane %v1229_v18, %v5636_v54 }
 0x360   : > { %v1311_v40 = vrot.slane %v4615_v34, 4  ;;  %v1314_v41 = vsel %vm1173_vm7, %v4615_v34, %v1313_v32  ;;  %v1299_v42 = vrot.slane %v4614_v35, 4  ;;  %v1302_v43 = vsel %vm1173_vm7, %v4614_v35, %v1301_v33 }
 0x361   : > { %v1322_v46 = vperm.slane %v1314_v41, %v5636_v54  ;;  %v1310_v48 = vperm.slane %v1302_v43, %v5636_v54  ;;  %v1253_v49 = vrot.slane %v1233_v31, 4 }
 0x362   : > { %v1312_v51 = vsel %vm1173_vm7, %v1311_v40, %v4610_v24  ;;  %v1300_v52 = vsel %vm1173_vm7, %v1299_v42, %v4609_v25  ;;  %v1250_v24 = vperm.slane %v1246_v1, %v5636_v54 }
 0x363   : > { %v1318_v53 = vperm.slane %v1312_v51, %v5636_v54  ;;  %v1335_v55 = vrot.slane %v1322_v46, 4  ;;  %v1306_v56 = vperm.slane %v1300_v52, %v5636_v54  ;;  %v1337_v57 = vrot.slane %v1310_v48, 4 }
 0x364   : > { %v1263_v41 = vrot.slane %v1250_v24, 4  ;;  %v1266_v50 = vsel %vm1173_vm7, %v1250_v24, %v1265_v29 }
 0x365   : > { %v1323_v60 = vrot.slane %v1318_v53, 4  ;;  %v1325_v61 = vrot.slane %v1306_v56, 4  ;;  %v1336_v62 = vsel %vm1173_vm7, %v1335_v55, %v1310_v48  ;;  %v1338_v63 = vsel %vm1173_vm7, %v1322_v46, %v1337_v57 }
 0x366   : > { %v1342_v12 = vperm.slane %v1336_v62, %v5646_v16  ;;  %v1346_v13 = vperm.slane %v1338_v63, %v5646_v16  ;;  %v1251_v55 = vrot.slane %v1239_v27, 4  ;;  %v1264_v57 = vsel %vm1173_vm7, %v1263_v41, %v1244_v0 }
 0x367   : > { %v1324_v15 = vsel %vm1173_vm7, %v1323_v60, %v1306_v56  ;;  %v1326_v17 = vsel %vm1173_vm7, %v1318_v53, %v1325_v61  ;;  %v1274_v61 = vperm.slane %v1266_v50, %v5646_v16  ;;  %v1270_v0 = vperm.slane %v1264_v57, %v5646_v16  ;;  %v1160_v50 = vld [vmem:[#allocation7 + $0x10] sm:$0xff] }
 0x368   : > { %v1330_v20 = vperm.slane %v1324_v15, %v5646_v16  ;;  %v1334_v21 = vperm.slane %v1326_v17, %v5646_v16  ;;  %v1351_v22 = vrot.slane %v1342_v12, 4  ;;  %v1353_v23 = vrot.slane %v1346_v13, 4 }
 0x369   : > { %v1252_v15 = vsel %vm1173_vm7, %v1251_v55, %v1233_v31  ;;  %v1275_v29 = vrot.slane %v1270_v0, 4  ;;  %v1158_v55 = vld [vmem:[#allocation7] sm:$0xff] }
 0x36a   : > { %v1347_v25 = vrot.slane %v1330_v20, 4  ;;  %v1349_v28 = vrot.slane %v1334_v21, 4  ;;  %v1354_v30 = vsel %vm1173_vm7, 0.0, %v1353_v23  ;;  %v1366_v32 = vsel %vm1173_vm7, %v1353_v23, %v1342_v12 }
 0x36b   : > { %v1371_v33 = vrot.slane %v1354_v30, 4  ;;  %v1352_v35 = vsel %vm1173_vm7, 0.0, %v1351_v22  ;;  %v1370_v37 = vperm.slane %v1366_v32, %v5636_v54  ;;  %v1254_v12 = vsel %vm1173_vm7, %v1239_v27, %v1253_v49 }
 0x36c   : > { %v1350_v34 = vsel %vm1173_vm7, 0.0, %v1349_v28  ;;  %v1355_v36 = vsel %vm1173_vm7, %v1349_v28, %v1330_v20  ;;  %v1348_v42 = vsel %vm1173_vm7, 0.0, %v1347_v25  ;;  %v1262_v22 = vperm.slane %v1254_v12, %v5646_v16 }
 0x36d   : > { %v1360_v38 = vrot.slane %v1350_v34, 4  ;;  %v1359_v39 = vperm.slane %v1355_v36, %v5636_v54  ;;  %v1372_v40 = vsel %vm1173_vm7, %v1371_v33, %v1352_v35  ;;  %v1391_v45 = vrot.slane %v1370_v37, 4 }
 0x36e   : > { %v1376_v43 = vperm.slane %v1372_v40, %v5636_v54  ;;  %v1279_v23 = vrot.slane %v1274_v61, 4  ;;  %v1258_v30 = vperm.slane %v1252_v15, %v5646_v16 }
 0x36f   : > { %v1361_v46 = vsel %vm1173_vm7, %v1360_v38, %v1348_v42  ;;  %v1379_v48 = vrot.slane %v1359_v39, 4 }
 0x370   : > { %v1365_v51 = vperm.slane %v1361_v46, %v5636_v54  ;;  %v1392_v52 = vsel %vm1173_vm7, %v1376_v43, %v1391_v45  ;;  %v1389_v53 = vrot.slane %v1376_v43, 4  ;;  %v1277_v38 = vrot.slane %v1258_v30, 4 }
 0x371   : > { %v1400_v56 = vperm.slane %v1392_v52, %v5646_v16  ;;  %v1276_v40 = vsel %vm1173_vm7, %v1275_v29, %v1258_v30  ;;  %v1281_v46 = vrot.slane %v1262_v22, 4 }
 0x372   : > { %v1380_v58 = vsel %vm1173_vm7, %v1365_v51, %v1379_v48  ;;  %v1377_v59 = vrot.slane %v1365_v51, 4  ;;  %v1390_v60 = vsel %vm1173_vm7, %v1389_v53, %v1370_v37  ;;  %v1280_v37 = vsel %vm1173_vm7, %v1279_v23, %v1262_v22 }
 0x373   : > { %v1388_v62 = vperm.slane %v1380_v58, %v5646_v16  ;;  %v1405_v63 = vrot.slane %v1400_v56, 4  ;;  %v1396_v1 = vperm.slane %v1390_v60, %v5646_v16  ;;  %v1285_v41 = vpack.c.bf16 %v1280_v37, %v1280_v37 }
 0x374   : > { %v1378_v13 = vsel %vm1173_vm7, %v1377_v59, %v1359_v39  ;;  %v1278_v42 = vsel %vm1173_vm7, %v1270_v0, %v1277_v38  ;;  %v1283_v43 = vpack.c.bf16 %v1276_v40, %v1276_v40  ;;  %v1282_v48 = vsel %vm1173_vm7, %v1274_v61, %v1281_v46 }
 0x375   : > { %v1406_v17 = vsel %vm1173_vm7, %v1405_v63, %v1388_v62  ;;  %v1384_v18 = vperm.slane %v1378_v13, %v5646_v16  ;;  %v1401_v19 = vrot.slane %v1396_v1, 4  ;;  %v1407_v20 = vrot.slane %v1388_v62, 4  ;;  %v1159_v62 = vld [vmem:[#allocation7 + $0x8] sm:$0xff]  ;;  %v1161_v13 = vld [vmem:[#allocation7 + $0x18] sm:$0xff] }
 0x376   : > { %v1411_v21 = vpack.c.bf16 %v1406_v17, %v1406_v17  ;;  %v1284_v45 = vpack.c.bf16 %v1278_v42, %v1278_v42  ;;  %v1286_v49 = vpack.c.bf16 %v1282_v48, %v1282_v48 }
 0x377   : > { %v1402_v24 = vsel %vm1173_vm7, %v1401_v19, %v1384_v18  ;;  %v1408_v25 = vsel %vm1173_vm7, %v1400_v56, %v1407_v20  ;;  %v1403_v28 = vrot.slane %v1384_v18, 4 }
 0x378   : > { %v1582_v31 = vsel %vm1539_vm8, %v1411_v21, 0  ;;  %v1409_v32 = vpack.c.bf16 %v1402_v24, %v1402_v24  ;;  %v1412_v33 = vpack.c.bf16 %v1408_v25, %v1408_v25 }
 0x379   : > { %1591 = vmatpush.bf16.xpose.msrb.mxu1 %v1582_v31  ;;  %v1404_v27 = vsel %vm1173_vm7, %v1396_v1, %v1403_v28 }
 0x37a   : > { %v1544_v34 = vsel %vm1539_vm8, %v1409_v32, 0  ;;  %v1601_v35 = vsel %vm1539_vm8, %v1412_v33, 0  ;;  %v1410_v36 = vpack.c.bf16 %v1404_v27, %v1404_v27 }
 0x37b   : > { %1553 = vmatpush.bf16.xpose.msra.mxu2 %v1544_v34 }
 0x37c   : > { %v1563_v39 = vsel %vm1539_vm8, %v1410_v36, 0 }
 0x37d   : > { %1572 = vmatpush.bf16.xpose.msra.mxu3 %v1563_v39 }
 0x380   : > { %4235 = vmatmul.msk.bf16.vlgmr.msrb.gmra.mxu1 %vm1539_vm8, %v1285_v41 }
 0x382   : > { %4233 = vmatmul.msk.bf16.vlgmr.msra.gmra.mxu2 %vm1539_vm8, %v1283_v43 }
 0x383   : > { %1610 = vmatpush.bf16.xpose.msrb.mxu2 %v1601_v35 }
 0x384   : > { %4234 = vmatmul.msk.bf16.vlgmr.msra.gmra.mxu3 %vm1539_vm8, %v1284_v45 }
 0x392   : > { %4236 = vmatmul.msk.bf16.vlgmr.msrb.gmra.mxu2 %vm1539_vm8, %v1286_v49 }
 0x3fd   : > { %v1593_v51 = vpop.f32.mrf.mxu1 }
 0x3fe   : > { %v1594_v52 = vadd.f32 %v1593_v51, %v1160_v50 }
 0x400   : > { %v1622_v53 = vsel %vm1539_vm8, %v1594_v52, -inf }
 0x401   : > { %1623 = vmax.xlane.f32.xlu1 %v1622_v53 }
 0x405   : > { %v1555_v56 = vpop.f32.mrf.mxu2  ;;  %v1595_v57 = vpop.f32.mrf.mxu1 }
 0x406   : > { %v1556_v58 = vadd.f32 %v1555_v56, %v1158_v55 }
 0x407   : > { %v1574_v59 = vpop.f32.mrf.mxu3 }
 0x408   : > { %v1616_v60 = vsel %vm1539_vm8, %v1556_v58, -inf  ;;  %v1575_v63 = vadd.f32 %v1574_v59, %v1159_v62 }
 0x409   : > { %1617 = vmax.xlane.f32.xlu2 %v1616_v60 }
 0x40a   : > { %v1619_v12 = vsel %vm1539_vm8, %v1575_v63, -inf }
 0x40d   : > { %v1557_v61 = vpop.f32.mrf.mxu2 }
 0x40f   : > { %v1576_v1 = vpop.f32.mrf.mxu3 }
 0x411   : > { %1620 = vmax.xlane.f32.xlu2 %v1619_v12 }
 0x415   : > { %v1612_v15 = vpop.f32.mrf.mxu2 }
 0x416   : > { %v1613_v0 = vadd.f32 %v1612_v15, %v1161_v13 }
 0x418   : > { %v1625_v17 = vsel %vm1539_vm8, %v1613_v0, -inf }
 0x419   : > { %1626 = vmax.xlane.f32.xlu0 %v1625_v17 }
 0x41d   : > { %v1614_v18 = vpop.f32.mrf.mxu2 }
 0x429   : > { %4622 = vrot.lane.b32.xlu2 %v5630_v47, %s5242_s29 }
 0x42d   : > { %4617 = vrot.lane.b32.xlu0 %v5626_v44, %s5242_s29 }
 0x474   : > { %v1624_v19 = vpop.xlane.xlu1 %1623 }
 0x475   : > { %v1630_v22 = vsub.f32 %v1594_v52, %v1624_v19 }
 0x477   : > { %v1636_v24 = vmul.f32 1.442695, %v1630_v22 }
 0x47c   : > { %v1618_v20 = vpop.xlane.xlu2 %1617 }
 0x47d   : > { %v1628_v21 = vsub.f32 %v1556_v58, %v1618_v20 }
 0x47f   : > { %v1632_v23 = vmul.f32 1.442695, %v1628_v21 }
 0x481   : > { %4669 = vpow2.f32 %v1632_v23 }
 0x482   : > { %4671 = vpow2.f32 %v1636_v24 }
 0x484   : > { %v1621_v25 = vpop.xlane.xlu2 %1620 }
 0x485   : > { %v1629_v30 = vsub.f32 %v1575_v63, %v1621_v25 }
 0x487   : > { %v5734_v28 = vpop.eup %4669  ;;  %v1634_v47 = vmul.f32 1.442695, %v1629_v30 }
 0x488   : > { %v1640_v31 = vsel %vm1539_vm8, %v5734_v28, 0.0  ;;  %v5738_v33 = vpop.eup %4671 }
 0x489   : > { %1641 = vadd.xlane.f32.xlu1 %v1640_v31  ;;  %4673 = vpow2.f32 %v1634_v47  ;;  %v1646_v29 = vsel %vm1539_vm8, %v5738_v33, 0.0 }
 0x48c   : > { %v1627_v32 = vpop.xlane.xlu0 %1626  ;;  %v4623_v38 = vpop.permute.xlu2 %4622 }
 0x48d   : > { %v1631_v44 = vsub.f32 %v1613_v0, %v1627_v32  ;;  %v4625_v39 = vunpack.i.h.bf16 %v4623_v38  ;;  %v4624_v40 = vunpack.i.l.bf16 %v4623_v38 }
 0x48f   : > { %v1638_v27 = vmul.f32 1.442695, %v1631_v44  ;;  %v5742_v34 = vpop.eup %4673  ;;  %v1437_v42 = vrot.slane %v4625_v39, 4  ;;  %v1425_v43 = vrot.slane %v4624_v40, 4 }
 0x490   : > { %v1643_v37 = vsel %vm1539_vm8, %v5742_v34, 0.0 }
 0x491   : > { %4675 = vpow2.f32 %v1638_v27  ;;  %1647 = vadd.xlane.f32.xlu1 %v1646_v29 }
 0x497   : > { %v5744_v35 = vpop.eup %4675 }
 0x498   : > { %v1649_v36 = vsel %vm1539_vm8, %v5744_v35, 0.0 }
 0x499   : > { %1650 = vadd.xlane.f32.xlu0 %v1649_v36  ;;  %1644 = vadd.xlane.f32.xlu1 %v1643_v37 }
 0x49f   : > { %v4618_v41 = vpop.permute.xlu0 %4617 }
 0x4a0   : > { %v4620_v45 = vunpack.i.h.bf16 %v4618_v41  ;;  %v4619_v46 = vunpack.i.l.bf16 %v4618_v41 }
 0x4a2   : > { %v1439_v48 = vrot.slane %v4620_v45, 4  ;;  %v1426_v49 = vsel %vm1173_vm7, %v1425_v43, %v4619_v46  ;;  %v1427_v50 = vrot.slane %v4619_v46, 4  ;;  %v1438_v51 = vsel %vm1173_vm7, %v1437_v42, %v4620_v45 }
 0x4a3   : > { %v1432_v52 = vperm.slane %v1426_v49, %v5636_v54  ;;  %v1444_v53 = vperm.slane %v1438_v51, %v5636_v54 }
 0x4a4   : > { %v1428_v55 = vsel %vm1173_vm7, %v4624_v40, %v1427_v50  ;;  %v1440_v56 = vsel %vm1173_vm7, %v4625_v39, %v1439_v48 }
 0x4a5   : > { %v1436_v57 = vperm.slane %v1428_v55, %v5636_v54  ;;  %v1448_v58 = vperm.slane %v1440_v56, %v5636_v54  ;;  %v1449_v59 = vrot.slane %v1444_v53, 4  ;;  %v1451_v60 = vrot.slane %v1432_v52, 4 }
 0x4a7   : > { %v1450_v62 = vsel %vm1173_vm7, %v1449_v59, %v1432_v52  ;;  %v1452_v63 = vsel %vm1173_vm7, %v1444_v53, %v1451_v60  ;;  %v1461_v61 = vrot.slane %v1448_v58, 4  ;;  %v1463_v1 = vrot.slane %v1436_v57, 4 }
 0x4a8   : > { %v1456_v12 = vperm.slane %v1450_v62, %v5646_v16  ;;  %v1460_v13 = vperm.slane %v1452_v63, %v5646_v16 }
 0x4a9   : > { %v1462_v15 = vsel %vm1173_vm7, %v1461_v61, %v1436_v57  ;;  %v1464_v0 = vsel %vm1173_vm7, %v1448_v58, %v1463_v1 }
 0x4aa   : > { %v1468_v17 = vperm.slane %v1462_v15, %v5646_v16  ;;  %v1472_v18 = vperm.slane %v1464_v0, %v5646_v16  ;;  %v1473_v19 = vrot.slane %v1456_v12, 4  ;;  %v1475_v20 = vrot.slane %v1460_v13, 4 }
 0x4ac   : > { %v1476_v21 = vsel %vm1173_vm7, 0.0, %v1475_v20  ;;  %v1477_v22 = vrot.slane %v1468_v17, 4  ;;  %v1479_v23 = vrot.slane %v1472_v18, 4  ;;  %v1481_v24 = vsel %vm1173_vm7, %v1475_v20, %v1456_v12 }
 0x4ad   : > { %v1486_v25 = vrot.slane %v1476_v21, 4  ;;  %v1474_v30 = vsel %vm1173_vm7, 0.0, %v1473_v19  ;;  %v1485_v47 = vperm.slane %v1481_v24, %v5636_v54  ;;  %v2027_v19 = vld [vmem:[%s5799_s25] sm:$0xff] }
 0x4ae   : > { %v1480_v31 = vsel %vm1173_vm7, 0.0, %v1479_v23  ;;  %v1492_v32 = vsel %vm1173_vm7, %v1479_v23, %v1468_v17  ;;  %v1478_v36 = vsel %vm1173_vm7, 0.0, %v1477_v22  ;;  %vm2028_vm10 = vcmp.eq.s32.totalorder %v2027_v19, 4294967196 }
 0x4af   : > { %v1487_v44 = vsel %vm1173_vm7, %v1486_v25, %v1474_v30  ;;  %v1497_v27 = vrot.slane %v1480_v31, 4  ;;  %v1496_v29 = vperm.slane %v1492_v32, %v5636_v54  ;;  %v1505_v38 = vrot.slane %v1485_v47, 4 }
 0x4b0   : > { %v1491_v37 = vperm.slane %v1487_v44, %v5636_v54  ;;  %v2029_v20 = vsel %vm2028_vm10, 0, %v2027_v19 }
 0x4b1   : > { %v1498_v39 = vsel %vm1173_vm7, %v1497_v27, %v1478_v36  ;;  %v1517_v40 = vrot.slane %v1496_v29, 4  ;;  %2033 = vperm.xlu2 %4626, %v2029_v20  }
 0x4b2   : > { %v1502_v41 = vperm.slane %v1498_v39, %v5636_v54  ;;  %v1503_v42 = vrot.slane %v1491_v37, 4  ;;  %v1506_v43 = vsel %vm1173_vm7, %v1491_v37, %v1505_v38  ;;  %v5811_v39 = vshrl.u32 %v1021_v10, 7 }
 0x4b3   : > { %v1514_v45 = vperm.slane %v1506_v43, %v5646_v16 }
 0x4b4   : > { %v1504_v46 = vsel %vm1173_vm7, %v1503_v42, %v1485_v47  ;;  %v1515_v48 = vrot.slane %v1502_v41, 4  ;;  %v1518_v49 = vsel %vm1173_vm7, %v1502_v41, %v1517_v40  ;;  %v2039_v40 = vadd.s32 1, %v5607_v11 }
 0x4b5   : > { %v1510_v50 = vperm.slane %v1504_v46, %v5646_v16  ;;  %v1526_v51 = vperm.slane %v1518_v49, %v5646_v16  ;;  %v1533_v52 = vrot.slane %v1514_v45, 4  ;;  %v5243_v41 = vmov 0.0  }
 0x4b6   : > { %v1516_v53 = vsel %vm1173_vm7, %v1515_v48, %v1496_v29  ;;  %vm2040_vm12 = vcmp.eq.s32.totalorder %v5811_v39, %v2039_v40  ;;  %vm2044_vm15 = vcmp.eq.s32.totalorder %v5811_v39, 0 }
 0x4b7   : > { %v1522_v55 = vperm.slane %v1516_v53, %v5646_v16  ;;  %v1529_v56 = vrot.slane %v1510_v50, 4  ;;  %v1531_v57 = vrot.slane %v1526_v51, 4  ;;  %v1534_v58 = vsel %vm1173_vm7, %v1526_v51, %v1533_v52  ;;  %vm2046_vm1 = vmand %vm2044_vm15, %vm2045_vm0 }
 0x4b8   : > { %v1538_v12 = vpack.c.bf16 %v1534_v58, %v1534_v58 }
 0x4b9   : > { %v1530_v59 = vsel %vm1173_vm7, %v1522_v55, %v1529_v56  ;;  %v1532_v60 = vsel %vm1173_vm7, %v1531_v57, %v1514_v45  ;;  %v1527_v62 = vrot.slane %v1522_v55, 4 }
 0x4ba   : > { %v1536_v63 = vpack.c.bf16 %v1530_v59, %v1530_v59  ;;  %v1537_v61 = vpack.c.bf16 %v1532_v60, %v1532_v60  ;;  %v1726_v18 = vsel %vm1667_vm9, %v1538_v12, 0 }
 0x4bb   : > { %v1528_v1 = vsel %vm1173_vm7, %v1527_v62, %v1510_v50 }
 0x4bc   : > { %v1688_v13 = vsel %vm1667_vm9, %v1536_v63, 0  ;;  %v1707_v15 = vsel %vm1667_vm9, %v1537_v61, 0  ;;  %v1535_v0 = vpack.c.bf16 %v1528_v1, %v1528_v1 }
 0x4bd   : > { %1697 = vmatpush.bf16.msra.mxu1 %v1688_v13  ;;  %1716 = vmatpush.bf16.msra.mxu2 %v1707_v15 }
 0x4be   : > { %v1669_v17 = vsel %vm1667_vm9, %v1535_v0, 0 }
 0x4bf   : > { %1678 = vmatpush.bf16.msrb.mxu3 %v1669_v17 }
 0x4c3   : > { %1735 = vmatpush.bf16.msra.mxu3 %v1726_v18 }
 0x4fc   : > { %v1642_v21 = vpop.xlane.xlu1 %1641 }
 0x4fd   : > { %4677 = vrcp.f32 %v1642_v21 }
 0x503   : > { %v4678_v22 = vpop.eup %4677 }
 0x504   : > { %v1656_v23 = vmul.f32 %v4678_v22, %v5734_v28  ;;  %v1648_v24 = vpop.xlane.xlu1 %1647 }
 0x505   : > { %4679 = vrcp.f32 %v1648_v24 }
 0x506   : > { %v1660_v25 = vpack.c.bf16 %v1656_v23, %v1656_v23 }
 0x508   : > { %4237 = vmatmul.msk.bf16.vlgmr.msrb.gmra.mxu3 %vm1539_vm8, %v1660_v25 }
 0x50b   : > { %v4680_v30 = vpop.eup %4679 }
 0x50c   : > { %v1658_v31 = vmul.f32 %v4680_v30, %v5738_v33  ;;  %v1651_v47 = vpop.xlane.xlu0 %1650  ;;  %v1645_v32 = vpop.xlane.xlu1 %1644 }
 0x50d   : > { %4681 = vrcp.f32 %v1651_v47  ;;  %v2034_v33 = vpop.permute.xlu2 %2033 }
 0x50e   : > { %v1662_v44 = vpack.c.bf16 %v1658_v31, %v1658_v31  ;;  %4683 = vrcp.f32 %v1645_v32  ;;  %vm2035_vm11 = vcmp.eq.s32.totalorder %v5607_v11, %v2034_v33 }
 0x50f   : > { %v4276_v42 = vsel %vm2035_vm11, 1.0, %v5243_v41 }
 0x510   : > { %4239 = vmatmul.msk.bf16.vlgmr.msra.gmra.mxu2 %vm1539_vm8, %v1662_v44 }
 0x513   : > { %v4682_v27 = vpop.eup %4681 }
 0x514   : > { %v4684_v29 = vpop.eup %4683  ;;  %v1659_v36 = vmul.f32 %v4682_v27, %v5744_v35  ;;  %v4277_v35 = vsel %vm2040_vm12, 1.0, %v5243_v41  ;;  %vm1987_vm12 = vcmask 523264  }
 0x515   : > { %v1657_v28 = vmul.f32 %v4684_v29, %v5742_v34  ;;  %v2038_v34 = vpack.c.bf16 %v4276_v42, %v4276_v42  ;;  %v2043_v45 = vpack.c.bf16 %v4277_v35, %v4277_v35 }
 0x516   : > { %v1663_v37 = vpack.c.bf16 %v1659_v36, %v1659_v36 }
 0x517   : > { %v1661_v38 = vpack.c.bf16 %v1657_v28, %v1657_v28  ;;  %v2053_v46 = vsel %vm1667_vm9, %v2038_v34, 0 }
 0x518   : > { %4240 = vmatmul.msk.bf16.vlgmr.msra.gmra.mxu3 %vm1539_vm8, %v1663_v37 }
 0x519   : > { %4238 = vmatmul.msk.bf16.vlgmr.msra.gmra.mxu1 %vm1539_vm8, %v1661_v38  ;;  %2062 = vmatpush.bf16.msrb.mxu3 %v2053_v46 }
 0x528   : > { %4279 = vmatmul.msk.bf16.vlgmr.msrb.gmra.mxu3 %vm1539_vm8, %v2043_v45 }
 0x58b   : > { %v1680_v43 = vpop.f32.mrf.mxu3 }
 0x58c   : > { %v1743_v49 = vrot.slane %v1680_v43, 4 }
 0x593   : > { %v1682_v10 = vpop.f32.mrf.mxu3  ;;  %v1718_v48 = vpop.f32.mrf.mxu2 }
 0x594   : > { %v1741_v50 = vrot.slane %v1718_v48, 4  ;;  %v1744_v51 = vsel %vm1173_vm7, %v1718_v48, %v1743_v49 }
 0x595   : > { %v1752_v55 = vperm.slane %v1744_v51, %v5636_v54 }
 0x596   : > { %v1699_v52 = vpop.f32.mrf.mxu1  ;;  %v1742_v53 = vsel %vm1173_vm7, %v1741_v50, %v1680_v43 }
 0x597   : > { %v1755_v56 = vrot.slane %v1699_v52, 4  ;;  %v1748_v57 = vperm.slane %v1742_v53, %v5636_v54  ;;  %v1779_v63 = vrot.slane %v1752_v55, 4 }
 0x599   : > { %v1767_v13 = vrot.slane %v1748_v57, 4 }
 0x59b   : > { %v1720_v58 = vpop.f32.mrf.mxu2  ;;  %v1737_v59 = vpop.f32.mrf.mxu3 }
 0x59c   : > { %v1753_v60 = vrot.slane %v1737_v59, 4  ;;  %v1756_v62 = vsel %vm1173_vm7, %v1737_v59, %v1755_v56 }
 0x59d   : > { %v1764_v61 = vperm.slane %v1756_v62, %v5636_v54 }
 0x59e   : > { %v1754_v1 = vsel %vm1173_vm7, %v1753_v60, %v1699_v52  ;;  %v1701_v12 = vpop.f32.mrf.mxu1 }
 0x59f   : > { %v1760_v15 = vperm.slane %v1754_v1, %v5636_v54  ;;  %v1777_v0 = vrot.slane %v1764_v61, 4  ;;  %v1780_v17 = vsel %vm1173_vm7, %v1764_v61, %v1779_v63 }
 0x5a0   : > { %v1788_v18 = vperm.slane %v1780_v17, %v5646_v16  ;;  %v4391_v17 = vld [vmem:[#allocation11] sm:$0xff] }
 0x5a1   : > { %v1765_v19 = vrot.slane %v1760_v15, 4  ;;  %v1768_v20 = vsel %vm1173_vm7, %v1760_v15, %v1767_v13  ;;  %v1778_v21 = vsel %vm1173_vm7, %v1777_v0, %v1752_v55  ;;  %v4392_v0 = vld [vmem:[#allocation11 + $0x8] sm:$0xff] }
 0x5a2   : > { %v1776_v22 = vperm.slane %v1768_v20, %v5646_v16  ;;  %v1784_v23 = vperm.slane %v1778_v21, %v5646_v16  ;;  %v1795_v24 = vrot.slane %v1788_v18, 4  ;;  %1890 = vmatpush.bf16.msrb.mxu0 %v4392_v0  ;;  %v4395_v0 = vld [vmem:[#allocation14] sm:$0xff] }
 0x5a3   : > { %v1766_v25 = vsel %vm1173_vm7, %v1765_v19, %v1748_v57  ;;  %v1739_v30 = vpop.f32.mrf.mxu3 }
 0x5a4   : > { %v1772_v31 = vperm.slane %v1766_v25, %v5646_v16  ;;  %v1791_v47 = vrot.slane %v1776_v22, 4  ;;  %v1793_v32 = vrot.slane %v1784_v23, 4  ;;  %v1796_v44 = vsel %vm1173_vm7, 0.0, %v1795_v24 }
 0x5a5   : > { %v1808_v27 = vsel %vm1173_vm7, %v1795_v24, %v1784_v23  ;;  %v1813_v29 = vrot.slane %v1796_v44, 4 }
 0x5a6   : > { %v1789_v36 = vrot.slane %v1772_v31, 4  ;;  %v1792_v28 = vsel %vm1173_vm7, 0.0, %v1791_v47  ;;  %v1794_v37 = vsel %vm1173_vm7, 0.0, %v1793_v32  ;;  %v1812_v38 = vperm.slane %v1808_v27, %v5636_v54  ;;  %1891 = vmatpush.bf16.msrb.mxu0 %v4391_v17  ;;  %v4394_v27 = vld [vmem:[#allocation13 + $0x8] sm:$0xff] }
 0x5a7   : > { %v1802_v33 = vrot.slane %v1792_v28, 4  ;;  %v1797_v40 = vsel %vm1173_vm7, %v1791_v47, %v1772_v31  ;;  %v1814_v42 = vsel %vm1173_vm7, %v1813_v29, %v1794_v37  ;;  %1946 = vmatpush.bf16.msrb.mxu1 %v4394_v27  ;;  %v4400_v37 = vld [vmem:[#allocation16 + $0x8] sm:$0xff] }
 0x5a8   : > { %v1790_v34 = vsel %vm1173_vm7, 0.0, %v1789_v36  ;;  %v1801_v35 = vperm.slane %v1797_v40, %v5636_v54  ;;  %v1818_v43 = vperm.slane %v1814_v42, %v5636_v54  ;;  %v1833_v45 = vrot.slane %v1812_v38, 4  ;;  %v4398_v42 = vld [vmem:[#allocation14 + $0x18] sm:$0xff] }
 0x5a9   : > { %v1803_v46 = vsel %vm1173_vm7, %v1802_v33, %v1790_v34  ;;  %1995 = vmatpush.bf16.msrb.mxu2 %v4398_v42 }
 0x5aa   : > { %v1807_v10 = vperm.slane %v1803_v46, %v5636_v54  ;;  %v1821_v48 = vrot.slane %v1801_v35, 4  ;;  %v1834_v49 = vsel %vm1173_vm7, %v1818_v43, %v1833_v45  ;;  %v1831_v50 = vrot.slane %v1818_v43, 4  ;;  %2069 = vmatpush.bf16.msra.mxu0 %v5582_v2  ;;  %v4397_v45 = vld [vmem:[#allocation14 + $0x10] sm:$0xff] }
 0x5ab   : > { %v1842_v51 = vperm.slane %v1834_v49, %v5646_v16  ;;  %v2064_v18 = vpop.f32.mrf.mxu3  ;;  %v4396_v49 = vld [vmem:[#allocation14 + $0x8] sm:$0xff] }
 0x5ac   : > { %v1822_v52 = vsel %vm1173_vm7, %v1807_v10, %v1821_v48  ;;  %v1819_v53 = vrot.slane %v1807_v10, 4  ;;  %v1832_v55 = vsel %vm1173_vm7, %v1831_v50, %v1812_v38  ;;  %v4399_v38 = vld [vmem:[#allocation16] sm:$0xff] }
 0x5ad   : > { %v1830_v56 = vperm.slane %v1822_v52, %v5646_v16  ;;  %v1847_v57 = vrot.slane %v1842_v51, 4  ;;  %v1838_v58 = vperm.slane %v1832_v55, %v5646_v16  ;;  %1996 = vmatpush.bf16.msrb.mxu2 %v4397_v45 }
 0x5ae   : > { %v1820_v59 = vsel %vm1173_vm7, %v1819_v53, %v1801_v35  ;;  %2070 = vmatpush.bf16.msra.mxu0 %v5585_v3 }
 0x5af   : > { %v1848_v60 = vsel %vm1173_vm7, %v1847_v57, %v1830_v56  ;;  %v1826_v62 = vperm.slane %v1820_v59, %v5646_v16  ;;  %v1843_v63 = vrot.slane %v1838_v58, 4  ;;  %v1849_v13 = vrot.slane %v1830_v56, 4 }
 0x5b0   : > { %1856 = vrot.lane.b32.xlu2 %v1848_v60, %s5244_s26 }
 0x5b1   : > { %v1845_v61 = vrot.slane %v1826_v62, 4  ;;  %v1844_v1 = vsel %vm1173_vm7, %v1843_v63, %v1826_v62  ;;  %v1850_v15 = vsel %vm1173_vm7, %v1842_v51, %v1849_v13  ;;  %v4659_v51 = vld [vmem:[%s6565_s23] ss:$0 sm:$0xff]  ;;  %1997 = vmatpush.bf16.msrb.mxu2 %v4396_v49 }
 0x5b2   : > { %2071 = vmatpush.bf16.msra.mxu0 %v5588_v4 }
 0x5b3   : > { %v1846_v12 = vsel %vm1173_vm7, %v1838_v58, %v1845_v61  ;;  %v2066_v19 = vpop.f32.mrf.mxu3  ;;  %v4660_v61 = vld [vmem:[%s6500_s13] ss:$0 sm:$0xff] }
 0x5b4   : > { %1852 = vrot.lane.b32.xlu1 %v1846_v12, %s5245_s8 }
 0x5b5   : > { %1998 = vmatpush.bf16.msrb.mxu2 %v4395_v0 }
 0x5b6   : > { %2072 = vmatpush.bf16.msra.mxu0 %v5591_v5 }
 0x5b8   : > { %1860 = vrot.lane.b32.xlu2 %v1850_v15, %s5246_s5 }
 0x5ba   : > { %2073 = vmatpush.bf16.msra.mxu0 %v5594_v6 }
 0x5be   : > { %2074 = vmatpush.bf16.msra.mxu0 %v5597_v7  ;;  %v4278_v7 = vsel %vm2046_vm1, 1.0, %v5243_v41 }
 0x5c2   : > { %2075 = vmatpush.bf16.msra.mxu0 %v5600_v8  ;;  %v2065_v8 = vadd.f32 %v4278_v7, %v2064_v18 }
 0x5c6   : > { %2076 = vmatpush.bf16.msra.mxu0 %v5603_v9  ;;  %v2068_v9 = vpack.c.bf16 %v2065_v8, %v2065_v8 }
 0x60a   : > { %v1857_v20 = vpop.permute.xlu2 %1856 }
 0x612   : > { %v1861_v21 = vpop.permute.xlu2 %1860 }
 0x626   : > { %v1853_v2 = vpop.permute.xlu1 %1852 }
 0x627   : > { %v1863_v3 = vsel %vm1539_vm8, %v1844_v1, %v1853_v2 }
 0x628   : > { %v1865_v4 = vsel %vm1864_vm13, %v1863_v3, %v1857_v20 }
 0x629   : > { %v1867_v5 = vsel %vm1866_vm14, %v1865_v4, %v1861_v21 }
 0x62a   : > { %v1868_v6 = vpack.c.bf16 %v1867_v5, %v1867_v5 }
 0x62c   : > { %4249 = vmatmul.msk.bf16.vlgmr.msrb.gmra.mxu0 %vm1093_vm2, %v1868_v6 }
 0x63c   : > { %2077 = vmatmul.bf16.vlgmr.msra.gmra.mxu0 %v2068_v9 }
 0x6a9   : > { %v1893_v22 = vpop.f32.mrf.mxu0 }
 0x6aa   : > { %v5881_v23 = vadd.f32 %v1893_v22, %v5610_v14  ;;  %v4393_v14 = vld [vmem:[#allocation13] sm:$0xff] }
 0x6ab   : > { %1947 = vmatpush.bf16.msrb.mxu1 %v4393_v14 }
 0x6ac   : > { %v1899_v24 = vmul.f32 %v5881_v23, %v5881_v23 }
 0x6ae   : > { %v1900_v25 = vsel %vm1093_vm2, %v1899_v24, 0.0 }
 0x6af   : > { %1901 = vadd.xlane.f32.xlu2 %v1900_v25  ;;  %2130 = vmatpush.bf16.msra.mxu1 %v4400_v37 }
 0x6b1   : > { %v1895_v30 = vpop.f32.mrf.mxu0 }
 0x6b3   : > { %2131 = vmatpush.bf16.msra.mxu1 %v4399_v38 }
 0x6b9   : > { %v5886_v31 = vpop.f32.mrf.mxu0 }
 0x6ba   : > { %v2083_v47 = vmul.f32 %v5886_v31, %v5886_v31 }
 0x6bc   : > { %v2084_v32 = vsel %vm1093_vm2, %v2083_v47, 0.0 }
 0x6bd   : > { %2085 = vadd.xlane.f32.xlu1 %v2084_v32 }
 0x6c1   : > { %v2080_v44 = vpop.f32.mrf.mxu0 }
 0x722   : > { %v1902_v29 = vpop.xlane.xlu2 %1901 }
 0x723   : > { %v1903_v36 = vmul.f32 %v1902_v29, %v5615_v26 }
 0x725   : > { %v1904_v28 = vadd.f32 1e-06, %v1903_v36 }
 0x727   : > { %4685 = vrsqrt.f32 %v1904_v28  ;;  %vm1911_vm4 = vweird.f32 %v1904_v28 }
 0x72d   : > { %v4686_v33 = vpop.eup %4685 }
 0x72e   : > { %v1906_v40 = vmul.f32 %v4686_v33, %v1904_v28  ;;  %vm1912_vm3 = vweird.f32 %v4686_v33 }
 0x72f   : > { %vm1913_vm5 = vmor %vm1911_vm4, %vm1912_vm3 }
 0x730   : > { %v1907_v34 = vmul.f32 %v4686_v33, %v1906_v40  ;;  %v2086_v35 = vpop.xlane.xlu1 %2085 }
 0x731   : > { %v2087_v43 = vmul.f32 %v2086_v35, %v5615_v26 }
 0x732   : > { %v1908_v46 = vmul.f32 0.5, %v1907_v34 }
 0x733   : > { %v2088_v10 = vadd.f32 1e-06, %v2087_v43 }
 0x734   : > { %v1909_v48 = vsub.f32 1.5, %v1908_v46 }
 0x735   : > { %4687 = vrsqrt.f32 %v2088_v10  ;;  %vm2095_vm10 = vweird.f32 %v2088_v10 }
 0x736   : > { %v1910_v50 = vmul.f32 %v4686_v33, %v1909_v48 }
 0x738   : > { %v1914_v52 = vsel %vm1913_vm5, %v4686_v33, %v1910_v50 }
 0x739   : > { %v1915_v53 = vmul.f32 %v1914_v52, %v5881_v23 }
 0x73b   : > { %v4688_v55 = vpop.eup %4687  ;;  %v1919_v56 = vmul.f32 %v4659_v51, %v1915_v53 }
 0x73c   : > { %v2090_v57 = vmul.f32 %v4688_v55, %v2088_v10  ;;  %vm2096_vm6 = vweird.f32 %v4688_v55 }
 0x73d   : > { %v1924_v58 = vpack.c.bf16 %v1919_v56, %v1919_v56  ;;  %vm2097_vm11 = vmor %vm2095_vm10, %vm2096_vm6 }
 0x73e   : > { %v2091_v59 = vmul.f32 %v4688_v55, %v2090_v57 }
 0x73f   : > { %4258 = vmatmul.msk.bf16.vlgmr.msrb.gmra.mxu1 %vm1093_vm2, %v1924_v58 }
 0x740   : > { %v2092_v60 = vmul.f32 0.5, %v2091_v59 }
 0x742   : > { %v2093_v62 = vsub.f32 1.5, %v2092_v60 }
 0x744   : > { %v2094_v63 = vmul.f32 %v4688_v55, %v2093_v62 }
 0x746   : > { %v2098_v1 = vsel %vm2097_vm11, %v4688_v55, %v2094_v63 }
 0x747   : > { %v2099_v12 = vmul.f32 %v2098_v1, %v5886_v31 }
 0x749   : > { %v2103_v13 = vmul.f32 %v4660_v61, %v2099_v12 }
 0x74b   : > { %v2108_v15 = vpack.c.bf16 %v2103_v13, %v2103_v13 }
 0x74f   : > { %4288 = vmatmul.msk.bf16.vlgmr.msra.gmra.mxu1 %vm1093_vm2, %v2108_v15 }
 0x7bc   : > { %v1949_v17 = vpop.f32.mrf.mxu1 }
 0x7bd   : > { %v1953_v18 = vmax.f32 %v1949_v17, 0.0 }
 0x7bf   : > { %v1962_v19 = vpack.c.bf16 %v1953_v18, %v1953_v18 }
 0x7c1   : > { %4275 = vmatmul.msk.bf16.vlgmr.msrb.gmra.mxu2 %vm1987_vm12, %v1962_v19 }
 0x7c4   : > { %v1951_v20 = vpop.f32.mrf.mxu1 }
 0x7cc   : > { %v2133_v2 = vpop.f32.mrf.mxu1 }
 0x7cd   : > { %2146 = vrot.lane.b32.xlu0 %v2133_v2, %s5237_s28  ;;  %v2157_v8 = vrot.slane %v2133_v2, 4 }
 0x7d4   : > { %v2135_v3 = vpop.f32.mrf.mxu1 }
 0x7d5   : > { %2149 = vrot.lane.b32.xlu0 %v2133_v2, %s5238_s3 }
 0x7dd   : > { %2152 = vrot.lane.b32.xlu0 %v2133_v2, %s5236_s4 }
 0x83f   : > { %v2147_v21 = vpop.permute.xlu0 %2146 }
 0x840   : > { %v4627_v4 = vpack.i.bf16 %v2147_v21, %v2133_v2  ;;  %v2169_v30 = vrot.slane %v2147_v21, 4 }
 0x842   : > { %4628 = vrot.lane.b32.xlu2 %v4627_v4, %s5239_s24 }
 0x844   : > { %v5908_v5 = vpop.f32.mrf.mxu2 }
 0x847   : > { %v2150_v6 = vpop.permute.xlu0 %2149 }
 0x848   : > { %v2155_v7 = vrot.slane %v2150_v6, 4  ;;  %v2158_v9 = vsel %vm1173_vm7, %v2150_v6, %v2157_v8 }
 0x849   : > { %v2166_v25 = vperm.slane %v2158_v9, %v5636_v54 }
 0x84a   : > { %4638 = vrot.lane.b32.xlu2 %v4627_v4, %s5242_s29  ;;  %v2156_v22 = vsel %vm1173_vm7, %v2155_v7, %v2133_v2 }
 0x84b   : > { %v2162_v47 = vperm.slane %v2156_v22, %v5636_v54  ;;  %v2193_v29 = vrot.slane %v2166_v25, 4 }
 0x84c   : > { %v2002_v24 = vpop.f32.mrf.mxu2 }
 0x84d   : > { %v2181_v37 = vrot.slane %v2162_v47, 4 }
 0x84f   : > { %v2153_v32 = vpop.permute.xlu0 %2152 }
 0x850   : > { %v2167_v44 = vrot.slane %v2153_v32, 4  ;;  %v2170_v27 = vsel %vm1173_vm7, %v2153_v32, %v2169_v30  ;;  %v5916_v14 = vpack.i.bf16 %v2153_v32, %v2150_v6 }
 0x851   : > { %v2178_v36 = vperm.slane %v2170_v27, %v5636_v54 }
 0x852   : > { %v2168_v28 = vsel %vm1173_vm7, %v2167_v44, %v2147_v21  ;;  %4633 = vrot.lane.b32.xlu0 %v5916_v14, %s5239_s24 }
 0x853   : > { %v2174_v38 = vperm.slane %v2168_v28, %v5636_v54  ;;  %v2191_v33 = vrot.slane %v2178_v36, 4  ;;  %v2194_v40 = vsel %vm1173_vm7, %v2178_v36, %v2193_v29 }
 0x854   : > { %v2202_v42 = vperm.slane %v2194_v40, %v5646_v16 }
 0x855   : > { %v2179_v34 = vrot.slane %v2174_v38, 4  ;;  %v2182_v35 = vsel %vm1173_vm7, %v2174_v38, %v2181_v37  ;;  %v2192_v43 = vsel %vm1173_vm7, %v2191_v33, %v2166_v25 }
 0x856   : > { %v2190_v45 = vperm.slane %v2182_v35, %v5646_v16  ;;  %v2198_v46 = vperm.slane %v2192_v43, %v5646_v16  ;;  %v2209_v10 = vrot.slane %v2202_v42, 4 }
 0x857   : > { %v2180_v48 = vsel %vm1173_vm7, %v2179_v34, %v2162_v47 }
 0x858   : > { %v2186_v49 = vperm.slane %v2180_v48, %v5646_v16  ;;  %v2205_v50 = vrot.slane %v2190_v45, 4  ;;  %v2207_v51 = vrot.slane %v2198_v46, 4  ;;  %v2210_v52 = vsel %vm1173_vm7, 0.0, %v2209_v10 }
 0x859   : > { %v2222_v53 = vsel %vm1173_vm7, %v2209_v10, %v2198_v46  ;;  %v2227_v55 = vrot.slane %v2210_v52, 4 }
 0x85a   : > { %v2203_v56 = vrot.slane %v2186_v49, 4  ;;  %v2206_v57 = vsel %vm1173_vm7, 0.0, %v2205_v50  ;;  %v2208_v58 = vsel %vm1173_vm7, 0.0, %v2207_v51  ;;  %v2211_v59 = vsel %vm1173_vm7, %v2205_v50, %v2186_v49 }
 0x85b   : > { %v2215_v60 = vperm.slane %v2211_v59, %v5636_v54  ;;  %v2216_v62 = vrot.slane %v2206_v57, 4  ;;  %v2226_v63 = vperm.slane %v2222_v53, %v5636_v54  ;;  %v2228_v61 = vsel %vm1173_vm7, %v2227_v55, %v2208_v58 }
 0x85c   : > { %v2204_v1 = vsel %vm1173_vm7, 0.0, %v2203_v56  ;;  %v2232_v12 = vperm.slane %v2228_v61, %v5636_v54 }
 0x85d   : > { %v2247_v13 = vrot.slane %v2226_v63, 4  ;;  %v2217_v15 = vsel %vm1173_vm7, %v2216_v62, %v2204_v1  ;;  %v2235_v0 = vrot.slane %v2215_v60, 4 }
 0x85e   : > { %v2245_v17 = vrot.slane %v2232_v12, 4  ;;  %v2221_v18 = vperm.slane %v2217_v15, %v5636_v54 }
 0x85f   : > { %v2248_v19 = vsel %vm1173_vm7, %v2232_v12, %v2247_v13 }
 0x860   : > { %v2236_v20 = vsel %vm1173_vm7, %v2221_v18, %v2235_v0  ;;  %v2256_v2 = vperm.slane %v2248_v19, %v5646_v16  ;;  %v2233_v3 = vrot.slane %v2221_v18, 4  ;;  %v2246_v21 = vsel %vm1173_vm7, %v2245_v17, %v2226_v63 }
 0x861   : > { %v2244_v4 = vperm.slane %v2236_v20, %v5646_v16  ;;  %v2252_v6 = vperm.slane %v2246_v21, %v5646_v16 }
 0x862   : > { %v2261_v7 = vrot.slane %v2256_v2, 4  ;;  %v2234_v8 = vsel %vm1173_vm7, %v2233_v3, %v2215_v60 }
 0x863   : > { %v2240_v9 = vperm.slane %v2234_v8, %v5646_v16  ;;  %v2257_v22 = vrot.slane %v2252_v6, 4  ;;  %v2263_v24 = vrot.slane %v2244_v4, 4 }
 0x864   : > { %v5952_v25 = vsel %vm1173_vm7, %v2261_v7, %v2244_v4 }
 0x865   : > { %v5955_v30 = vsel %vm1173_vm7, %v2257_v22, %v2240_v9  ;;  %v2259_v47 = vrot.slane %v2240_v9, 4  ;;  %v5958_v32 = vsel %vm1173_vm7, %v2256_v2, %v2263_v24 }
 0x867   : > { %v5961_v44 = vsel %vm1173_vm7, %v2252_v6, %v2259_v47 }
 0x89c   : > { %v4629_v27 = vpop.permute.xlu2 %4628 }
 0x89d   : > { %v4631_v29 = vunpack.i.h.bf16 %v4629_v27  ;;  %v4630_v36 = vunpack.i.l.bf16 %v4629_v27 }
 0x89f   : > { %v2295_v37 = vrot.slane %v4631_v29, 4  ;;  %v2283_v38 = vrot.slane %v4630_v36, 4 }
 0x8c4   : > { %v4634_v28 = vpop.permute.xlu0 %4633 }
 0x8c5   : > { %v4636_v33 = vunpack.i.h.bf16 %v4634_v28  ;;  %v4635_v40 = vunpack.i.l.bf16 %v4634_v28 }
 0x8c7   : > { %v2293_v42 = vrot.slane %v4636_v33, 4  ;;  %v2296_v34 = vsel %vm1173_vm7, %v4636_v33, %v2295_v37  ;;  %v2281_v35 = vrot.slane %v4635_v40, 4  ;;  %v2284_v43 = vsel %vm1173_vm7, %v4635_v40, %v2283_v38 }
 0x8c8   : > { %v2304_v45 = vperm.slane %v2296_v34, %v5636_v54  ;;  %v2292_v46 = vperm.slane %v2284_v43, %v5636_v54 }
 0x8c9   : > { %v2294_v10 = vsel %vm1173_vm7, %v2293_v42, %v4631_v29  ;;  %v2282_v48 = vsel %vm1173_vm7, %v2281_v35, %v4630_v36 }
 0x8ca   : > { %v2300_v49 = vperm.slane %v2294_v10, %v5636_v54  ;;  %v2317_v50 = vrot.slane %v2304_v45, 4  ;;  %v2288_v51 = vperm.slane %v2282_v48, %v5636_v54  ;;  %v2319_v52 = vrot.slane %v2292_v46, 4 }
 0x8cc   : > { %v2305_v53 = vrot.slane %v2300_v49, 4  ;;  %v2307_v55 = vrot.slane %v2288_v51, 4  ;;  %v2318_v56 = vsel %vm1173_vm7, %v2317_v50, %v2292_v46  ;;  %v2320_v57 = vsel %vm1173_vm7, %v2304_v45, %v2319_v52 }
 0x8cd   : > { %v2324_v58 = vperm.slane %v2318_v56, %v5646_v16  ;;  %v2328_v59 = vperm.slane %v2320_v57, %v5646_v16 }
 0x8ce   : > { %v2306_v60 = vsel %vm1173_vm7, %v2305_v53, %v2288_v51  ;;  %v2308_v62 = vsel %vm1173_vm7, %v2300_v49, %v2307_v55 }
 0x8cf   : > { %v2312_v63 = vperm.slane %v2306_v60, %v5646_v16  ;;  %v2316_v61 = vperm.slane %v2308_v62, %v5646_v16  ;;  %v2333_v1 = vrot.slane %v2324_v58, 4  ;;  %v2335_v12 = vrot.slane %v2328_v59, 4 }
 0x8d0   : > { %v2267_v60 = vpack.c.bf16 %v5952_v25, %v5952_v25  ;;  %v2265_v62 = vpack.c.bf16 %v5955_v30, %v5955_v30 }
 0x8d1   : > { %v2329_v13 = vrot.slane %v2312_v63, 4  ;;  %v2331_v15 = vrot.slane %v2316_v61, 4  ;;  %v2336_v0 = vsel %vm1173_vm7, 0.0, %v2335_v12  ;;  %v2348_v17 = vsel %vm1173_vm7, %v2335_v12, %v2324_v58  ;;  %v2141_v12 = vld [vmem:[#allocation8] sm:$0xff] }
 0x8d2   : > { %v2353_v18 = vrot.slane %v2336_v0, 4  ;;  %v2334_v20 = vsel %vm1173_vm7, 0.0, %v2333_v1  ;;  %v2352_v2 = vperm.slane %v2348_v17, %v5636_v54  ;;  %v2268_v61 = vpack.c.bf16 %v5958_v32, %v5958_v32  ;;  %v2143_v17 = vld [vmem:[#allocation8 + $0x10] sm:$0xff]  ;;  %v2144_v32 = vld [vmem:[#allocation8 + $0x18] sm:$0xff] }
 0x8d3   : > { %v2332_v19 = vsel %vm1173_vm7, 0.0, %v2331_v15  ;;  %v2337_v3 = vsel %vm1173_vm7, %v2331_v15, %v2312_v63  ;;  %v2330_v7 = vsel %vm1173_vm7, 0.0, %v2329_v13  ;;  %v2266_v63 = vpack.c.bf16 %v5961_v44, %v5961_v44 }
 0x8d4   : > { %v2342_v21 = vrot.slane %v2332_v19, 4  ;;  %v2341_v4 = vperm.slane %v2337_v3, %v5636_v54  ;;  %v2354_v6 = vsel %vm1173_vm7, %v2353_v18, %v2334_v20  ;;  %v2373_v9 = vrot.slane %v2352_v2, 4 }
 0x8d5   : > { %v2358_v8 = vperm.slane %v2354_v6, %v5636_v54 }
 0x8d6   : > { %v2343_v22 = vsel %vm1173_vm7, %v2342_v21, %v2330_v7  ;;  %v2361_v24 = vrot.slane %v2341_v4, 4 }
 0x8d7   : > { %v2347_v47 = vperm.slane %v2343_v22, %v5636_v54  ;;  %v2374_v27 = vsel %vm1173_vm7, %v2358_v8, %v2373_v9  ;;  %v2371_v29 = vrot.slane %v2358_v8, 4 }
 0x8d8   : > { %v2382_v36 = vperm.slane %v2374_v27, %v5646_v16 }
 0x8d9   : > { %v2362_v28 = vsel %vm1173_vm7, %v2347_v47, %v2361_v24  ;;  %v2359_v37 = vrot.slane %v2347_v47, 4  ;;  %v2372_v38 = vsel %vm1173_vm7, %v2371_v29, %v2352_v2  ;;  %v2142_v2 = vld [vmem:[#allocation8 + $0x8] sm:$0xff] }
 0x8da   : > { %v2370_v33 = vperm.slane %v2362_v28, %v5646_v16  ;;  %v2387_v40 = vrot.slane %v2382_v36, 4  ;;  %v2378_v42 = vperm.slane %v2372_v38, %v5646_v16 }
 0x8db   : > { %v2360_v34 = vsel %vm1173_vm7, %v2359_v37, %v2341_v4 }
 0x8dc   : > { %v2388_v35 = vsel %vm1173_vm7, %v2387_v40, %v2370_v33  ;;  %v2366_v43 = vperm.slane %v2360_v34, %v5646_v16  ;;  %v2383_v45 = vrot.slane %v2378_v42, 4  ;;  %v2389_v46 = vrot.slane %v2370_v33, 4 }
 0x8dd   : > { %v2393_v10 = vpack.c.bf16 %v2388_v35, %v2388_v35  ;;  %v6033_v34 = vadd.f32 %v5908_v5, %v5881_v23  ;;  %v4639_v5 = vpop.permute.xlu2 %4638 }
 0x8de   : > { %v2384_v48 = vsel %vm1173_vm7, %v2383_v45, %v2366_v43  ;;  %v2390_v49 = vsel %vm1173_vm7, %v2382_v36, %v2389_v46  ;;  %v2385_v50 = vrot.slane %v2366_v43, 4 }
 0x8df   : > { %v2563_v51 = vsel %vm1539_vm8, %v2393_v10, 0  ;;  %v2391_v52 = vpack.c.bf16 %v2384_v48, %v2384_v48  ;;  %v2394_v53 = vpack.c.bf16 %v2390_v49, %v2390_v49  ;;  %v2006_v45 = vmul.f32 %v6033_v34, %v6033_v34 }
 0x8e0   : > { %2572 = vmatpush.bf16.xpose.msrb.mxu1 %v2563_v51  ;;  %v2386_v55 = vsel %vm1173_vm7, %v2378_v42, %v2385_v50  ;;  %v4641_v50 = vunpack.i.h.bf16 %v4639_v5  ;;  %v4640_v51 = vunpack.i.l.bf16 %v4639_v5 }
 0x8e1   : > { %v2525_v56 = vsel %vm1539_vm8, %v2391_v52, 0  ;;  %v2582_v57 = vsel %vm1539_vm8, %v2394_v53, 0  ;;  %v2392_v58 = vpack.c.bf16 %v2386_v55, %v2386_v55  ;;  %v2007_v48 = vsel %vm1093_vm2, %v2006_v45, 0.0 }
 0x8e2   : > { %2534 = vmatpush.bf16.xpose.msra.mxu2 %v2525_v56  ;;  %v2421_v53 = vrot.slane %v4641_v50, 4  ;;  %v2409_v55 = vrot.slane %v4640_v51, 4 }
 0x8e3   : > { %v2544_v59 = vsel %vm1539_vm8, %v2392_v58, 0 }
 0x8e4   : > { %2553 = vmatpush.bf16.xpose.msra.mxu3 %v2544_v59 }
 0x8e7   : > { %4291 = vmatmul.msk.bf16.vlgmr.msrb.gmra.mxu1 %vm1539_vm8, %v2267_v60 }
 0x8e9   : > { %4289 = vmatmul.msk.bf16.vlgmr.msra.gmra.mxu2 %vm1539_vm8, %v2265_v62 }
 0x8ea   : > { %2591 = vmatpush.bf16.xpose.msrb.mxu2 %v2582_v57 }
 0x8eb   : > { %4290 = vmatmul.msk.bf16.vlgmr.msra.gmra.mxu3 %vm1539_vm8, %v2266_v63 }
 0x8f9   : > { %4292 = vmatmul.msk.bf16.vlgmr.msrb.gmra.mxu2 %vm1539_vm8, %v2268_v61 }
 0x964   : > { %v2574_v1 = vpop.f32.mrf.mxu1 }
 0x965   : > { %v2575_v18 = vadd.f32 %v2574_v1, %v2143_v17 }
 0x967   : > { %v2603_v20 = vsel %vm1539_vm8, %v2575_v18, -inf }
 0x96c   : > { %v2536_v25 = vpop.f32.mrf.mxu2  ;;  %v2576_v13 = vpop.f32.mrf.mxu1 }
 0x96d   : > { %v2537_v15 = vadd.f32 %v2536_v25, %v2141_v12 }
 0x96e   : > { %v2555_v0 = vpop.f32.mrf.mxu3 }
 0x96f   : > { %v2597_v30 = vsel %vm1539_vm8, %v2537_v15, -inf  ;;  %v2556_v3 = vadd.f32 %v2555_v0, %v2142_v2 }
 0x970   : > { %2598 = vmax.xlane.f32.xlu1 %v2597_v30 }
 0x971   : > { %v2600_v7 = vsel %vm1539_vm8, %v2556_v3, -inf }
 0x974   : > { %v2538_v19 = vpop.f32.mrf.mxu2 }
 0x976   : > { %v2557_v44 = vpop.f32.mrf.mxu3 }
 0x978   : > { %2604 = vmax.xlane.f32.xlu1 %v2603_v20 }
 0x97c   : > { %v2593_v21 = vpop.f32.mrf.mxu2 }
 0x97d   : > { %v2594_v4 = vadd.f32 %v2593_v21, %v2144_v32 }
 0x97f   : > { %v2606_v6 = vsel %vm1539_vm8, %v2594_v4, -inf }
 0x980   : > { %2607 = vmax.xlane.f32.xlu0 %v2606_v6  ;;  %2601 = vmax.xlane.f32.xlu1 %v2600_v7 }
 0x984   : > { %v2595_v8 = vpop.f32.mrf.mxu2 }
 0x999   : > { %4643 = vrot.lane.b32.xlu1 %v5916_v14, %s5242_s29  ;;  %s6567_s29 = sld [smem:[#allocation33_spill]] }
 0x9e3   : > { %v2599_v9 = vpop.xlane.xlu1 %2598 }
 0x9e4   : > { %v2609_v22 = vsub.f32 %v2537_v15, %v2599_v9 }
 0x9e6   : > { %v2613_v24 = vmul.f32 1.442695, %v2609_v22 }
 0x9e8   : > { %4689 = vpow2.f32 %v2613_v24 }
 0x9eb   : > { %v2605_v47 = vpop.xlane.xlu1 %2604 }
 0x9ec   : > { %v2611_v27 = vsub.f32 %v2575_v18, %v2605_v47 }
 0x9ee   : > { %v6025_v29 = vpop.eup %4689  ;;  %v2617_v36 = vmul.f32 1.442695, %v2611_v27 }
 0x9ef   : > { %v2621_v28 = vsel %vm1539_vm8, %v6025_v29, 0.0 }
 0x9f0   : > { %4691 = vpow2.f32 %v2617_v36  ;;  %2622 = vadd.xlane.f32.xlu2 %v2621_v28 }
 0x9f3   : > { %v2608_v37 = vpop.xlane.xlu0 %2607  ;;  %v2602_v38 = vpop.xlane.xlu1 %2601 }
 0x9f4   : > { %v2612_v33 = vsub.f32 %v2594_v4, %v2608_v37  ;;  %v2610_v42 = vsub.f32 %v2556_v3, %v2602_v38 }
 0x9f6   : > { %v6029_v40 = vpop.eup %4691  ;;  %v2619_v14 = vmul.f32 1.442695, %v2612_v33  ;;  %v2615_v43 = vmul.f32 1.442695, %v2610_v42 }
 0x9f7   : > { %v2627_v35 = vsel %vm1539_vm8, %v6029_v40, 0.0 }
 0x9f8   : > { %4693 = vpow2.f32 %v2619_v14  ;;  %2628 = vadd.xlane.f32.xlu1 %v2627_v35 }
 0x9f9   : > { %4695 = vpow2.f32 %v2615_v43 }
 0x9fe   : > { %v6039_v46 = vpop.eup %4693 }
 0x9ff   : > { %v2630_v10 = vsel %vm1539_vm8, %v6039_v46, 0.0  ;;  %v6044_v23 = vpop.eup %4695 }
 0xa00   : > { %2631 = vadd.xlane.f32.xlu0 %v2630_v10  ;;  %2008 = vadd.xlane.f32.xlu1 %v2007_v48  ;;  %v2624_v49 = vsel %vm1539_vm8, %v6044_v23, 0.0 }
 0xa08   : > { %2625 = vadd.xlane.f32.xlu0 %v2624_v49 }
 0xa0b   : > { %v4644_v52 = vpop.permute.xlu1 %4643 }
 0xa0c   : > { %v4646_v56 = vunpack.i.h.bf16 %v4644_v52  ;;  %v4645_v57 = vunpack.i.l.bf16 %v4644_v52 }
 0xa0e   : > { %v2419_v58 = vrot.slane %v4646_v56, 4  ;;  %v2422_v59 = vsel %vm1173_vm7, %v4646_v56, %v2421_v53  ;;  %v2407_v60 = vrot.slane %v4645_v57, 4  ;;  %v2410_v62 = vsel %vm1173_vm7, %v4645_v57, %v2409_v55 }
 0xa0f   : > { %v2430_v63 = vperm.slane %v2422_v59, %v5636_v54  ;;  %v2418_v61 = vperm.slane %v2410_v62, %v5636_v54 }
 0xa10   : > { %v2420_v1 = vsel %vm1173_vm7, %v2419_v58, %v4641_v50  ;;  %v2408_v12 = vsel %vm1173_vm7, %v2407_v60, %v4640_v51 }
 0xa11   : > { %v2426_v25 = vperm.slane %v2420_v1, %v5636_v54  ;;  %v2443_v13 = vrot.slane %v2430_v63, 4  ;;  %v2414_v15 = vperm.slane %v2408_v12, %v5636_v54  ;;  %v2445_v0 = vrot.slane %v2418_v61, 4 }
 0xa13   : > { %v2431_v30 = vrot.slane %v2426_v25, 4  ;;  %v2433_v17 = vrot.slane %v2414_v15, 4  ;;  %v2444_v18 = vsel %vm1173_vm7, %v2443_v13, %v2418_v61  ;;  %v2446_v19 = vsel %vm1173_vm7, %v2430_v63, %v2445_v0 }
 0xa14   : > { %v2450_v44 = vperm.slane %v2444_v18, %v5646_v16  ;;  %v2454_v20 = vperm.slane %v2446_v19, %v5646_v16 }
 0xa15   : > { %v2432_v2 = vsel %vm1173_vm7, %v2431_v30, %v2414_v15  ;;  %v2434_v32 = vsel %vm1173_vm7, %v2426_v25, %v2433_v17 }
 0xa16   : > { %v2438_v3 = vperm.slane %v2432_v2, %v5646_v16  ;;  %v2442_v21 = vperm.slane %v2434_v32, %v5646_v16  ;;  %v2459_v4 = vrot.slane %v2450_v44, 4  ;;  %v2461_v6 = vrot.slane %v2454_v20, 4  ;;  %v4406_v20 = vld [vmem:[#allocation20 + $0x8] sm:$0xff] }
 0xa18   : > { %v2455_v7 = vrot.slane %v2438_v3, 4  ;;  %v2457_v8 = vrot.slane %v2442_v21, 4  ;;  %v2462_v9 = vsel %vm1173_vm7, 0.0, %v2461_v6  ;;  %v2474_v22 = vsel %vm1173_vm7, %v2461_v6, %v2450_v44  ;;  %v4405_v21 = vld [vmem:[#allocation20] sm:$0xff] }
 0xa19   : > { %v2479_v24 = vrot.slane %v2462_v9, 4  ;;  %v2460_v27 = vsel %vm1173_vm7, 0.0, %v2459_v4  ;;  %v2478_v36 = vperm.slane %v2474_v22, %v5636_v54 }
 0xa1a   : > { %v2458_v47 = vsel %vm1173_vm7, 0.0, %v2457_v8  ;;  %v2463_v28 = vsel %vm1173_vm7, %v2457_v8, %v2438_v3  ;;  %v2456_v14 = vsel %vm1173_vm7, 0.0, %v2455_v7 }
 0xa1b   : > { %v2468_v37 = vrot.slane %v2458_v47, 4  ;;  %v2467_v38 = vperm.slane %v2463_v28, %v5636_v54  ;;  %v2480_v33 = vsel %vm1173_vm7, %v2479_v24, %v2460_v27  ;;  %v2499_v35 = vrot.slane %v2478_v36, 4 }
 0xa1c   : > { %v2484_v42 = vperm.slane %v2480_v33, %v5636_v54 }
 0xa1d   : > { %v2469_v43 = vsel %vm1173_vm7, %v2468_v37, %v2456_v14  ;;  %v2487_v45 = vrot.slane %v2467_v38, 4 }
 0xa1e   : > { %v2473_v10 = vperm.slane %v2469_v43, %v5636_v54  ;;  %v2500_v48 = vsel %vm1173_vm7, %v2484_v42, %v2499_v35  ;;  %v2497_v5 = vrot.slane %v2484_v42, 4 }
 0xa1f   : > { %v2508_v49 = vperm.slane %v2500_v48, %v5646_v16 }
 0xa20   : > { %v2488_v50 = vsel %vm1173_vm7, %v2473_v10, %v2487_v45  ;;  %v2485_v51 = vrot.slane %v2473_v10, 4  ;;  %v2498_v52 = vsel %vm1173_vm7, %v2497_v5, %v2478_v36 }
 0xa21   : > { %v2496_v53 = vperm.slane %v2488_v50, %v5646_v16  ;;  %v2513_v55 = vrot.slane %v2508_v49, 4  ;;  %v2504_v56 = vperm.slane %v2498_v52, %v5646_v16 }
 0xa22   : > { %v2486_v57 = vsel %vm1173_vm7, %v2485_v51, %v2467_v38 }
 0xa23   : > { %v2514_v58 = vsel %vm1173_vm7, %v2513_v55, %v2496_v53  ;;  %v2492_v59 = vperm.slane %v2486_v57, %v5646_v16  ;;  %v2509_v60 = vrot.slane %v2504_v56, 4  ;;  %v2515_v62 = vrot.slane %v2496_v53, 4 }
 0xa24   : > { %v2519_v63 = vpack.c.bf16 %v2514_v58, %v2514_v58 }
 0xa25   : > { %v2510_v61 = vsel %vm1173_vm7, %v2509_v60, %v2492_v59  ;;  %v2516_v1 = vsel %vm1173_vm7, %v2508_v49, %v2515_v62  ;;  %v2511_v12 = vrot.slane %v2492_v59, 4 }
 0xa26   : > { %v2687_v25 = vsel %vm1667_vm9, %v2519_v63, 0  ;;  %v2517_v13 = vpack.c.bf16 %v2510_v61, %v2510_v61  ;;  %v2520_v15 = vpack.c.bf16 %v2516_v1, %v2516_v1 }
 0xa27   : > { %2696 = vmatpush.bf16.msra.mxu1 %v2687_v25  ;;  %v2512_v0 = vsel %vm1173_vm7, %v2504_v56, %v2511_v12 }
 0xa28   : > { %v2649_v30 = vsel %vm1667_vm9, %v2517_v13, 0  ;;  %v2706_v17 = vsel %vm1667_vm9, %v2520_v15, 0  ;;  %v2518_v18 = vpack.c.bf16 %v2512_v0, %v2512_v0 }
 0xa29   : > { %2658 = vmatpush.bf16.msrb.mxu3 %v2649_v30  ;;  %2715 = vmatpush.bf16.msra.mxu2 %v2706_v17 }
 0xa2a   : > { %v2668_v19 = vsel %vm1667_vm9, %v2518_v18, 0 }
 0xa2b   : > { %2677 = vmatpush.bf16.msrb.mxu0 %v2668_v19  ;;  %2957 = vmatpush.bf16.msrb.mxu1 %v4406_v20 }
 0xa2f   : > { %2958 = vmatpush.bf16.msrb.mxu1 %v4405_v21 }
 0xa63   : > { %v2623_v44 = vpop.xlane.xlu2 %2622 }
 0xa64   : > { %4697 = vrcp.f32 %v2623_v44 }
 0xa6a   : > { %v4698_v2 = vpop.eup %4697 }
 0xa6b   : > { %v2637_v32 = vmul.f32 %v4698_v2, %v6025_v29  ;;  %v2629_v3 = vpop.xlane.xlu1 %2628 }
 0xa6c   : > { %4699 = vrcp.f32 %v2629_v3 }
 0xa6d   : > { %v2641_v4 = vpack.c.bf16 %v2637_v32, %v2637_v32 }
 0xa6f   : > { %4293 = vmatmul.msk.bf16.vlgmr.msrb.gmra.mxu3 %vm1539_vm8, %v2641_v4 }
 0xa72   : > { %v4700_v6 = vpop.eup %4699 }
 0xa73   : > { %v2639_v7 = vmul.f32 %v4700_v6, %v6029_v40  ;;  %v2632_v8 = vpop.xlane.xlu0 %2631  ;;  %v2009_v9 = vpop.xlane.xlu1 %2008 }
 0xa74   : > { %4701 = vrcp.f32 %v2632_v8  ;;  %v2010_v22 = vmul.f32 %v2009_v9, %v5615_v26 }
 0xa75   : > { %v2643_v24 = vpack.c.bf16 %v2639_v7, %v2639_v7 }
 0xa76   : > { %v2011_v47 = vadd.f32 1e-06, %v2010_v22 }
 0xa77   : > { %4295 = vmatmul.msk.bf16.vlgmr.msra.gmra.mxu1 %vm1539_vm8, %v2643_v24 }
 0xa78   : > { %4703 = vrsqrt.f32 %v2011_v47  ;;  %vm2018_vm1 = vweird.f32 %v2011_v47 }
 0xa7a   : > { %v4702_v29 = vpop.eup %4701 }
 0xa7b   : > { %v2640_v27 = vmul.f32 %v4702_v29, %v6039_v46  ;;  %v2626_v36 = vpop.xlane.xlu0 %2625  ;;  %v4661_v46 = vld [vmem:[%s6499_s12] ss:$0 sm:$0xff] }
 0xa7c   : > { %4705 = vrcp.f32 %v2626_v36 }
 0xa7d   : > { %v2644_v28 = vpack.c.bf16 %v2640_v27, %v2640_v27 }
 0xa7e   : > { %v4704_v37 = vpop.eup %4703 }
 0xa7f   : > { %v2013_v38 = vmul.f32 %v4704_v37, %v2011_v47  ;;  %4296 = vmatmul.msk.bf16.vlgmr.msra.gmra.mxu2 %vm1539_vm8, %v2644_v28  ;;  %vm2019_vm0 = vweird.f32 %v4704_v37 }
 0xa80   : > { %vm2020_vm3 = vmor %vm2018_vm1, %vm2019_vm0  ;;  %vm3860_vm0 = vcmp.lt.s32.totalorder %v5607_v11, 64 }
 0xa81   : > { %v2014_v40 = vmul.f32 %v4704_v37, %v2013_v38 }
 0xa82   : > { %v4706_v33 = vpop.eup %4705 }
 0xa83   : > { %v2015_v14 = vmul.f32 0.5, %v2014_v40  ;;  %v2638_v42 = vmul.f32 %v4706_v33, %v6044_v23 }
 0xa85   : > { %v2016_v35 = vsub.f32 1.5, %v2015_v14  ;;  %v2642_v43 = vpack.c.bf16 %v2638_v42, %v2638_v42 }
 0xa87   : > { %v2017_v45 = vmul.f32 %v4704_v37, %v2016_v35  ;;  %4294 = vmatmul.msk.bf16.vlgmr.msrb.gmra.mxu0 %vm1539_vm8, %v2642_v43 }
 0xa89   : > { %v2021_v10 = vsel %vm2020_vm3, %v4704_v37, %v2017_v45 }
 0xa8a   : > { %v2022_v48 = vmul.f32 %v2021_v10, %v6033_v34 }
 0xa8c   : > { %v2026_v5 = vmul.f32 %v4661_v46, %v2022_v48 }
 0xa8e   : > { %v2935_v49 = vpack.c.bf16 %v2026_v5, %v2026_v5 }
 0xa90   : > { %4323 = vmatmul.msk.bf16.vlgmr.msrb.gmra.mxu1 %vm1093_vm2, %v2935_v49 }
 0xaf2   : > { %v2660_v23 = vpop.f32.mrf.mxu3 }
 0xaf3   : > { %v2723_v55 = vrot.slane %v2660_v23, 4 }
 0xaf4   : > { %v2698_v50 = vpop.f32.mrf.mxu1 }
 0xaf5   : > { %v2721_v52 = vrot.slane %v2698_v50, 4  ;;  %v2724_v57 = vsel %vm1173_vm7, %v2698_v50, %v2723_v55 }
 0xaf6   : > { %v2732_v34 = vperm.slane %v2724_v57, %v5636_v54 }
 0xaf7   : > { %v2722_v56 = vsel %vm1173_vm7, %v2721_v52, %v2660_v23 }
 0xaf8   : > { %v2728_v58 = vperm.slane %v2722_v56, %v5636_v54  ;;  %v2759_v13 = vrot.slane %v2732_v34, 4 }
 0xafa   : > { %v2662_v51 = vpop.f32.mrf.mxu3  ;;  %v2747_v1 = vrot.slane %v2728_v58, 4 }
 0xafc   : > { %v2700_v53 = vpop.f32.mrf.mxu1 }
 0xb02   : > { %v2717_v59 = vpop.f32.mrf.mxu2 }
 0xb03   : > { %v2733_v60 = vrot.slane %v2717_v59, 4 }
 0xb04   : > { %v2679_v62 = vpop.f32.mrf.mxu0 }
 0xb05   : > { %v2734_v63 = vsel %vm1173_vm7, %v2733_v60, %v2679_v62  ;;  %v2735_v61 = vrot.slane %v2679_v62, 4 }
 0xb06   : > { %v2740_v12 = vperm.slane %v2734_v63, %v5636_v54 }
 0xb07   : > { %v2736_v25 = vsel %vm1173_vm7, %v2717_v59, %v2735_v61 }
 0xb08   : > { %v2744_v15 = vperm.slane %v2736_v25, %v5636_v54  ;;  %v2745_v0 = vrot.slane %v2740_v12, 4  ;;  %v2748_v30 = vsel %vm1173_vm7, %v2740_v12, %v2747_v1  ;;  %v4402_v1 = vld [vmem:[#allocation17 + $0x8] sm:$0xff]  ;;  %v4401_v25 = vld [vmem:[#allocation17] sm:$0xff] }
 0xb09   : > { %v2756_v17 = vperm.slane %v2748_v30, %v5646_v16  ;;  %2868 = vmatpush.bf16.msra.mxu3 %v4402_v1 }
 0xb0a   : > { %v2746_v18 = vsel %vm1173_vm7, %v2745_v0, %v2728_v58  ;;  %v2757_v19 = vrot.slane %v2744_v15, 4  ;;  %v2760_v44 = vsel %vm1173_vm7, %v2744_v15, %v2759_v13  ;;  %v2719_v20 = vpop.f32.mrf.mxu2  ;;  %v4404_v13 = vld [vmem:[#allocation19 + $0x8] sm:$0xff]  ;;  %v4403_v15 = vld [vmem:[#allocation19] sm:$0xff] }
 0xb0b   : > { %v2752_v2 = vperm.slane %v2746_v18, %v5646_v16  ;;  %v2768_v32 = vperm.slane %v2760_v44, %v5646_v16  ;;  %v2771_v3 = vrot.slane %v2756_v17, 4  ;;  %2924 = vmatpush.bf16.msra.mxu0 %v4404_v13 }
 0xb0c   : > { %v2758_v21 = vsel %vm1173_vm7, %v2757_v19, %v2732_v34  ;;  %v2681_v4 = vpop.f32.mrf.mxu0 }
 0xb0d   : > { %v2764_v6 = vperm.slane %v2758_v21, %v5646_v16  ;;  %v2769_v7 = vrot.slane %v2752_v2, 4  ;;  %v2772_v8 = vsel %vm1173_vm7, 0.0, %v2771_v3  ;;  %v2775_v9 = vrot.slane %v2768_v32, 4  ;;  %v6123_v22 = vpop.f32.mrf.mxu1  ;;  %2869 = vmatpush.bf16.msra.mxu3 %v4401_v25 }
 0xb0e   : > { %v2777_v24 = vsel %vm1173_vm7, %v2771_v3, %v2752_v2  ;;  %v2782_v47 = vrot.slane %v2772_v8, 4  ;;  %3096 = vrot.lane.b32.xlu1 %v6123_v22, %s5238_s3  ;;  %v3104_v30 = vrot.slane %v6123_v22, 4 }
 0xb0f   : > { %v2770_v29 = vsel %vm1173_vm7, 0.0, %v2769_v7  ;;  %v2773_v27 = vrot.slane %v2764_v6, 4  ;;  %v2776_v36 = vsel %vm1173_vm7, 0.0, %v2775_v9  ;;  %v2781_v28 = vperm.slane %v2777_v24, %v5636_v54  ;;  %2925 = vmatpush.bf16.msra.mxu0 %v4403_v15 }
 0xb10   : > { %v2793_v37 = vrot.slane %v2776_v36, 4  ;;  %v2783_v38 = vsel %vm1173_vm7, %v2782_v47, %v2770_v29  ;;  %v2788_v40 = vsel %vm1173_vm7, %v2775_v9, %v2764_v6 }
 0xb11   : > { %v2774_v33 = vsel %vm1173_vm7, 0.0, %v2773_v27  ;;  %v2787_v14 = vperm.slane %v2783_v38, %v5636_v54  ;;  %v2792_v42 = vperm.slane %v2788_v40, %v5636_v54  ;;  %v2801_v35 = vrot.slane %v2781_v28, 4 }
 0xb12   : > { %v2794_v43 = vsel %vm1173_vm7, %v2793_v37, %v2774_v33 }
 0xb13   : > { %v2798_v45 = vperm.slane %v2794_v43, %v5636_v54  ;;  %v2813_v46 = vrot.slane %v2792_v42, 4  ;;  %v2799_v10 = vrot.slane %v2787_v14, 4  ;;  %v2802_v5 = vsel %vm1173_vm7, %v2787_v14, %v2801_v35 }
 0xb14   : > { %v2810_v55 = vperm.slane %v2802_v5, %v5646_v16 }
 0xb15   : > { %v2962_v48 = vpop.f32.mrf.mxu1  ;;  %v2814_v49 = vsel %vm1173_vm7, %v2798_v45, %v2813_v46  ;;  %v2800_v23 = vsel %vm1173_vm7, %v2799_v10, %v2781_v28  ;;  %v2811_v50 = vrot.slane %v2798_v45, 4 }
 0xb16   : > { %v2822_v51 = vperm.slane %v2814_v49, %v5646_v16  ;;  %v2806_v52 = vperm.slane %v2800_v23, %v5646_v16  ;;  %v2829_v63 = vrot.slane %v2810_v55, 4 }
 0xb17   : > { %v2812_v53 = vsel %vm1173_vm7, %v2811_v50, %v2792_v42 }
 0xb18   : > { %v2827_v56 = vrot.slane %v2822_v51, 4  ;;  %v2818_v57 = vperm.slane %v2812_v53, %v5646_v16  ;;  %v2825_v58 = vrot.slane %v2806_v52, 4  ;;  %v2830_v61 = vsel %vm1173_vm7, %v2822_v51, %v2829_v63 }
 0xb1a   : > { %v2828_v59 = vsel %vm1173_vm7, %v2827_v56, %v2810_v55  ;;  %v2823_v60 = vrot.slane %v2818_v57, 4  ;;  %v2826_v34 = vsel %vm1173_vm7, %v2818_v57, %v2825_v58 }
 0xb1b   : > { %2836 = vrot.lane.b32.xlu2 %v2828_v59, %s5244_s26  ;;  %2832 = vrot.lane.b32.xlu0 %v2826_v34, %s5245_s8 }
 0xb1c   : > { %v2824_v62 = vsel %vm1173_vm7, %v2823_v60, %v2806_v52 }
 0xb23   : > { %3093 = vrot.lane.b32.xlu2 %v6123_v22, %s5237_s28  ;;  %2840 = vrot.lane.b32.xlu0 %v2830_v61, %s5246_s5 }
 0xb2b   : > { %3099 = vrot.lane.b32.xlu2 %v6123_v22, %s5236_s4 }
 0xb75   : > { %v2837_v12 = vpop.permute.xlu2 %2836 }
 0xb7d   : > { %v6157_v0 = vpop.permute.xlu2 %3093 }
 0xb7e   : > { %v3116_v2 = vrot.slane %v6157_v0, 4 }
 0xb80   : > { %v6160_v17 = vpop.permute.xlu1 %3096 }
 0xb81   : > { %v3102_v18 = vrot.slane %v6160_v17, 4  ;;  %v3105_v19 = vsel %vm1173_vm7, %v6160_v17, %v3104_v30 }
 0xb82   : > { %v3113_v20 = vperm.slane %v3105_v19, %v5636_v54 }
 0xb83   : > { %v3103_v44 = vsel %vm1173_vm7, %v3102_v18, %v6123_v22 }
 0xb84   : > { %v3109_v32 = vperm.slane %v3103_v44, %v5636_v54  ;;  %v3140_v6 = vrot.slane %v3113_v20, 4 }
 0xb85   : > { %v6170_v3 = vpop.permute.xlu2 %3099 }
 0xb86   : > { %v3114_v21 = vrot.slane %v6170_v3, 4  ;;  %v3117_v4 = vsel %vm1173_vm7, %v6170_v3, %v3116_v2  ;;  %v3128_v9 = vrot.slane %v3109_v32, 4 }
 0xb87   : > { %v3125_v7 = vperm.slane %v3117_v4, %v5636_v54 }
 0xb88   : > { %v3115_v8 = vsel %vm1173_vm7, %v3114_v21, %v6157_v0 }
 0xb89   : > { %v3121_v24 = vperm.slane %v3115_v8, %v5636_v54  ;;  %v3138_v47 = vrot.slane %v3125_v7, 4  ;;  %v3141_v29 = vsel %vm1173_vm7, %v3125_v7, %v3140_v6 }
 0xb8a   : > { %v3149_v27 = vperm.slane %v3141_v29, %v5646_v16 }
 0xb8b   : > { %v3126_v36 = vrot.slane %v3121_v24, 4  ;;  %v3129_v28 = vsel %vm1173_vm7, %v3121_v24, %v3128_v9  ;;  %v3139_v37 = vsel %vm1173_vm7, %v3138_v47, %v3113_v20 }
 0xb8c   : > { %v3137_v38 = vperm.slane %v3129_v28, %v5646_v16  ;;  %v3145_v40 = vperm.slane %v3139_v37, %v5646_v16  ;;  %v3156_v33 = vrot.slane %v3149_v27, 4 }
 0xb8d   : > { %v3127_v14 = vsel %vm1173_vm7, %v3126_v36, %v3109_v32  ;;  %v2833_v42 = vpop.permute.xlu0 %2832 }
 0xb8e   : > { %v3133_v35 = vperm.slane %v3127_v14, %v5646_v16  ;;  %v3152_v43 = vrot.slane %v3137_v38, 4  ;;  %v3154_v45 = vrot.slane %v3145_v40, 4  ;;  %v3157_v46 = vsel %vm1173_vm7, 0.0, %v3156_v33 }
 0xb8f   : > { %v3169_v10 = vsel %vm1173_vm7, %v3156_v33, %v3145_v40  ;;  %v3174_v48 = vrot.slane %v3157_v46, 4  ;;  %v2843_v53 = vsel %vm1539_vm8, %v2824_v62, %v2833_v42 }
 0xb90   : > { %v3150_v5 = vrot.slane %v3133_v35, 4  ;;  %v3153_v49 = vsel %vm1173_vm7, 0.0, %v3152_v43  ;;  %v3155_v23 = vsel %vm1173_vm7, 0.0, %v3154_v45  ;;  %v3173_v50 = vperm.slane %v3169_v10, %v5636_v54 }
 0xb91   : > { %v3163_v51 = vrot.slane %v3153_v49, 4  ;;  %v3175_v52 = vsel %vm1173_vm7, %v3174_v48, %v3155_v23  ;;  %v3158_v55 = vsel %vm1173_vm7, %v3152_v43, %v3133_v35  ;;  %v2844_v62 = vsel %vm1864_vm13, %v2843_v53, %v2837_v12 }
 0xb92   : > { %v3151_v56 = vsel %vm1173_vm7, 0.0, %v3150_v5  ;;  %v3162_v57 = vperm.slane %v3158_v55, %v5636_v54  ;;  %v3179_v58 = vperm.slane %v3175_v52, %v5636_v54  ;;  %v3194_v59 = vrot.slane %v3173_v50, 4  ;;  %v4662_v52 = vld [vmem:[%s6503_s16] ss:$0 sm:$0xff] }
 0xb93   : > { %v3164_v60 = vsel %vm1173_vm7, %v3163_v51, %v3151_v56 }
 0xb94   : > { %v3168_v34 = vperm.slane %v3164_v60, %v5636_v54  ;;  %v3182_v63 = vrot.slane %v3162_v57, 4  ;;  %v3195_v61 = vsel %vm1173_vm7, %v3179_v58, %v3194_v59  ;;  %v3192_v1 = vrot.slane %v3179_v58, 4 }
 0xb95   : > { %v2841_v25 = vpop.permute.xlu0 %2840  ;;  %v3203_v13 = vperm.slane %v3195_v61, %v5646_v16 }
 0xb96   : > { %v2845_v15 = vsel %vm1866_vm14, %v2844_v62, %v2841_v25  ;;  %v3183_v30 = vsel %vm1173_vm7, %v3168_v34, %v3182_v63  ;;  %v3180_v18 = vrot.slane %v3168_v34, 4  ;;  %v3193_v19 = vsel %vm1173_vm7, %v3192_v1, %v3173_v50 }
 0xb97   : > { %v2846_v44 = vpack.c.bf16 %v2845_v15, %v2845_v15  ;;  %v3191_v20 = vperm.slane %v3183_v30, %v5646_v16  ;;  %v3208_v2 = vrot.slane %v3203_v13, 4  ;;  %v3199_v32 = vperm.slane %v3193_v19, %v5646_v16 }
 0xb98   : > { %v3181_v21 = vsel %vm1173_vm7, %v3180_v18, %v3162_v57 }
 0xb99   : > { %4305 = vmatmul.msk.bf16.vlgmr.msra.gmra.mxu3 %vm1093_vm2, %v2846_v44  ;;  %v3209_v12 = vsel %vm1173_vm7, %v3208_v2, %v3191_v20  ;;  %v3187_v4 = vperm.slane %v3181_v21, %v5646_v16  ;;  %v3204_v6 = vrot.slane %v3199_v32, 4  ;;  %v3210_v7 = vrot.slane %v3191_v20, 4 }
 0xb9a   : > { %v3214_v8 = vpack.c.bf16 %v3209_v12, %v3209_v12 }
 0xb9b   : > { %v3205_v9 = vsel %vm1173_vm7, %v3204_v6, %v3187_v4  ;;  %v3211_v24 = vsel %vm1173_vm7, %v3203_v13, %v3210_v7  ;;  %v3206_v47 = vrot.slane %v3187_v4, 4 }
 0xb9c   : > { %v3384_v29 = vsel %vm1539_vm8, %v3214_v8, 0  ;;  %v3212_v27 = vpack.c.bf16 %v3205_v9, %v3205_v9  ;;  %v3215_v36 = vpack.c.bf16 %v3211_v24, %v3211_v24 }
 0xb9d   : > { %3393 = vmatpush.bf16.xpose.msrb.mxu0 %v3384_v29  ;;  %v3207_v28 = vsel %vm1173_vm7, %v3199_v32, %v3206_v47 }
 0xb9e   : > { %v3346_v37 = vsel %vm1539_vm8, %v3212_v27, 0  ;;  %v3403_v38 = vsel %vm1539_vm8, %v3215_v36, 0  ;;  %v3213_v40 = vpack.c.bf16 %v3207_v28, %v3207_v28 }
 0xb9f   : > { %3355 = vmatpush.bf16.xpose.msrb.mxu2 %v3346_v37  ;;  %3412 = vmatpush.bf16.xpose.msra.mxu1 %v3403_v38 }
 0xba0   : > { %v3365_v33 = vsel %vm1539_vm8, %v3213_v40, 0 }
 0xba1   : > { %3374 = vmatpush.bf16.xpose.msrb.mxu3 %v3365_v33 }
 0xc1c   : > { %v2871_v14 = vpop.f32.mrf.mxu3 }
 0xc1d   : > { %v6220_v42 = vadd.f32 %v2871_v14, %v5886_v31 }
 0xc1f   : > { %v2877_v35 = vmul.f32 %v6220_v42, %v6220_v42 }
 0xc21   : > { %v2878_v43 = vsel %vm1093_vm2, %v2877_v35, 0.0 }
 0xc22   : > { %2879 = vadd.xlane.f32.xlu0 %v2878_v43 }
 0xc24   : > { %v2873_v45 = vpop.f32.mrf.mxu3 }
 0xc95   : > { %v2880_v46 = vpop.xlane.xlu0 %2879 }
 0xc96   : > { %v2881_v10 = vmul.f32 %v2880_v46, %v5615_v26 }
 0xc98   : > { %v2882_v48 = vadd.f32 1e-06, %v2881_v10 }
 0xc9a   : > { %4707 = vrsqrt.f32 %v2882_v48  ;;  %vm2889_vm5 = vweird.f32 %v2882_v48 }
 0xca0   : > { %v4708_v5 = vpop.eup %4707 }
 0xca1   : > { %v2884_v49 = vmul.f32 %v4708_v5, %v2882_v48  ;;  %vm2890_vm4 = vweird.f32 %v4708_v5 }
 0xca2   : > { %vm2891_vm6 = vmor %vm2889_vm5, %vm2890_vm4 }
 0xca3   : > { %v2885_v23 = vmul.f32 %v4708_v5, %v2884_v49 }
 0xca5   : > { %v2886_v50 = vmul.f32 0.5, %v2885_v23 }
 0xca7   : > { %v2887_v51 = vsub.f32 1.5, %v2886_v50 }
 0xca9   : > { %v2888_v31 = vmul.f32 %v4708_v5, %v2887_v51 }
 0xcab   : > { %v2892_v53 = vsel %vm2891_vm6, %v4708_v5, %v2888_v31 }
 0xcac   : > { %v2893_v55 = vmul.f32 %v2892_v53, %v6220_v42 }
 0xcae   : > { %v2897_v56 = vmul.f32 %v4662_v52, %v2893_v55 }
 0xcb0   : > { %v2902_v57 = vpack.c.bf16 %v2897_v56, %v2897_v56 }
 0xcb2   : > { %4314 = vmatmul.msk.bf16.vlgmr.msra.gmra.mxu0 %vm1093_vm2, %v2902_v57 }
 0xd2f   : > { %v2927_v58 = vpop.f32.mrf.mxu0 }
 0xd30   : > { %2975 = vrot.lane.b32.xlu1 %v2927_v58, %s5236_s4  ;;  %2969 = vrot.lane.b32.xlu2 %v2927_v58, %s5237_s28  ;;  %v2980_v61 = vrot.slane %v2927_v58, 4  ;;  %s6568_s4 = sld [smem:[#allocation52_spill]]  ;;  %s982_s28 = sand.u32 1, %s6567_s29  }
 0xd37   : > { %v2929_v59 = vpop.f32.mrf.mxu0 }
 0xd38   : > { %2972 = vrot.lane.b32.xlu2 %v2927_v58, %s5238_s3  ;;  %s4185_s3 = sshll.u32 %s982_s28, 3 }
 0xd8a   : > { %v2970_v60 = vpop.permute.xlu2 %2969 }
 0xd8b   : > { %v2992_v13 = vrot.slane %v2970_v60, 4 }
 0xd92   : > { %v2973_v34 = vpop.permute.xlu2 %2972 }
 0xd93   : > { %v2978_v63 = vrot.slane %v2973_v34, 4  ;;  %v2981_v1 = vsel %vm1173_vm7, %v2973_v34, %v2980_v61 }
 0xd94   : > { %v2989_v62 = vperm.slane %v2981_v1, %v5636_v54 }
 0xd95   : > { %v2979_v25 = vsel %vm1173_vm7, %v2978_v63, %v2927_v58 }
 0xd96   : > { %v2985_v15 = vperm.slane %v2979_v25, %v5636_v54  ;;  %v3016_v44 = vrot.slane %v2989_v62, 4 }
 0xd98   : > { %v3004_v32 = vrot.slane %v2985_v15, 4 }
 0xda2   : > { %v2976_v30 = vpop.permute.xlu1 %2975 }
 0xda3   : > { %v2990_v18 = vrot.slane %v2976_v30, 4  ;;  %v2993_v19 = vsel %vm1173_vm7, %v2976_v30, %v2992_v13 }
 0xda4   : > { %v3001_v20 = vperm.slane %v2993_v19, %v5636_v54 }
 0xda5   : > { %v2991_v2 = vsel %vm1173_vm7, %v2990_v18, %v2970_v60 }
 0xda6   : > { %v2997_v21 = vperm.slane %v2991_v2, %v5636_v54  ;;  %v3014_v12 = vrot.slane %v3001_v20, 4  ;;  %v3017_v4 = vsel %vm1173_vm7, %v3001_v20, %v3016_v44 }
 0xda7   : > { %v3025_v6 = vperm.slane %v3017_v4, %v5646_v16 }
 0xda8   : > { %v3002_v7 = vrot.slane %v2997_v21, 4  ;;  %v3005_v8 = vsel %vm1173_vm7, %v2997_v21, %v3004_v32  ;;  %v3015_v9 = vsel %vm1173_vm7, %v3014_v12, %v2989_v62 }
 0xda9   : > { %v3013_v24 = vperm.slane %v3005_v8, %v5646_v16  ;;  %v3021_v47 = vperm.slane %v3015_v9, %v5646_v16  ;;  %v3032_v29 = vrot.slane %v3025_v6, 4 }
 0xdaa   : > { %v3003_v27 = vsel %vm1173_vm7, %v3002_v7, %v2985_v15 }
 0xdab   : > { %v3009_v36 = vperm.slane %v3003_v27, %v5646_v16  ;;  %v3028_v28 = vrot.slane %v3013_v24, 4  ;;  %v3030_v37 = vrot.slane %v3021_v47, 4  ;;  %v3033_v38 = vsel %vm1173_vm7, 0.0, %v3032_v29 }
 0xdac   : > { %v3045_v40 = vsel %vm1173_vm7, %v3032_v29, %v3021_v47  ;;  %v3050_v33 = vrot.slane %v3033_v38, 4 }
 0xdad   : > { %v3026_v14 = vrot.slane %v3009_v36, 4  ;;  %v3029_v35 = vsel %vm1173_vm7, 0.0, %v3028_v28  ;;  %v3031_v43 = vsel %vm1173_vm7, 0.0, %v3030_v37  ;;  %v3034_v45 = vsel %vm1173_vm7, %v3028_v28, %v3009_v36 }
 0xdae   : > { %v3038_v46 = vperm.slane %v3034_v45, %v5636_v54  ;;  %v3039_v10 = vrot.slane %v3029_v35, 4  ;;  %v3049_v48 = vperm.slane %v3045_v40, %v5636_v54  ;;  %v3051_v5 = vsel %vm1173_vm7, %v3050_v33, %v3031_v43 }
 0xdaf   : > { %v3027_v49 = vsel %vm1173_vm7, 0.0, %v3026_v14  ;;  %v3055_v23 = vperm.slane %v3051_v5, %v5636_v54  ;;  %v4647_v28 = vpack.i.bf16 %v6157_v0, %v6123_v22  ;;  %v4652_v37 = vpack.i.bf16 %v6170_v3, %v6160_v17 }
 0xdb0   : > { %v3040_v50 = vsel %vm1173_vm7, %v3039_v10, %v3027_v49  ;;  %v3058_v51 = vrot.slane %v3038_v46, 4  ;;  %v3070_v31 = vrot.slane %v3049_v48, 4 }
 0xdb1   : > { %v3044_v52 = vperm.slane %v3040_v50, %v5636_v54  ;;  %v3068_v53 = vrot.slane %v3055_v23, 4 }
 0xdb2   : > { %v3071_v55 = vsel %vm1173_vm7, %v3055_v23, %v3070_v31 }
 0xdb3   : > { %v3069_v56 = vsel %vm1173_vm7, %v3068_v53, %v3049_v48  ;;  %v3059_v57 = vsel %vm1173_vm7, %v3044_v52, %v3058_v51  ;;  %v3079_v58 = vperm.slane %v3071_v55, %v5646_v16  ;;  %v3056_v59 = vrot.slane %v3044_v52, 4 }
 0xdb4   : > { %v3067_v60 = vperm.slane %v3059_v57, %v5646_v16  ;;  %v3075_v34 = vperm.slane %v3069_v56, %v5646_v16 }
 0xdb5   : > { %v3084_v63 = vrot.slane %v3079_v58, 4  ;;  %v3057_v61 = vsel %vm1173_vm7, %v3056_v59, %v3038_v46 }
 0xdb6   : > { %v3063_v1 = vperm.slane %v3057_v61, %v5646_v16  ;;  %v3080_v25 = vrot.slane %v3075_v34, 4  ;;  %v3086_v62 = vrot.slane %v3067_v60, 4 }
 0xdb7   : > { %v3085_v13 = vsel %vm1173_vm7, %v3084_v63, %v3067_v60 }
 0xdb8   : > { %v3090_v15 = vpack.c.bf16 %v3085_v13, %v3085_v13  ;;  %v3081_v30 = vsel %vm1173_vm7, %v3080_v25, %v3063_v1  ;;  %v3087_v18 = vsel %vm1173_vm7, %v3079_v58, %v3086_v62  ;;  %v3082_v19 = vrot.slane %v3063_v1, 4 }
 0xdb9   : > { %v3088_v44 = vpack.c.bf16 %v3081_v30, %v3081_v30  ;;  %v3091_v20 = vpack.c.bf16 %v3087_v18, %v3087_v18 }
 0xdba   : > { %4326 = vmatmul.msk.bf16.vlgmr.msrb.gmra.mxu0 %vm1539_vm8, %v3090_v15  ;;  %v3083_v2 = vsel %vm1173_vm7, %v3075_v34, %v3082_v19 }
 0xdbb   : > { %4324 = vmatmul.msk.bf16.vlgmr.msrb.gmra.mxu2 %vm1539_vm8, %v3088_v44  ;;  %4327 = vmatmul.msk.bf16.vlgmr.msra.gmra.mxu1 %vm1539_vm8, %v3091_v20  ;;  %v3089_v32 = vpack.c.bf16 %v3083_v2, %v3083_v2 }
 0xdbd   : > { %4325 = vmatmul.msk.bf16.vlgmr.msrb.gmra.mxu3 %vm1539_vm8, %v3089_v32 }
 0xe37   : > { %v3395_v21 = vpop.f32.mrf.mxu0 }
 0xe38   : > { %v3414_v12 = vpop.f32.mrf.mxu1  ;;  %v3424_v4 = vsel %vm1539_vm8, %v3395_v21, -inf }
 0xe39   : > { %3425 = vmax.xlane.f32.xlu0 %v3424_v4  ;;  %v3427_v47 = vsel %vm1539_vm8, %v3414_v12, -inf }
 0xe3e   : > { %v3357_v6 = vpop.f32.mrf.mxu2 }
 0xe3f   : > { %v3397_v7 = vpop.f32.mrf.mxu0  ;;  %v3418_v8 = vsel %vm1539_vm8, %v3357_v6, -inf }
 0xe40   : > { %v3376_v9 = vpop.f32.mrf.mxu3  ;;  %v3416_v24 = vpop.f32.mrf.mxu1  ;;  %3419 = vmax.xlane.f32.xlu2 %v3418_v8 }
 0xe41   : > { %3428 = vmax.xlane.f32.xlu0 %v3427_v47  ;;  %v3421_v29 = vsel %vm1539_vm8, %v3376_v9, -inf }
 0xe42   : > { %3422 = vmax.xlane.f32.xlu1 %v3421_v29 }
 0xe46   : > { %v3359_v27 = vpop.f32.mrf.mxu2 }
 0xe48   : > { %v3378_v36 = vpop.f32.mrf.mxu3 }
 0xe55   : > { %4648 = vrot.lane.b32.xlu0 %v4647_v28, %s5239_s24 }
 0xe58   : > { %4653 = vrot.lane.b32.xlu2 %v4652_v37, %s5239_s24  ;;  %s984_s24 = scalar_lea.vmem [#allocation23], %s4185_s3 }
 0xeac   : > { %v3426_v38 = vpop.xlane.xlu0 %3425 }
 0xead   : > { %v3432_v40 = vsub.f32 %v3395_v21, %v3426_v38 }
 0xeaf   : > { %v3438_v33 = vmul.f32 1.442695, %v3432_v40 }
 0xeb1   : > { %4709 = vpow2.f32 %v3438_v33 }
 0xeb3   : > { %v3420_v14 = vpop.xlane.xlu2 %3419 }
 0xeb4   : > { %v3430_v35 = vsub.f32 %v3357_v6, %v3420_v14  ;;  %v3429_v43 = vpop.xlane.xlu0 %3428 }
 0xeb5   : > { %v3423_v45 = vpop.xlane.xlu1 %3422  ;;  %v3433_v22 = vsub.f32 %v3414_v12, %v3429_v43 }
 0xeb6   : > { %v3434_v46 = vmul.f32 1.442695, %v3430_v35  ;;  %v3431_v10 = vsub.f32 %v3376_v9, %v3423_v45 }
 0xeb7   : > { %v6288_v48 = vpop.eup %4709  ;;  %v3440_v3 = vmul.f32 1.442695, %v3433_v22 }
 0xeb8   : > { %4711 = vpow2.f32 %v3434_v46  ;;  %v3436_v0 = vmul.f32 1.442695, %v3431_v10  ;;  %v3448_v17 = vsel %vm1539_vm8, %v6288_v48, 0.0 }
 0xeb9   : > { %3449 = vadd.xlane.f32.xlu1 %v3448_v17 }
 0xeba   : > { %4713 = vpow2.f32 %v3436_v0 }
 0xebb   : > { %4715 = vpow2.f32 %v3440_v3  ;;  %v4654_v50 = vpop.permute.xlu2 %4653 }
 0xebc   : > { %v4656_v31 = vunpack.i.h.bf16 %v4654_v50  ;;  %v4655_v52 = vunpack.i.l.bf16 %v4654_v50 }
 0xebe   : > { %v6292_v5 = vpop.eup %4711  ;;  %v3240_v56 = vrot.slane %v4656_v31, 4  ;;  %v3228_v57 = vrot.slane %v4655_v52, 4 }
 0xebf   : > { %v3442_v49 = vsel %vm1539_vm8, %v6292_v5, 0.0 }
 0xec0   : > { %v6296_v23 = vpop.eup %4713  ;;  %3443 = vadd.xlane.f32.xlu0 %v3442_v49 }
 0xec1   : > { %v3445_v51 = vsel %vm1539_vm8, %v6296_v23, 0.0  ;;  %v6300_v53 = vpop.eup %4715 }
 0xec2   : > { %3446 = vadd.xlane.f32.xlu1 %v3445_v51  ;;  %v3451_v60 = vsel %vm1539_vm8, %v6300_v53, 0.0 }
 0xec7   : > { %v4649_v55 = vpop.permute.xlu0 %4648 }
 0xec8   : > { %v4651_v58 = vunpack.i.h.bf16 %v4649_v55  ;;  %v4650_v59 = vunpack.i.l.bf16 %v4649_v55 }
 0xeca   : > { %v3241_v34 = vsel %vm1173_vm7, %v3240_v56, %v4651_v58  ;;  %v3242_v63 = vrot.slane %v4651_v58, 4  ;;  %v3229_v61 = vsel %vm1173_vm7, %v3228_v57, %v4650_v59  ;;  %v3230_v1 = vrot.slane %v4650_v59, 4  ;;  %3452 = vadd.xlane.f32.xlu1 %v3451_v60 }
 0xecb   : > { %v3247_v25 = vperm.slane %v3241_v34, %v5636_v54  ;;  %v3235_v62 = vperm.slane %v3229_v61, %v5636_v54 }
 0xecc   : > { %v3243_v13 = vsel %vm1173_vm7, %v4656_v31, %v3242_v63  ;;  %v3231_v15 = vsel %vm1173_vm7, %v4655_v52, %v3230_v1 }
 0xecd   : > { %v3251_v30 = vperm.slane %v3243_v13, %v5636_v54  ;;  %v3252_v18 = vrot.slane %v3247_v25, 4  ;;  %v3239_v19 = vperm.slane %v3231_v15, %v5636_v54  ;;  %v3254_v44 = vrot.slane %v3235_v62, 4 }
 0xecf   : > { %v3264_v20 = vrot.slane %v3251_v30, 4  ;;  %v3253_v2 = vsel %vm1173_vm7, %v3252_v18, %v3235_v62  ;;  %v3255_v32 = vsel %vm1173_vm7, %v3247_v25, %v3254_v44  ;;  %v3266_v21 = vrot.slane %v3239_v19, 4 }
 0xed0   : > { %v3259_v12 = vperm.slane %v3253_v2, %v5646_v16  ;;  %v3263_v4 = vperm.slane %v3255_v32, %v5646_v16 }
 0xed1   : > { %v3265_v6 = vsel %vm1173_vm7, %v3264_v20, %v3239_v19  ;;  %v3267_v7 = vsel %vm1173_vm7, %v3251_v30, %v3266_v21 }
 0xed2   : > { %v3271_v8 = vperm.slane %v3265_v6, %v5646_v16  ;;  %v3275_v9 = vperm.slane %v3267_v7, %v5646_v16  ;;  %v3276_v24 = vrot.slane %v3259_v12, 4  ;;  %v3278_v47 = vrot.slane %v3263_v4, 4 }
 0xed4   : > { %v3279_v29 = vsel %vm1173_vm7, 0.0, %v3278_v47  ;;  %v3280_v27 = vrot.slane %v3271_v8, 4  ;;  %v3282_v36 = vrot.slane %v3275_v9, 4  ;;  %v3284_v28 = vsel %vm1173_vm7, %v3278_v47, %v3259_v12 }
 0xed5   : > { %v3289_v37 = vrot.slane %v3279_v29, 4  ;;  %v3277_v38 = vsel %vm1173_vm7, 0.0, %v3276_v24  ;;  %v3288_v33 = vperm.slane %v3284_v28, %v5636_v54 }
 0xed6   : > { %v3283_v40 = vsel %vm1173_vm7, 0.0, %v3282_v36  ;;  %v3295_v14 = vsel %vm1173_vm7, %v3282_v36, %v3271_v8  ;;  %v3281_v46 = vsel %vm1173_vm7, 0.0, %v3280_v27 }
 0xed7   : > { %v3300_v35 = vrot.slane %v3283_v40, 4  ;;  %v3290_v43 = vsel %vm1173_vm7, %v3289_v37, %v3277_v38  ;;  %v3299_v45 = vperm.slane %v3295_v14, %v5636_v54  ;;  %v3308_v22 = vrot.slane %v3288_v33, 4 }
 0xed8   : > { %v3294_v10 = vperm.slane %v3290_v43, %v5636_v54 }
 0xed9   : > { %v3301_v0 = vsel %vm1173_vm7, %v3300_v35, %v3281_v46  ;;  %v3320_v17 = vrot.slane %v3299_v45, 4 }
 0xeda   : > { %v3305_v3 = vperm.slane %v3301_v0, %v5636_v54  ;;  %v3309_v49 = vsel %vm1173_vm7, %v3294_v10, %v3308_v22  ;;  %v3306_v50 = vrot.slane %v3294_v10, 4 }
 0xedb   : > { %v3317_v51 = vperm.slane %v3309_v49, %v5646_v16 }
 0xedc   : > { %v3321_v31 = vsel %vm1173_vm7, %v3305_v3, %v3320_v17  ;;  %v3307_v52 = vsel %vm1173_vm7, %v3306_v50, %v3288_v33  ;;  %v3318_v55 = vrot.slane %v3305_v3, 4 }
 0xedd   : > { %v3329_v56 = vperm.slane %v3321_v31, %v5646_v16  ;;  %v3336_v57 = vrot.slane %v3317_v51, 4  ;;  %v3313_v58 = vperm.slane %v3307_v52, %v5646_v16 }
 0xede   : > { %v3319_v59 = vsel %vm1173_vm7, %v3318_v55, %v3299_v45 }
 0xedf   : > { %v3337_v60 = vsel %vm1173_vm7, %v3329_v56, %v3336_v57  ;;  %v3325_v34 = vperm.slane %v3319_v59, %v5646_v16  ;;  %v3332_v63 = vrot.slane %v3313_v58, 4  ;;  %v3334_v61 = vrot.slane %v3329_v56, 4 }
 0xee0   : > { %v3341_v1 = vpack.c.bf16 %v3337_v60, %v3337_v60 }
 0xee1   : > { %v3333_v25 = vsel %vm1173_vm7, %v3325_v34, %v3332_v63  ;;  %v3335_v62 = vsel %vm1173_vm7, %v3334_v61, %v3317_v51  ;;  %v3330_v13 = vrot.slane %v3325_v34, 4 }
 0xee2   : > { %v3527_v15 = vsel %vm1667_vm9, %v3341_v1, 0  ;;  %v3339_v30 = vpack.c.bf16 %v3333_v25, %v3333_v25  ;;  %v3340_v18 = vpack.c.bf16 %v3335_v62, %v3335_v62 }
 0xee3   : > { %3536 = vmatpush.bf16.msrb.mxu1 %v3527_v15  ;;  %v3331_v19 = vsel %vm1173_vm7, %v3330_v13, %v3313_v58 }
 0xee4   : > { %v3489_v44 = vsel %vm1667_vm9, %v3339_v30, 0  ;;  %v3508_v20 = vsel %vm1667_vm9, %v3340_v18, 0  ;;  %v3338_v2 = vpack.c.bf16 %v3331_v19, %v3331_v19 }
 0xee5   : > { %3498 = vmatpush.bf16.msra.mxu3 %v3489_v44  ;;  %3517 = vmatpush.bf16.msra.mxu0 %v3508_v20 }
 0xee6   : > { %v3470_v32 = vsel %vm1667_vm9, %v3338_v2, 0 }
 0xee7   : > { %3479 = vmatpush.bf16.msra.mxu2 %v3470_v32 }
 0xf2c   : > { %v3450_v21 = vpop.xlane.xlu1 %3449 }
 0xf2d   : > { %4717 = vrcp.f32 %v3450_v21 }
 0xf33   : > { %v4718_v12 = vpop.eup %4717  ;;  %v3444_v4 = vpop.xlane.xlu0 %3443 }
 0xf34   : > { %v3460_v6 = vmul.f32 %v4718_v12, %v6288_v48  ;;  %4719 = vrcp.f32 %v3444_v4 }
 0xf35   : > { %v3447_v7 = vpop.xlane.xlu1 %3446 }
 0xf36   : > { %v3464_v8 = vpack.c.bf16 %v3460_v6, %v3460_v6  ;;  %4721 = vrcp.f32 %v3447_v7 }
 0xf38   : > { %4330 = vmatmul.msk.bf16.vlgmr.msra.gmra.mxu0 %vm1539_vm8, %v3464_v8 }
 0xf3a   : > { %v4720_v9 = vpop.eup %4719 }
 0xf3b   : > { %v3458_v24 = vmul.f32 %v4720_v9, %v6292_v5 }
 0xf3c   : > { %v4722_v47 = vpop.eup %4721 }
 0xf3d   : > { %v3462_v29 = vpack.c.bf16 %v3458_v24, %v3458_v24  ;;  %v3459_v27 = vmul.f32 %v4722_v47, %v6296_v23  ;;  %v3453_v36 = vpop.xlane.xlu1 %3452 }
 0xf3e   : > { %4723 = vrcp.f32 %v3453_v36 }
 0xf3f   : > { %v3463_v28 = vpack.c.bf16 %v3459_v27, %v3459_v27  ;;  %4328 = vmatmul.msk.bf16.vlgmr.msra.gmra.mxu2 %vm1539_vm8, %v3462_v29 }
 0xf41   : > { %4329 = vmatmul.msk.bf16.vlgmr.msra.gmra.mxu3 %vm1539_vm8, %v3463_v28 }
 0xf44   : > { %v4724_v48 = vpop.eup %4723 }
 0xf45   : > { %v3461_v37 = vmul.f32 %v4724_v48, %v6300_v53 }
 0xf47   : > { %v3465_v38 = vpack.c.bf16 %v3461_v37, %v3461_v37 }
 0xf49   : > { %4331 = vmatmul.msk.bf16.vlgmr.msrb.gmra.mxu1 %vm1539_vm8, %v3465_v38 }
 0xfb5   : > { %v3519_v40 = vpop.f32.mrf.mxu0 }
 0xfb6   : > { %v3542_v5 = vrot.slane %v3519_v40, 4 }
 0xfbd   : > { %v3521_v33 = vpop.f32.mrf.mxu0 }
 0xfc2   : > { %v3481_v14 = vpop.f32.mrf.mxu2 }
 0xfc3   : > { %v3543_v35 = vsel %vm1173_vm7, %v3542_v5, %v3481_v14  ;;  %v3544_v23 = vrot.slane %v3481_v14, 4 }
 0xfc4   : > { %v3500_v43 = vpop.f32.mrf.mxu3  ;;  %v3549_v10 = vperm.slane %v3543_v35, %v5636_v54 }
 0xfc5   : > { %v3545_v45 = vsel %vm1173_vm7, %v3519_v40, %v3544_v23  ;;  %v3556_v46 = vrot.slane %v3500_v43, 4 }
 0xfc6   : > { %v3553_v22 = vperm.slane %v3545_v45, %v5636_v54  ;;  %v3538_v0 = vpop.f32.mrf.mxu1  ;;  %v3568_v51 = vrot.slane %v3549_v10, 4 }
 0xfc7   : > { %v3554_v53 = vrot.slane %v3538_v0, 4  ;;  %v3557_v17 = vsel %vm1173_vm7, %v3538_v0, %v3556_v46  ;;  %v4733_v0 = vld [vmem:[%s5799_s25] sm:$0xff]  ;;  %s3928_s25 = sshll.u32 %s984_s24, 4  ;;  %s3929_s25 = int_to_ptr.vmem [resolvable:$true] %s3928_s25 }
 0xfc8   : > { %v3580_v3 = vrot.slane %v3553_v22, 4  ;;  %v3565_v49 = vperm.slane %v3557_v17, %v5636_v54  ;;  %v4408_v17 = vld [vmem:[#allocation22 + $0x8] sm:$0xff]  ;;  %vm3879_vm9 = vcmp.ge.s32.totalorder %v4733_v0, 0 }
 0xfc9   : > { %v3555_v50 = vsel %vm1173_vm7, %v3554_v53, %v3500_v43  ;;  %3689 = vmatpush.bf16.msrb.mxu2 %v4408_v17 }
 0xfca   : > { %v3561_v31 = vperm.slane %v3555_v50, %v5636_v54  ;;  %v3578_v52 = vrot.slane %v3565_v49, 4  ;;  %v3581_v55 = vsel %vm1173_vm7, %v3565_v49, %v3580_v3  ;;  %v3483_v56 = vpop.f32.mrf.mxu2 }
 0xfcb   : > { %v3589_v57 = vperm.slane %v3581_v55, %v5646_v16  ;;  %v6405_v56 = vsel %vm3879_vm9, 1.0, %v5243_v41  ;;  %v4410_v41 = vld [vmem:[%s6508_s21 + $0x8] sm:$0xff] }
 0xfcc   : > { %v3566_v58 = vrot.slane %v3561_v31, 4  ;;  %v3569_v59 = vsel %vm1173_vm7, %v3561_v31, %v3568_v51  ;;  %v3579_v60 = vsel %vm1173_vm7, %v3578_v52, %v3553_v22  ;;  %v3502_v34 = vpop.f32.mrf.mxu3  ;;  %3745 = vmatpush.bf16.msrb.mxu3 %v4410_v41 }
 0xfcd   : > { %v3577_v63 = vperm.slane %v3569_v59, %v5646_v16  ;;  %v3585_v61 = vperm.slane %v3579_v60, %v5646_v16  ;;  %v3596_v1 = vrot.slane %v3589_v57, 4 }
 0xfce   : > { %v3567_v25 = vsel %vm1173_vm7, %v3566_v58, %v3549_v10  ;;  %v3540_v62 = vpop.f32.mrf.mxu1 }
 0xfcf   : > { %v3573_v13 = vperm.slane %v3567_v25, %v5646_v16  ;;  %v3592_v15 = vrot.slane %v3577_v63, 4  ;;  %v3594_v30 = vrot.slane %v3585_v61, 4  ;;  %v3597_v18 = vsel %vm1173_vm7, 0.0, %v3596_v1 }
 0xfd0   : > { %v3609_v19 = vsel %vm1173_vm7, %v3596_v1, %v3585_v61  ;;  %v3614_v44 = vrot.slane %v3597_v18, 4  ;;  %v4413_v18 = vld [vmem:[%s6509_s22 + $0x10] sm:$0xff] }
 0xfd1   : > { %v3590_v20 = vrot.slane %v3573_v13, 4  ;;  %v3593_v2 = vsel %vm1173_vm7, 0.0, %v3592_v15  ;;  %v3595_v32 = vsel %vm1173_vm7, 0.0, %v3594_v30  ;;  %v3613_v21 = vperm.slane %v3609_v19, %v5636_v54  ;;  %v4414_v30 = vld [vmem:[%s6509_s22 + $0x18] sm:$0xff] }
 0xfd2   : > { %v3603_v12 = vrot.slane %v3593_v2, 4  ;;  %v3598_v4 = vsel %vm1173_vm7, %v3592_v15, %v3573_v13  ;;  %v3615_v6 = vsel %vm1173_vm7, %v3614_v44, %v3595_v32  ;;  %3793 = vmatpush.bf16.msrb.mxu0 %v4414_v30  ;;  %v4412_v2 = vld [vmem:[%s6509_s22 + $0x8] sm:$0xff] }
 0xfd3   : > { %v3591_v7 = vsel %vm1173_vm7, 0.0, %v3590_v20  ;;  %v3602_v8 = vperm.slane %v3598_v4, %v5636_v54  ;;  %v3619_v9 = vperm.slane %v3615_v6, %v5636_v54  ;;  %v3634_v24 = vrot.slane %v3613_v21, 4 }
 0xfd4   : > { %v3604_v47 = vsel %vm1173_vm7, %v3603_v12, %v3591_v7 }
 0xfd5   : > { %v3608_v29 = vperm.slane %v3604_v47, %v5636_v54  ;;  %v3622_v27 = vrot.slane %v3602_v8, 4  ;;  %v3635_v36 = vsel %vm1173_vm7, %v3619_v9, %v3634_v24  ;;  %v3632_v28 = vrot.slane %v3619_v9, 4 }
 0xfd6   : > { %v3643_v48 = vperm.slane %v3635_v36, %v5646_v16  ;;  %3794 = vmatpush.bf16.msrb.mxu0 %v4413_v18 }
 0xfd7   : > { %v3623_v37 = vsel %vm1173_vm7, %v3608_v29, %v3622_v27  ;;  %v3620_v38 = vrot.slane %v3608_v29, 4  ;;  %v3633_v40 = vsel %vm1173_vm7, %v3632_v28, %v3613_v21  ;;  %v4411_v27 = vld [vmem:[%s6509_s22] sm:$0xff] }
 0xfd8   : > { %v3631_v33 = vperm.slane %v3623_v37, %v5646_v16  ;;  %v3648_v5 = vrot.slane %v3643_v48, 4  ;;  %v3639_v14 = vperm.slane %v3633_v40, %v5646_v16 }
 0xfd9   : > { %v3621_v35 = vsel %vm1173_vm7, %v3620_v38, %v3602_v8  ;;  %v4663_v8 = vld [vmem:[%s6566_s1] ss:$0 sm:$0xff]  ;;  %s3912_s1 = scalar_lea.sflag [#allocation4], %s982_s28 }
 0xfda   : > { %v3649_v54 = vsel %vm1173_vm7, %v3648_v5, %v3631_v33  ;;  %v3627_v23 = vperm.slane %v3621_v35, %v5646_v16  ;;  %v3644_v43 = vrot.slane %v3639_v14, 4  ;;  %v3650_v22 = vrot.slane %v3631_v33, 4  ;;  %v4407_v16 = vld [vmem:[#allocation22] sm:$0xff]  ;;  %3795 = vmatpush.bf16.msrb.mxu0 %v4412_v2  ;;  %v4416_v35 = vld [vmem:[#allocation5 + $0x8] sm:$0xff] }
 0xfdb   : > { %3657 = vrot.lane.b32.xlu1 %v3649_v54, %s5244_s26  ;;  %3690 = vmatpush.bf16.msrb.mxu2 %v4407_v16  ;;  %v4415_v54 = vld [vmem:[#allocation5] sm:$0xff]  ;;  %s4378_s26 = sshll.u32 %s5398_s7, 3 }
 0xfdc   : > { %v3646_v45 = vrot.slane %v3627_v23, 4  ;;  %v3645_v46 = vsel %vm1173_vm7, %v3644_v43, %v3627_v23  ;;  %v3651_v53 = vsel %vm1173_vm7, %v3643_v48, %v3650_v22  ;;  %3852 = vmatpush.bf16.msra.mxu1 %v4416_v35  ;;  %v4664_v16 = vld [vmem:[%s6568_s4] ss:$0 sm:$0xff]  ;;  %s3926_s20 = scalar_lea.hbm %s6570_s0, %s4378_s26 }
 0xfdd   : > { %s3930_s23 = sshll.u32 %s3926_s20, 4  ;;  %s3931_s23 = int_to_ptr.hbm [resolvable:$true] %s3930_s23 }
 0xfde   : > { %v3647_v10 = vsel %vm1173_vm7, %v3639_v14, %v3646_v45  ;;  %vm3884_vm7 = vcmask 7168   ;;  %3796 = vmatpush.bf16.msrb.mxu0 %v4411_v27  ;;  %s5138_s11 = sshra.s32 %s3931_s23, 4  ;;  %s5139_s11 = int_to_ptr.hbm [resolvable:$true] %s5138_s11 }
 0xfdf   : > { %3653 = vrot.lane.b32.xlu2 %v3647_v10, %s5245_s8  ;;  %v3892_v60 = vsel %vm3884_vm7, %v6405_v56, 0.0  ;;  %s5140_s27 = scalar_lea.hbm %s5139_s11, 8  ;;  %p5145_p3 = scmp.lt.s32.totalorder %s5139_s11, %s6570_s0 }
 0xfe0   : > { %v3893_v63 = vrot.slane %v3892_v60, 4  ;;  %3853 = vmatpush.bf16.msra.mxu1 %v4415_v54  ;;  %p5141_p0 = scmp.ne.s32.totalorder %s5139_s11, %s5140_s27  ;;  %p5146_p4 = scmp.lt.s32.totalorder %s5144_s6, %s5140_s27 }
 0xfe2   : > { %v3894_v1 = vadd.f32 %v3893_v63, %v3892_v60  ;;  %p5142_p1 = pnand %p5141_p0, %p5415_p5  ;;  %p5147_p7 = por %p5146_p4, %p5145_p3 }
 0xfe3   : > { %3873 = vperm.xlu1 %4657, %v4733_v0  }
 0xfe4   : > { %v3895_v25 = vrot.slane %v3894_v1, 2  ;;  %p5143_p2 = pneg %p5142_p1 }
 0xfe6   : > { %v3896_v62 = vadd.f32 %v3895_v25, %v3894_v1  ;;  %p5148_p8 = pnand %p5147_p7, %p5143_p2 }
 0xfe7   : > { %3661 = vrot.lane.b32.xlu2 %v3651_v53, %s5246_s5 }
 0xfe8   : > { %v3897_v13 = vrot.slane %v3896_v62, 1 }
 0xfea   : > { %v3898_v15 = vadd.f32 %v3897_v13, %v3896_v62 }
0x1039   : > { %v3654_v3 = vpop.permute.xlu2 %3653 }
0x103a   : > { %v3664_v49 = vsel %vm1539_vm8, %v3645_v46, %v3654_v3 }
0x1041   : > { %v3662_v51 = vpop.permute.xlu2 %3661 }
0x104d   : > { %v3658_v50 = vpop.permute.xlu1 %3657 }
0x104e   : > { %v3665_v31 = vsel %vm1864_vm13, %v3664_v49, %v3658_v50 }
0x104f   : > { %v3666_v52 = vsel %vm1866_vm14, %v3665_v31, %v3662_v51 }
0x1050   : > { %v3667_v55 = vpack.c.bf16 %v3666_v52, %v3666_v52 }
0x1052   : > { %4340 = vmatmul.msk.bf16.vlgmr.msrb.gmra.mxu2 %vm1093_vm2, %v3667_v55 }
0x1055   : > { %v3874_v31 = vpop.permute.xlu1 %3873 }
0x1056   : > { %vm3875_vm1 = vcmp.eq.s32.totalorder %v5607_v11, %v3874_v31 }
0x10d5   : > { %v3692_v57 = vpop.f32.mrf.mxu2 }
0x10d6   : > { %v3696_v58 = vadd.f32 %v3692_v57, %v6220_v42  ;;  %v4409_v42 = vld [vmem:[%s6508_s21] sm:$0xff] }
0x10d7   : > { %3746 = vmatpush.bf16.msrb.mxu3 %v4409_v42 }
0x10d8   : > { %v3698_v59 = vmul.f32 %v3696_v58, %v3696_v58 }
0x10da   : > { %v3699_v34 = vsel %vm1093_vm2, %v3698_v59, 0.0 }
0x10db   : > { %3700 = vadd.xlane.f32.xlu2 %v3699_v34 }
0x10dd   : > { %v3694_v61 = vpop.f32.mrf.mxu2 }
0x10f3   : > { %3906 = vperm.xlu2 %4626, %v3898_v15  }
0x114e   : > { %v3701_v19 = vpop.xlane.xlu2 %3700 }
0x114f   : > { %v3702_v44 = vmul.f32 %v3701_v19, %v5615_v26 }
0x1151   : > { %v3703_v20 = vadd.f32 1e-06, %v3702_v44 }
0x1153   : > { %4725 = vrsqrt.f32 %v3703_v20  ;;  %vm3710_vm13 = vweird.f32 %v3703_v20 }
0x1159   : > { %v4726_v32 = vpop.eup %4725 }
0x115a   : > { %v3705_v21 = vmul.f32 %v4726_v32, %v3703_v20  ;;  %vm3711_vm8 = vweird.f32 %v4726_v32 }
0x115b   : > { %vm3712_vm14 = vmor %vm3710_vm13, %vm3711_vm8 }
0x115c   : > { %v3706_v12 = vmul.f32 %v4726_v32, %v3705_v21 }
0x115e   : > { %v3707_v4 = vmul.f32 0.5, %v3706_v12 }
0x1160   : > { %v3708_v6 = vsub.f32 1.5, %v3707_v4 }
0x1162   : > { %v3709_v7 = vmul.f32 %v4726_v32, %v3708_v6 }
0x1164   : > { %v3713_v9 = vsel %vm3712_vm14, %v4726_v32, %v3709_v7 }
0x1165   : > { %v3714_v24 = vmul.f32 %v3713_v9, %v3696_v58 }
0x1167   : > { %v3718_v47 = vmul.f32 %v4663_v8, %v3714_v24 }
0x1169   : > { %v3723_v29 = vpack.c.bf16 %v3718_v47, %v3718_v47 }
0x116b   : > { %4349 = vmatmul.msk.bf16.vlgmr.msrb.gmra.mxu3 %vm1093_vm2, %v3723_v29 }
0x11ee   : > { %v3748_v36 = vpop.f32.mrf.mxu3 }
0x11ef   : > { %v3752_v28 = vmax.f32 %v3748_v36, 0.0 }
0x11f1   : > { %v3761_v48 = vpack.c.bf16 %v3752_v28, %v3752_v28 }
0x11f3   : > { %4366 = vmatmul.msk.bf16.vlgmr.msrb.gmra.mxu0 %vm1987_vm12, %v3761_v48 }
0x11f6   : > { %v3750_v37 = vpop.f32.mrf.mxu3 }
0x1270   : > { %v3798_v38 = vpop.f32.mrf.mxu0 }
0x1271   : > { %v3802_v40 = vadd.f32 %v3798_v38, %v3696_v58 }
0x1273   : > { %v3804_v33 = vmul.f32 %v3802_v40, %v3802_v40 }
0x1275   : > { %v3805_v5 = vsel %vm1093_vm2, %v3804_v33, 0.0 }
0x1276   : > { %3806 = vadd.xlane.f32.xlu0 %v3805_v5 }
0x1278   : > { %v3800_v14 = vpop.f32.mrf.mxu0 }
0x12e9   : > { %v3807_v23 = vpop.xlane.xlu0 %3806 }
0x12ea   : > { %v3808_v43 = vmul.f32 %v3807_v23, %v5615_v26 }
0x12ec   : > { %v3809_v45 = vadd.f32 1e-06, %v3808_v43 }
0x12ee   : > { %4727 = vrsqrt.f32 %v3809_v45  ;;  %vm3816_vm11 = vweird.f32 %v3809_v45 }
0x12f4   : > { %v4728_v46 = vpop.eup %4727 }
0x12f5   : > { %v3811_v10 = vmul.f32 %v4728_v46, %v3809_v45  ;;  %vm3817_vm10 = vweird.f32 %v4728_v46 }
0x12f6   : > { %vm3818_vm12 = vmor %vm3816_vm11, %vm3817_vm10 }
0x12f7   : > { %v3812_v22 = vmul.f32 %v4728_v46, %v3811_v10 }
0x12f9   : > { %v3813_v0 = vmul.f32 0.5, %v3812_v22 }
0x12fb   : > { %v3814_v53 = vsub.f32 1.5, %v3813_v0 }
0x12fd   : > { %v3815_v17 = vmul.f32 %v4728_v46, %v3814_v53 }
0x12ff   : > { %v3819_v3 = vsel %vm3818_vm12, %v4728_v46, %v3815_v17 }
0x1300   : > { %v3820_v49 = vmul.f32 %v3819_v3, %v3802_v40 }
0x1302   : > { %v3824_v26 = vmul.f32 %v4664_v16, %v3820_v49 }
0x1304   : > { %v3825_v50 = vmul.f32 0.17677669, %v3824_v26 }
0x1306   : > { %v3826_v51 = vpack.c.bf16 %v3825_v50, %v3825_v50 }
0x1308   : > { %4375 = vmatmul.msk.bf16.vlgmr.msra.gmra.mxu1 %vm1093_vm2, %v3826_v51 }
0x1385   : > { %v3855_v52 = vpop.f32.mrf.mxu1 }
0x1386   : > { %3859 = vst [vmem:[%s984_s24] sm:$0xff] %v3855_v52  ;;  %v3861_v55 = vsel %vm3860_vm0, %v3855_v52, -1e+09 }
0x1387   : > { %3862 = vmax.xlane.f32.xlu0 %v3861_v55  ;;  %v3876_v57 = vsel %vm3875_vm1, %v3861_v55, 0.0 }
0x1388   : > { %3877 = vadd.xlane.f32.xlu1 %v3876_v57 }
0x138d   : > { %v3857_v58 = vpop.f32.mrf.mxu1 }
0x13fa   : > { %v3863_v59 = vpop.xlane.xlu0 %3862 }
0x13fb   : > { %v3864_v60 = vsub.f32 %v3861_v55, %v3863_v59  ;;  %v3878_v62 = vpop.xlane.xlu1 %3877 }
0x13fd   : > { %v3865_v34 = vmul.f32 1.442695, %v3864_v60 }
0x13ff   : > { %4729 = vpow2.f32 %v3865_v34 }
0x1405   : > { %v4730_v63 = vpop.eup %4729 }
0x1406   : > { %3867 = vadd.xlane.f32.xlu0 %v4730_v63 }
0x1479   : > { %v3868_v61 = vpop.xlane.xlu0 %3867 }
0x147a   : > { %4731 = vlog2.f32 %v3868_v61 }
0x1480   : > { %v4732_v1 = vpop.eup %4731 }
0x1481   : > { %v3870_v11 = vmul.f32 0.6931472, %v4732_v1 }
0x1483   : > { %v3871_v25 = vadd.f32 %v3870_v11, %v3863_v59 }
0x1485   : > { %v3882_v13 = vsub.f32 %v3871_v25, %v3878_v62 }
0x1487   : > { %v3883_v15 = vmul.f32 %v6405_v56, %v3882_v13 }
0x1489   : > { %v3885_v41 = vsel %vm3884_vm7, %v3883_v15, 0.0 }
0x148a   : > { %v3886_v42 = vrot.slane %v3885_v41, 4 }
0x148c   : > { %v3887_v30 = vadd.f32 %v3886_v42, %v3885_v41 }
0x148d   : > { %5151 = shalt.err (!%p5148_p8)
}
0x148e   : > { %4469 = dma.vmem_to_hbm [thread:$0]  (%p5415_p5), %s3929_s25, 128, %s3931_s23, %s3912_s1   ;;  %v3888_v56 = vrot.slane %v3887_v30, 2  ;;  %v3907_v20 = vpop.permute.xlu2 %3906 }
0x148f   : > { %s4188_s29 = sshll.u32 %s5574_s9, 1  ;;  %s6571_s26 = sld [smem:[#allocation54_spill]] }
0x1490   : > { %v3889_v18 = vadd.f32 %v3888_v56, %v3887_v30 }
0x1492   : > { %v3890_v19 = vrot.slane %v3889_v18, 1 }
0x1494   : > { %v3891_v44 = vadd.f32 %v3890_v19, %v3889_v18 }
0x1495   : > { %s1002_s8 = scalar_lea.vmem %s6571_s26, %s4188_s29 }
0x1496   : > { %3901 = vperm.xlu0 %4605, %v3891_v44  }
0x1508   : > { %v3902_v2 = vpop.permute.xlu0 %3901 }
0x1509   : > { %v3909_v32 = vsel %vm2044_vm15, %v3902_v2, %v3907_v20 }
0x150a   : > { %3910 = vst [vmem:[%s1002_s8] sm:$0x3] %v3909_v32 }
0x150b PF: > { %s6572_s30 = sld [smem:[#allocation35_spill]] }
0x150c   : > { %s6573_s5 = sld [smem:[#allocation32_spill]] }
0x1511   : > { %p4541_p5 = scmp.ge.s32.totalorder %s6572_s30, 2 }
0x1512   : > { %s3945_s20 = sand.u32 1, %s6573_s5  }
0x1513   : > { %p4512_p9 = pnand %p4541_p5, %p5419_p6  ;;  %s3946_s9 = scalar_lea.sflag [#allocation4], %s3945_s20 }
0x1515   : > { %p4513_p10 = pneg %p4512_p9 }
0x1517   : > { %5197 = dma.done.wait (%p4513_p10), %s3946_s9, 128  }
0x1518   : > { %5199 = vsyncadd (%p4513_p10), %s3946_s9, 4294967168  ;;  %s6575_s30 = sld [smem:[#allocation36_spill]] }
0x1519   : > { %s6576_s29 = sld [smem:[#allocation33_spill]] }
0x151a   : > { %s6577_s2 = sld [smem:[#allocation34_spill]] }
0x151b   : > { %s6578_s6 = sld [smem:[#allocation37_spill]] }
0x151e   : > { %p43_p11 = scmp.ge.s32.totalorder %s6575_s30, 4  }
0x1520   :  { %45 = sbr.rel (!%p43_p11) target bundleno = 26 (0x1a), region = 219 }
0x1525   :  { %3959 = vsyncpa [#allocation3], 1 }
0x1526   :  { %3961 = vsyncpa [#allocation3 + $0x1], 1 }
0x1527   :  { %3962 = vsyncpa [#allocation6], 1 }
0x1528   :  { %3963 = vsyncpa [#allocation9], 1 }
0x1529   :  { %3964 = vsyncpa [#allocation12], 1 }
0x152a   :  { %3965 = vsyncpa [#allocation15], 1 }
0x152b   :  { %3966 = vsyncpa [#allocation18], 1 }
0x152c   :  { %3967 = vsyncpa [#allocation21], 1 }
0x152d   :  { %3968 = vsyncpa [#allocation4], 1 }
0x152e   :  { %3970 = vsyncpa [#allocation4 + $0x1], 1 }

</bundles_post_ra>
